<compile_context>
chip_gen: v7x
topology: tpu7x:2x2x1
jax: 0.10.0
libtpu: 0.0.40
codegen_flags: <defaults>
</compile_context>

<pallas_src>
import numpy as np

import jax
import jax.numpy as jnp
from jax.experimental import pallas as pl
from jax.experimental.pallas import tpu as pltpu

BN_EPS = 1e-5
LRELU_SLOPE = 0.2

# Static conv configuration (Python ints stay OUT of the jitted pytrees).
#   (c_in, c_out, kernel, stride, pad, has_bn)
CONV_CFG = (
    (1, 16, 3, 2, 1, False),
    (16, 32, 3, 2, 1, True),
    (32, 64, 3, 2, 1, True),
    (64, 128, 4, 1, 0, True),
)


def conv_out_hw(h, w, k, s, p):
    return (h + 2 * p - k) // s + 1, (w + 2 * p - k) // s + 1


# ----------------------------------------------------------------------------
# Host-side constants: per-tap 0/1 selection matrices (implicit padding) and
# BN-folded per-tap weight matrices.
# ----------------------------------------------------------------------------
def build_tap_selectors(h, w, k, s, p):
    """G[kh*k+kw, ho*Wo+wo, hi*W+wi] = 1 for the tap's input position (zero row if the
    tap falls in the zero-padding region)."""
    ho, wo = conv_out_hw(h, w, k, s, p)
    g = np.zeros((k * k, ho * wo, h * w), np.float32)
    for kh in range(k):
        for kw in range(k):
            t = kh * k + kw
            for i in range(ho):
                hi = s * i + kh - p
                if not (0 <= hi < h):
                    continue
                for j in range(wo):
                    wi = s * j + kw - p
                    if 0 <= wi < w:
                        g[t, i * wo + j, hi * w + wi] = 1.0
    return g


def make_raw_params(key):
    """Deterministic synthetic parameters in the PyTorch layout."""
    conv = []
    for (cin, cout, k, s, p, has_bn) in CONV_CFG:
        key, kw_, kb_, kg_, kbe_ = jax.random.split(key, 5)
        conv.append(dict(
            w=0.05 * jax.random.normal(kw_, (cout, cin, k, k), jnp.float32),
            b=0.01 * jax.random.normal(kb_, (cout,), jnp.float32),
            gamma=1.0 + 0.05 * jax.random.normal(kg_, (cout,), jnp.float32),
            beta=0.01 * jax.random.normal(kbe_, (cout,), jnp.float32),
            mean=jnp.zeros((cout,), jnp.float32),   # eval-mode running stats
            var=jnp.ones((cout,), jnp.float32),
        ))
    key, kw_, kb_ = jax.random.split(key, 3)
    lin_w = 0.05 * jax.random.normal(kw_, (1, 128), jnp.float32)
    lin_b = 0.01 * jax.random.normal(kb_, (1,), jnp.float32)
    return conv, lin_w, lin_b


def prepare_params(raw_conv, lin_w, lin_b, h_in=28, w_in=28):
    """Fold eval-mode BN into W/b, build per-tap weights + selection matrices, cast the
    matmul operands to bf16 (biases stay f32)."""
    # Per-layer input spatial sizes.
    sizes = []
    h, w = h_in, w_in
    for (cin, cout, k, s, p, _) in CONV_CFG:
        sizes.append((h, w))
        h, w = conv_out_hw(h, w, k, s, p)
    assert (h, w) == (1, 1), "Discriminator expects 28x28 inputs"

    folded = []
    for (cin, cout, k, s, p, has_bn), lyr in zip(CONV_CFG, raw_conv):
        wgt, b = lyr["w"], lyr["b"]
        if has_bn:
            scale = lyr["gamma"] * jax.lax.rsqrt(lyr["var"] + BN_EPS)   # (cout,)
            wgt = wgt * scale[:, None, None, None]
            b = (b - lyr["mean"]) * scale + lyr["beta"]
        # (Cout, Cin, kh, kw) -> (kh, kw, Cin, Cout) -> (k*k, Cin, Cout); tap t = kh*k+kw
        w_taps = jnp.transpose(wgt, (2, 3, 1, 0)).reshape(k * k, cin, cout)
        folded.append((w_taps.astype(jnp.bfloat16),
                       b.reshape(1, cout).astype(jnp.float32)))

    # Layer 1: wrapper-side im2col -> one (k*k*Cin, Cout) weight matrix (Cin = 1).
    c1, o1, k1, _, _, _ = CONV_CFG[0]
    w1 = folded[0][0].reshape(k1 * k1 * c1, o1)          # (9, 16) bf16
    b1 = folded[0][1]

    # Layers 2-3: in-kernel patch extraction via per-tap 0/1 selection matmuls.
    g_list = []
    for li in (1, 2):
        _, _, k, s, p, _ = CONV_CFG[li]
        hh, ww = sizes[li]
        g_list.append(jnp.asarray(build_tap_selectors(hh, ww, k, s, p), jnp.bfloat16))
    g2, g3 = g_list

    wl = lin_w.reshape(1, 128).astype(jnp.float32)
    bl = lin_b.reshape(1, 1).astype(jnp.float32)

    return (w1, b1,
            g2, folded[1][0], folded[1][1],
            g3, folded[2][0], folded[2][1],
            folded[3][0], folded[3][1],
            wl, bl)


# ----------------------------------------------------------------------------
# Wrapper-side im2col for layer 1 only (plain XLA on the network input).
# ----------------------------------------------------------------------------
def im2col_nhwc(x, k, stride, pad):
    """x: (N, H, W, C) -> (N, Ho*Wo, k*k*C), flattened in (kh, kw, c) order."""
    n, h, w, c = x.shape
    xp = jnp.pad(x, ((0, 0), (pad, pad), (pad, pad), (0, 0)))
    ho = (h + 2 * pad - k) // stride + 1
    wo = (w + 2 * pad - k) // stride + 1
    cols = []
    for kh in range(k):
        for kw in range(k):
            cols.append(xp[:, kh:kh + stride * ho:stride,
                           kw:kw + stride * wo:stride, :])      # (N, Ho, Wo, C)
    patches = jnp.concatenate(cols, axis=-1)                    # (N, Ho, Wo, k*k*C)
    return patches.reshape(n, ho * wo, k * k * c), ho, wo


# ----------------------------------------------------------------------------
# Single fused kernel: conv1..conv4 + BN(folded) + LeakyReLU + Linear + Sigmoid.
# One grid step == one sample; everything stays in VMEM / vregs.
# ----------------------------------------------------------------------------
def discriminator_kernel(p1_ref, w1_ref, b1_ref,
                         g2_ref, w2_ref, b2_ref,
                         g3_ref, w3_ref, b3_ref,
                         w4_ref, b4_ref,
                         wl_ref, bl_ref, o_ref):
    def lrelu(v):
        return jnp.where(v > 0, v, LRELU_SLOPE * v)

    # ---- layer 1: precomputed patches (Ho*Wo, 9) @ folded W1 (9, 16) ----
    y = jnp.dot(p1_ref[0], w1_ref[...], preferred_element_type=jnp.float32)
    a = lrelu(y + b1_ref[...]).astype(jnp.bfloat16)            # (196, 16)

    # ---- layers 2-3: per-tap selection matmuls: Y += (G_t @ A) @ W_t ----
    for g_ref, w_ref, b_ref in ((g2_ref, w2_ref, b2_ref),
                                (g3_ref, w3_ref, b3_ref)):
        taps, mo, _ = g_ref.shape
        cout = w_ref.shape[2]
        y = jnp.zeros((mo, cout), jnp.float32)
        for t in range(taps):
            slab = jnp.dot(g_ref[t], a, preferred_element_type=jnp.float32)
            y = y + jnp.dot(slab.astype(jnp.bfloat16), w_ref[t],
                            preferred_element_type=jnp.float32)
        a = lrelu(y + b_ref[...]).astype(jnp.bfloat16)         # (49,32) then (16,64)

    # ---- layer 4 (4x4, stride 1, valid): spatial rows of `a` are exactly the taps ----
    taps4, _, cout4 = w4_ref.shape
    y = jnp.zeros((1, cout4), jnp.float32)
    for t in range(taps4):
        y = y + jnp.dot(a[t:t + 1, :], w4_ref[t], preferred_element_type=jnp.float32)
    feat = lrelu(y + b4_ref[...])                              # (1, 128) f32

    # ---- Linear(128 -> 1) + Sigmoid epilogue (no separate kernel / no wasted MXU) ----
    logit = jnp.sum(feat * wl_ref[...], axis=-1, keepdims=True) + bl_ref[...]   # (1, 1)
    val = 1.0 / (1.0 + jnp.exp(-logit))
    o_ref[0] = jnp.broadcast_to(val, (1, 128))                 # lane-dense store


def _zero_index_map(ndim):
    zeros = (0,) * ndim
    return lambda i, _z=zeros: _z


@jax.jit
def discriminator_forward(x_nchw, params):
    (w1, b1, g2, w2, b2, g3, w3, b3, w4, b4, wl, bl) = params
    consts = (w1, b1, g2, w2, b2, g3, w3, b3, w4, b4, wl, bl)

    n = x_nchw.shape[0]
    _, _, k0, s0, p0, _ = CONV_CFG[0]
    x_nhwc = jnp.transpose(x_nchw, (0, 2, 3, 1))                       # NCHW -> NHWC, once
    patches1, _, _ = im2col_nhwc(x_nhwc, k0, s0, p0)                   # (N, 196, 9)
    patches1 = patches1.astype(jnp.bfloat16)                           # single cast
    assert patches1.shape[1] == g2.shape[2], "Discriminator expects 28x28 inputs"

    # Rough cost hint for the scheduler.
    flops = 2 * patches1.shape[1] * patches1.shape[2] * w1.shape[1]
    for g, wt in ((g2, w2), (g3, w3)):
        taps, mo, mi = g.shape
        flops += taps * 2 * mo * (mi * wt.shape[1] + wt.shape[1] * wt.shape[2])
    flops += w4.shape[0] * 2 * w4.shape[1] * w4.shape[2] + 2 * wl.shape[1]
    flops *= n
    bytes_accessed = (patches1.size * patches1.dtype.itemsize
                      + sum(int(c.size) * c.dtype.itemsize for c in consts)
                      + n * 128 * 4)

    in_specs = [pl.BlockSpec((1,) + patches1.shape[1:], lambda i: (i, 0, 0))]
    in_specs += [pl.BlockSpec(c.shape, _zero_index_map(c.ndim)) for c in consts]  # resident

    out = pl.pallas_call(
        discriminator_kernel,
        out_shape=jax.ShapeDtypeStruct((n, 1, 128), jnp.float32),
        grid_spec=pltpu.PrefetchScalarGridSpec(
            num_scalar_prefetch=0,
            grid=(n,),                                     # >= 2 steps at batch >= 2 (v7x dual TC)
            in_specs=in_specs,
            out_specs=pl.BlockSpec((1, 1, 128), lambda i: (i, 0, 0)),
        ),
        compiler_params=pltpu.CompilerParams(dimension_semantics=("parallel",)),
        cost_estimate=pl.CostEstimate(flops=int(flops), transcendentals=int(n),
                                      bytes_accessed=int(bytes_accessed)),
    )(patches1, *consts)
    return out[:, 0, :1]                                               # (N, 1)


# ----------------------------------------------------------------------------
# Pure-XLA f32 reference (mirrors the PyTorch module in eval mode).
# ----------------------------------------------------------------------------
@jax.jit
def reference_forward(x_nchw, raw_conv_ws, raw_conv_bs, raw_bn, lin_w, lin_b):
    h = x_nchw
    for idx, (cin, cout, k, s, p, has_bn) in enumerate(CONV_CFG):
        h = jax.lax.conv_general_dilated(
            h, raw_conv_ws[idx], (s, s), [(p, p), (p, p)],
            dimension_numbers=("NCHW", "OIHW", "NCHW"))
        h = h + raw_conv_bs[idx][None, :, None, None]
        if has_bn:
            gamma, beta, mean, var = raw_bn[idx]
            scale = gamma * jax.lax.rsqrt(var + BN_EPS)
            h = (h - mean[None, :, None, None]) * scale[None, :, None, None] \
                + beta[None, :, None, None]
        h = jnp.where(h > 0, h, LRELU_SLOPE * h)
    feat = h.reshape(h.shape[0], -1)
    logit = feat @ lin_w.T + lin_b
    return 1.0 / (1.0 + jnp.exp(-logit))


if __name__ == "__main__":
    key = jax.random.PRNGKey(0)
    key, kx = jax.random.split(key)
    # Input consistent with the module's conv arithmetic: 1x28x28 (MNIST-like).
    x = jax.random.normal(kx, (2, 1, 28, 28), jnp.float32)

    raw_conv, lin_w, lin_b = make_raw_params(key)
    params = prepare_params(raw_conv, lin_w, lin_b, 28, 28)

    out = discriminator_forward(x, params)
    out = jax.block_until_ready(out)
    assert out.shape == (2, 1), out.shape
    assert bool(jnp.all((out > 0.0) & (out < 1.0)))

    ref = reference_forward(
        x,
        tuple(l["w"] for l in raw_conv),
        tuple(l["b"] for l in raw_conv),
        tuple((l["gamma"], l["beta"], l["mean"], l["var"]) for l in raw_conv),
        lin_w, lin_b)
    ref = jax.block_until_ready(ref)
    assert bool(jnp.allclose(out, ref, atol=2e-2)), (out, ref)

    print("KERNEL_OK")
</pallas_src>

<mosaic_0001>
module attributes {stable_mosaic.version = 11 : i64} {
  func.func @discriminator_kernel(%arg0: i32, %arg1: memref<1x196x9xbf16, #tpu.memory_space<vmem>>, %arg2: memref<9x16xbf16, #tpu.memory_space<vmem>>, %arg3: memref<1x16xf32, #tpu.memory_space<vmem>>, %arg4: memref<9x49x196xbf16, #tpu.memory_space<vmem>>, %arg5: memref<9x16x32xbf16, #tpu.memory_space<vmem>>, %arg6: memref<1x32xf32, #tpu.memory_space<vmem>>, %arg7: memref<9x16x49xbf16, #tpu.memory_space<vmem>>, %arg8: memref<9x32x64xbf16, #tpu.memory_space<vmem>>, %arg9: memref<1x64xf32, #tpu.memory_space<vmem>>, %arg10: memref<16x64x128xbf16, #tpu.memory_space<vmem>>, %arg11: memref<1x128xf32, #tpu.memory_space<vmem>>, %arg12: memref<1x128xf32, #tpu.memory_space<vmem>>, %arg13: memref<1x1xf32, #tpu.memory_space<vmem>>, %arg14: memref<1x1x128xf32, #tpu.memory_space<vmem>>) attributes {dimension_semantics = [#tpu.dimension_semantics<parallel>], iteration_bounds = array<i64: 2>, scalar_prefetch = 0 : i64, scratch_operands = 0 : i64, tpu.core_type = #tpu.core_type<tc>, window_params = [{transform_indices = @transform_0, window_bounds = array<i64: 1, 196, 9>}, {pipeline_mode = #tpu.pipeline_mode<synchronous>, transform_indices = @transform_1, window_bounds = array<i64: 9, 16>}, {pipeline_mode = #tpu.pipeline_mode<synchronous>, transform_indices = @transform_2, window_bounds = array<i64: 1, 16>}, {pipeline_mode = #tpu.pipeline_mode<synchronous>, transform_indices = @transform_3, window_bounds = array<i64: 9, 49, 196>}, {pipeline_mode = #tpu.pipeline_mode<synchronous>, transform_indices = @transform_4, window_bounds = array<i64: 9, 16, 32>}, {pipeline_mode = #tpu.pipeline_mode<synchronous>, transform_indices = @transform_5, window_bounds = array<i64: 1, 32>}, {pipeline_mode = #tpu.pipeline_mode<synchronous>, transform_indices = @transform_6, window_bounds = array<i64: 9, 16, 49>}, {pipeline_mode = #tpu.pipeline_mode<synchronous>, transform_indices = @transform_7, window_bounds = array<i64: 9, 32, 64>}, {pipeline_mode = #tpu.pipeline_mode<synchronous>, transform_indices = @transform_8, window_bounds = array<i64: 1, 64>}, {pipeline_mode = #tpu.pipeline_mode<synchronous>, transform_indices = @transform_9, window_bounds = array<i64: 16, 64, 128>}, {pipeline_mode = #tpu.pipeline_mode<synchronous>, transform_indices = @transform_10, window_bounds = array<i64: 1, 128>}, {pipeline_mode = #tpu.pipeline_mode<synchronous>, transform_indices = @transform_11, window_bounds = array<i64: 1, 128>}, {pipeline_mode = #tpu.pipeline_mode<synchronous>, transform_indices = @transform_12, window_bounds = array<i64: 1, 1>}, {transform_indices = @transform_13, window_bounds = array<i64: 1, 1, 128>}]} {
    %c0 = arith.constant 0 : index
    %c0_0 = arith.constant 0 : index
    %c0_1 = arith.constant 0 : index
    %0 = vector.load %arg1[%c0, %c0_0, %c0_1] : memref<1x196x9xbf16, #tpu.memory_space<vmem>>, vector<1x196x9xbf16>
    %1 = vector.shape_cast %0 : vector<1x196x9xbf16> to vector<196x9xbf16>
    %c0_2 = arith.constant 0 : index
    %c0_3 = arith.constant 0 : index
    %2 = vector.load %arg2[%c0_2, %c0_3] : memref<9x16xbf16, #tpu.memory_space<vmem>>, vector<9x16xbf16>
    %cst = arith.constant dense<0.000000e+00> : vector<196x16xf32>
    %3 = tpu.matmul %1, %2, %cst {dimension_numbers = #tpu.dot_dimension_numbers<[1], [0], [0], [1], [0, 0, 1, 1], [], []>} : vector<196x9xbf16>, vector<9x16xbf16>, vector<196x16xf32> -> vector<196x16xf32>
    %c0_4 = arith.constant 0 : index
    %c0_5 = arith.constant 0 : index
    %4 = vector.load %arg3[%c0_4, %c0_5] : memref<1x16xf32, #tpu.memory_space<vmem>>, vector<1x16xf32>
    %5 = vector.broadcast %4 : vector<1x16xf32> to vector<196x16xf32>
    %6 = arith.addf %3, %5 : vector<196x16xf32>
    %cst_6 = arith.constant 0.000000e+00 : f32
    %7 = vector.broadcast %cst_6 : f32 to vector<196x16xf32>
    %8 = arith.cmpf ogt, %6, %7 : vector<196x16xf32>
    %cst_7 = arith.constant 2.000000e-01 : f32
    %9 = vector.broadcast %cst_7 : f32 to vector<196x16xf32>
    %10 = arith.mulf %9, %6 : vector<196x16xf32>
    %11 = arith.select %8, %6, %10 : vector<196x16xi1>, vector<196x16xf32>
    %12 = arith.truncf %11 : vector<196x16xf32> to vector<196x16xbf16>
    %cst_8 = arith.constant 0.000000e+00 : f32
    %13 = vector.broadcast %cst_8 : f32 to vector<49x32xf32>
    %c0_9 = arith.constant 0 : index
    %c0_10 = arith.constant 0 : index
    %c0_11 = arith.constant 0 : index
    %14 = vector.load %arg4[%c0_9, %c0_10, %c0_11] : memref<9x49x196xbf16, #tpu.memory_space<vmem>>, vector<1x49x196xbf16>
    %15 = vector.shape_cast %14 : vector<1x49x196xbf16> to vector<49x196xbf16>
    %cst_12 = arith.constant dense<0.000000e+00> : vector<49x16xf32>
    %16 = tpu.matmul %15, %12, %cst_12 {dimension_numbers = #tpu.dot_dimension_numbers<[1], [0], [0], [1], [0, 0, 1, 1], [], []>} : vector<49x196xbf16>, vector<196x16xbf16>, vector<49x16xf32> -> vector<49x16xf32>
    %17 = arith.truncf %16 : vector<49x16xf32> to vector<49x16xbf16>
    %c0_13 = arith.constant 0 : index
    %c0_14 = arith.constant 0 : index
    %c0_15 = arith.constant 0 : index
    %18 = vector.load %arg5[%c0_13, %c0_14, %c0_15] : memref<9x16x32xbf16, #tpu.memory_space<vmem>>, vector<1x16x32xbf16>
    %19 = vector.shape_cast %18 : vector<1x16x32xbf16> to vector<16x32xbf16>
    %cst_16 = arith.constant dense<0.000000e+00> : vector<49x32xf32>
    %20 = tpu.matmul %17, %19, %cst_16 {dimension_numbers = #tpu.dot_dimension_numbers<[1], [0], [0], [1], [0, 0, 1, 1], [], []>} : vector<49x16xbf16>, vector<16x32xbf16>, vector<49x32xf32> -> vector<49x32xf32>
    %21 = arith.addf %13, %20 : vector<49x32xf32>
    %c1 = arith.constant 1 : index
    %c0_17 = arith.constant 0 : index
    %c0_18 = arith.constant 0 : index
    %22 = vector.load %arg4[%c1, %c0_17, %c0_18] : memref<9x49x196xbf16, #tpu.memory_space<vmem>>, vector<1x49x196xbf16>
    %23 = vector.shape_cast %22 : vector<1x49x196xbf16> to vector<49x196xbf16>
    %cst_19 = arith.constant dense<0.000000e+00> : vector<49x16xf32>
    %24 = tpu.matmul %23, %12, %cst_19 {dimension_numbers = #tpu.dot_dimension_numbers<[1], [0], [0], [1], [0, 0, 1, 1], [], []>} : vector<49x196xbf16>, vector<196x16xbf16>, vector<49x16xf32> -> vector<49x16xf32>
    %25 = arith.truncf %24 : vector<49x16xf32> to vector<49x16xbf16>
    %c1_20 = arith.constant 1 : index
    %c0_21 = arith.constant 0 : index
    %c0_22 = arith.constant 0 : index
    %26 = vector.load %arg5[%c1_20, %c0_21, %c0_22] : memref<9x16x32xbf16, #tpu.memory_space<vmem>>, vector<1x16x32xbf16>
    %27 = vector.shape_cast %26 : vector<1x16x32xbf16> to vector<16x32xbf16>
    %cst_23 = arith.constant dense<0.000000e+00> : vector<49x32xf32>
    %28 = tpu.matmul %25, %27, %cst_23 {dimension_numbers = #tpu.dot_dimension_numbers<[1], [0], [0], [1], [0, 0, 1, 1], [], []>} : vector<49x16xbf16>, vector<16x32xbf16>, vector<49x32xf32> -> vector<49x32xf32>
    %29 = arith.addf %21, %28 : vector<49x32xf32>
    %c2 = arith.constant 2 : index
    %c0_24 = arith.constant 0 : index
    %c0_25 = arith.constant 0 : index
    %30 = vector.load %arg4[%c2, %c0_24, %c0_25] : memref<9x49x196xbf16, #tpu.memory_space<vmem>>, vector<1x49x196xbf16>
    %31 = vector.shape_cast %30 : vector<1x49x196xbf16> to vector<49x196xbf16>
    %cst_26 = arith.constant dense<0.000000e+00> : vector<49x16xf32>
    %32 = tpu.matmul %31, %12, %cst_26 {dimension_numbers = #tpu.dot_dimension_numbers<[1], [0], [0], [1], [0, 0, 1, 1], [], []>} : vector<49x196xbf16>, vector<196x16xbf16>, vector<49x16xf32> -> vector<49x16xf32>
    %33 = arith.truncf %32 : vector<49x16xf32> to vector<49x16xbf16>
    %c2_27 = arith.constant 2 : index
    %c0_28 = arith.constant 0 : index
    %c0_29 = arith.constant 0 : index
    %34 = vector.load %arg5[%c2_27, %c0_28, %c0_29] : memref<9x16x32xbf16, #tpu.memory_space<vmem>>, vector<1x16x32xbf16>
    %35 = vector.shape_cast %34 : vector<1x16x32xbf16> to vector<16x32xbf16>
    %cst_30 = arith.constant dense<0.000000e+00> : vector<49x32xf32>
    %36 = tpu.matmul %33, %35, %cst_30 {dimension_numbers = #tpu.dot_dimension_numbers<[1], [0], [0], [1], [0, 0, 1, 1], [], []>} : vector<49x16xbf16>, vector<16x32xbf16>, vector<49x32xf32> -> vector<49x32xf32>
    %37 = arith.addf %29, %36 : vector<49x32xf32>
    %c3 = arith.constant 3 : index
    %c0_31 = arith.constant 0 : index
    %c0_32 = arith.constant 0 : index
    %38 = vector.load %arg4[%c3, %c0_31, %c0_32] : memref<9x49x196xbf16, #tpu.memory_space<vmem>>, vector<1x49x196xbf16>
    %39 = vector.shape_cast %38 : vector<1x49x196xbf16> to vector<49x196xbf16>
    %cst_33 = arith.constant dense<0.000000e+00> : vector<49x16xf32>
    %40 = tpu.matmul %39, %12, %cst_33 {dimension_numbers = #tpu.dot_dimension_numbers<[1], [0], [0], [1], [0, 0, 1, 1], [], []>} : vector<49x196xbf16>, vector<196x16xbf16>, vector<49x16xf32> -> vector<49x16xf32>
    %41 = arith.truncf %40 : vector<49x16xf32> to vector<49x16xbf16>
    %c3_34 = arith.constant 3 : index
    %c0_35 = arith.constant 0 : index
    %c0_36 = arith.constant 0 : index
    %42 = vector.load %arg5[%c3_34, %c0_35, %c0_36] : memref<9x16x32xbf16, #tpu.memory_space<vmem>>, vector<1x16x32xbf16>
    %43 = vector.shape_cast %42 : vector<1x16x32xbf16> to vector<16x32xbf16>
    %cst_37 = arith.constant dense<0.000000e+00> : vector<49x32xf32>
    %44 = tpu.matmul %41, %43, %cst_37 {dimension_numbers = #tpu.dot_dimension_numbers<[1], [0], [0], [1], [0, 0, 1, 1], [], []>} : vector<49x16xbf16>, vector<16x32xbf16>, vector<49x32xf32> -> vector<49x32xf32>
    %45 = arith.addf %37, %44 : vector<49x32xf32>
    %c4 = arith.constant 4 : index
    %c0_38 = arith.constant 0 : index
    %c0_39 = arith.constant 0 : index
    %46 = vector.load %arg4[%c4, %c0_38, %c0_39] : memref<9x49x196xbf16, #tpu.memory_space<vmem>>, vector<1x49x196xbf16>
    %47 = vector.shape_cast %46 : vector<1x49x196xbf16> to vector<49x196xbf16>
    %cst_40 = arith.constant dense<0.000000e+00> : vector<49x16xf32>
    %48 = tpu.matmul %47, %12, %cst_40 {dimension_numbers = #tpu.dot_dimension_numbers<[1], [0], [0], [1], [0, 0, 1, 1], [], []>} : vector<49x196xbf16>, vector<196x16xbf16>, vector<49x16xf32> -> vector<49x16xf32>
    %49 = arith.truncf %48 : vector<49x16xf32> to vector<49x16xbf16>
    %c4_41 = arith.constant 4 : index
    %c0_42 = arith.constant 0 : index
    %c0_43 = arith.constant 0 : index
    %50 = vector.load %arg5[%c4_41, %c0_42, %c0_43] : memref<9x16x32xbf16, #tpu.memory_space<vmem>>, vector<1x16x32xbf16>
    %51 = vector.shape_cast %50 : vector<1x16x32xbf16> to vector<16x32xbf16>
    %cst_44 = arith.constant dense<0.000000e+00> : vector<49x32xf32>
    %52 = tpu.matmul %49, %51, %cst_44 {dimension_numbers = #tpu.dot_dimension_numbers<[1], [0], [0], [1], [0, 0, 1, 1], [], []>} : vector<49x16xbf16>, vector<16x32xbf16>, vector<49x32xf32> -> vector<49x32xf32>
    %53 = arith.addf %45, %52 : vector<49x32xf32>
    %c5 = arith.constant 5 : index
    %c0_45 = arith.constant 0 : index
    %c0_46 = arith.constant 0 : index
    %54 = vector.load %arg4[%c5, %c0_45, %c0_46] : memref<9x49x196xbf16, #tpu.memory_space<vmem>>, vector<1x49x196xbf16>
    %55 = vector.shape_cast %54 : vector<1x49x196xbf16> to vector<49x196xbf16>
    %cst_47 = arith.constant dense<0.000000e+00> : vector<49x16xf32>
    %56 = tpu.matmul %55, %12, %cst_47 {dimension_numbers = #tpu.dot_dimension_numbers<[1], [0], [0], [1], [0, 0, 1, 1], [], []>} : vector<49x196xbf16>, vector<196x16xbf16>, vector<49x16xf32> -> vector<49x16xf32>
    %57 = arith.truncf %56 : vector<49x16xf32> to vector<49x16xbf16>
    %c5_48 = arith.constant 5 : index
    %c0_49 = arith.constant 0 : index
    %c0_50 = arith.constant 0 : index
    %58 = vector.load %arg5[%c5_48, %c0_49, %c0_50] : memref<9x16x32xbf16, #tpu.memory_space<vmem>>, vector<1x16x32xbf16>
    %59 = vector.shape_cast %58 : vector<1x16x32xbf16> to vector<16x32xbf16>
    %cst_51 = arith.constant dense<0.000000e+00> : vector<49x32xf32>
    %60 = tpu.matmul %57, %59, %cst_51 {dimension_numbers = #tpu.dot_dimension_numbers<[1], [0], [0], [1], [0, 0, 1, 1], [], []>} : vector<49x16xbf16>, vector<16x32xbf16>, vector<49x32xf32> -> vector<49x32xf32>
    %61 = arith.addf %53, %60 : vector<49x32xf32>
    %c6 = arith.constant 6 : index
    %c0_52 = arith.constant 0 : index
    %c0_53 = arith.constant 0 : index
    %62 = vector.load %arg4[%c6, %c0_52, %c0_53] : memref<9x49x196xbf16, #tpu.memory_space<vmem>>, vector<1x49x196xbf16>
    %63 = vector.shape_cast %62 : vector<1x49x196xbf16> to vector<49x196xbf16>
    %cst_54 = arith.constant dense<0.000000e+00> : vector<49x16xf32>
    %64 = tpu.matmul %63, %12, %cst_54 {dimension_numbers = #tpu.dot_dimension_numbers<[1], [0], [0], [1], [0, 0, 1, 1], [], []>} : vector<49x196xbf16>, vector<196x16xbf16>, vector<49x16xf32> -> vector<49x16xf32>
    %65 = arith.truncf %64 : vector<49x16xf32> to vector<49x16xbf16>
    %c6_55 = arith.constant 6 : index
    %c0_56 = arith.constant 0 : index
    %c0_57 = arith.constant 0 : index
    %66 = vector.load %arg5[%c6_55, %c0_56, %c0_57] : memref<9x16x32xbf16, #tpu.memory_space<vmem>>, vector<1x16x32xbf16>
    %67 = vector.shape_cast %66 : vector<1x16x32xbf16> to vector<16x32xbf16>
    %cst_58 = arith.constant dense<0.000000e+00> : vector<49x32xf32>
    %68 = tpu.matmul %65, %67, %cst_58 {dimension_numbers = #tpu.dot_dimension_numbers<[1], [0], [0], [1], [0, 0, 1, 1], [], []>} : vector<49x16xbf16>, vector<16x32xbf16>, vector<49x32xf32> -> vector<49x32xf32>
    %69 = arith.addf %61, %68 : vector<49x32xf32>
    %c7 = arith.constant 7 : index
    %c0_59 = arith.constant 0 : index
    %c0_60 = arith.constant 0 : index
    %70 = vector.load %arg4[%c7, %c0_59, %c0_60] : memref<9x49x196xbf16, #tpu.memory_space<vmem>>, vector<1x49x196xbf16>
    %71 = vector.shape_cast %70 : vector<1x49x196xbf16> to vector<49x196xbf16>
    %cst_61 = arith.constant dense<0.000000e+00> : vector<49x16xf32>
    %72 = tpu.matmul %71, %12, %cst_61 {dimension_numbers = #tpu.dot_dimension_numbers<[1], [0], [0], [1], [0, 0, 1, 1], [], []>} : vector<49x196xbf16>, vector<196x16xbf16>, vector<49x16xf32> -> vector<49x16xf32>
    %73 = arith.truncf %72 : vector<49x16xf32> to vector<49x16xbf16>
    %c7_62 = arith.constant 7 : index
    %c0_63 = arith.constant 0 : index
    %c0_64 = arith.constant 0 : index
    %74 = vector.load %arg5[%c7_62, %c0_63, %c0_64] : memref<9x16x32xbf16, #tpu.memory_space<vmem>>, vector<1x16x32xbf16>
    %75 = vector.shape_cast %74 : vector<1x16x32xbf16> to vector<16x32xbf16>
    %cst_65 = arith.constant dense<0.000000e+00> : vector<49x32xf32>
    %76 = tpu.matmul %73, %75, %cst_65 {dimension_numbers = #tpu.dot_dimension_numbers<[1], [0], [0], [1], [0, 0, 1, 1], [], []>} : vector<49x16xbf16>, vector<16x32xbf16>, vector<49x32xf32> -> vector<49x32xf32>
    %77 = arith.addf %69, %76 : vector<49x32xf32>
    %c8 = arith.constant 8 : index
    %c0_66 = arith.constant 0 : index
    %c0_67 = arith.constant 0 : index
    %78 = vector.load %arg4[%c8, %c0_66, %c0_67] : memref<9x49x196xbf16, #tpu.memory_space<vmem>>, vector<1x49x196xbf16>
    %79 = vector.shape_cast %78 : vector<1x49x196xbf16> to vector<49x196xbf16>
    %cst_68 = arith.constant dense<0.000000e+00> : vector<49x16xf32>
    %80 = tpu.matmul %79, %12, %cst_68 {dimension_numbers = #tpu.dot_dimension_numbers<[1], [0], [0], [1], [0, 0, 1, 1], [], []>} : vector<49x196xbf16>, vector<196x16xbf16>, vector<49x16xf32> -> vector<49x16xf32>
    %81 = arith.truncf %80 : vector<49x16xf32> to vector<49x16xbf16>
    %c8_69 = arith.constant 8 : index
    %c0_70 = arith.constant 0 : index
    %c0_71 = arith.constant 0 : index
    %82 = vector.load %arg5[%c8_69, %c0_70, %c0_71] : memref<9x16x32xbf16, #tpu.memory_space<vmem>>, vector<1x16x32xbf16>
    %83 = vector.shape_cast %82 : vector<1x16x32xbf16> to vector<16x32xbf16>
    %cst_72 = arith.constant dense<0.000000e+00> : vector<49x32xf32>
    %84 = tpu.matmul %81, %83, %cst_72 {dimension_numbers = #tpu.dot_dimension_numbers<[1], [0], [0], [1], [0, 0, 1, 1], [], []>} : vector<49x16xbf16>, vector<16x32xbf16>, vector<49x32xf32> -> vector<49x32xf32>
    %85 = arith.addf %77, %84 : vector<49x32xf32>
    %c0_73 = arith.constant 0 : index
    %c0_74 = arith.constant 0 : index
    %86 = vector.load %arg6[%c0_73, %c0_74] : memref<1x32xf32, #tpu.memory_space<vmem>>, vector<1x32xf32>
    %87 = vector.broadcast %86 : vector<1x32xf32> to vector<49x32xf32>
    %88 = arith.addf %85, %87 : vector<49x32xf32>
    %cst_75 = arith.constant 0.000000e+00 : f32
    %89 = vector.broadcast %cst_75 : f32 to vector<49x32xf32>
    %90 = arith.cmpf ogt, %88, %89 : vector<49x32xf32>
    %cst_76 = arith.constant 2.000000e-01 : f32
    %91 = vector.broadcast %cst_76 : f32 to vector<49x32xf32>
    %92 = arith.mulf %91, %88 : vector<49x32xf32>
    %93 = arith.select %90, %88, %92 : vector<49x32xi1>, vector<49x32xf32>
    %94 = arith.truncf %93 : vector<49x32xf32> to vector<49x32xbf16>
    %cst_77 = arith.constant 0.000000e+00 : f32
    %95 = vector.broadcast %cst_77 : f32 to vector<16x64xf32>
    %c0_78 = arith.constant 0 : index
    %c0_79 = arith.constant 0 : index
    %c0_80 = arith.constant 0 : index
    %96 = vector.load %arg7[%c0_78, %c0_79, %c0_80] : memref<9x16x49xbf16, #tpu.memory_space<vmem>>, vector<1x16x49xbf16>
    %97 = vector.shape_cast %96 : vector<1x16x49xbf16> to vector<16x49xbf16>
    %cst_81 = arith.constant dense<0.000000e+00> : vector<16x32xf32>
    %98 = tpu.matmul %97, %94, %cst_81 {dimension_numbers = #tpu.dot_dimension_numbers<[1], [0], [0], [1], [0, 0, 1, 1], [], []>} : vector<16x49xbf16>, vector<49x32xbf16>, vector<16x32xf32> -> vector<16x32xf32>
    %99 = arith.truncf %98 : vector<16x32xf32> to vector<16x32xbf16>
    %c0_82 = arith.constant 0 : index
    %c0_83 = arith.constant 0 : index
    %c0_84 = arith.constant 0 : index
    %100 = vector.load %arg8[%c0_82, %c0_83, %c0_84] : memref<9x32x64xbf16, #tpu.memory_space<vmem>>, vector<1x32x64xbf16>
    %101 = vector.shape_cast %100 : vector<1x32x64xbf16> to vector<32x64xbf16>
    %cst_85 = arith.constant dense<0.000000e+00> : vector<16x64xf32>
    %102 = tpu.matmul %99, %101, %cst_85 {dimension_numbers = #tpu.dot_dimension_numbers<[1], [0], [0], [1], [0, 0, 1, 1], [], []>} : vector<16x32xbf16>, vector<32x64xbf16>, vector<16x64xf32> -> vector<16x64xf32>
    %103 = arith.addf %95, %102 : vector<16x64xf32>
    %c1_86 = arith.constant 1 : index
    %c0_87 = arith.constant 0 : index
    %c0_88 = arith.constant 0 : index
    %104 = vector.load %arg7[%c1_86, %c0_87, %c0_88] : memref<9x16x49xbf16, #tpu.memory_space<vmem>>, vector<1x16x49xbf16>
    %105 = vector.shape_cast %104 : vector<1x16x49xbf16> to vector<16x49xbf16>
    %cst_89 = arith.constant dense<0.000000e+00> : vector<16x32xf32>
    %106 = tpu.matmul %105, %94, %cst_89 {dimension_numbers = #tpu.dot_dimension_numbers<[1], [0], [0], [1], [0, 0, 1, 1], [], []>} : vector<16x49xbf16>, vector<49x32xbf16>, vector<16x32xf32> -> vector<16x32xf32>
    %107 = arith.truncf %106 : vector<16x32xf32> to vector<16x32xbf16>
    %c1_90 = arith.constant 1 : index
    %c0_91 = arith.constant 0 : index
    %c0_92 = arith.constant 0 : index
    %108 = vector.load %arg8[%c1_90, %c0_91, %c0_92] : memref<9x32x64xbf16, #tpu.memory_space<vmem>>, vector<1x32x64xbf16>
    %109 = vector.shape_cast %108 : vector<1x32x64xbf16> to vector<32x64xbf16>
    %cst_93 = arith.constant dense<0.000000e+00> : vector<16x64xf32>
    %110 = tpu.matmul %107, %109, %cst_93 {dimension_numbers = #tpu.dot_dimension_numbers<[1], [0], [0], [1], [0, 0, 1, 1], [], []>} : vector<16x32xbf16>, vector<32x64xbf16>, vector<16x64xf32> -> vector<16x64xf32>
    %111 = arith.addf %103, %110 : vector<16x64xf32>
    %c2_94 = arith.constant 2 : index
    %c0_95 = arith.constant 0 : index
    %c0_96 = arith.constant 0 : index
    %112 = vector.load %arg7[%c2_94, %c0_95, %c0_96] : memref<9x16x49xbf16, #tpu.memory_space<vmem>>, vector<1x16x49xbf16>
    %113 = vector.shape_cast %112 : vector<1x16x49xbf16> to vector<16x49xbf16>
    %cst_97 = arith.constant dense<0.000000e+00> : vector<16x32xf32>
    %114 = tpu.matmul %113, %94, %cst_97 {dimension_numbers = #tpu.dot_dimension_numbers<[1], [0], [0], [1], [0, 0, 1, 1], [], []>} : vector<16x49xbf16>, vector<49x32xbf16>, vector<16x32xf32> -> vector<16x32xf32>
    %115 = arith.truncf %114 : vector<16x32xf32> to vector<16x32xbf16>
    %c2_98 = arith.constant 2 : index
    %c0_99 = arith.constant 0 : index
    %c0_100 = arith.constant 0 : index
    %116 = vector.load %arg8[%c2_98, %c0_99, %c0_100] : memref<9x32x64xbf16, #tpu.memory_space<vmem>>, vector<1x32x64xbf16>
    %117 = vector.shape_cast %116 : vector<1x32x64xbf16> to vector<32x64xbf16>
    %cst_101 = arith.constant dense<0.000000e+00> : vector<16x64xf32>
    %118 = tpu.matmul %115, %117, %cst_101 {dimension_numbers = #tpu.dot_dimension_numbers<[1], [0], [0], [1], [0, 0, 1, 1], [], []>} : vector<16x32xbf16>, vector<32x64xbf16>, vector<16x64xf32> -> vector<16x64xf32>
    %119 = arith.addf %111, %118 : vector<16x64xf32>
    %c3_102 = arith.constant 3 : index
    %c0_103 = arith.constant 0 : index
    %c0_104 = arith.constant 0 : index
    %120 = vector.load %arg7[%c3_102, %c0_103, %c0_104] : memref<9x16x49xbf16, #tpu.memory_space<vmem>>, vector<1x16x49xbf16>
    %121 = vector.shape_cast %120 : vector<1x16x49xbf16> to vector<16x49xbf16>
    %cst_105 = arith.constant dense<0.000000e+00> : vector<16x32xf32>
    %122 = tpu.matmul %121, %94, %cst_105 {dimension_numbers = #tpu.dot_dimension_numbers<[1], [0], [0], [1], [0, 0, 1, 1], [], []>} : vector<16x49xbf16>, vector<49x32xbf16>, vector<16x32xf32> -> vector<16x32xf32>
    %123 = arith.truncf %122 : vector<16x32xf32> to vector<16x32xbf16>
    %c3_106 = arith.constant 3 : index
    %c0_107 = arith.constant 0 : index
    %c0_108 = arith.constant 0 : index
    %124 = vector.load %arg8[%c3_106, %c0_107, %c0_108] : memref<9x32x64xbf16, #tpu.memory_space<vmem>>, vector<1x32x64xbf16>
    %125 = vector.shape_cast %124 : vector<1x32x64xbf16> to vector<32x64xbf16>
    %cst_109 = arith.constant dense<0.000000e+00> : vector<16x64xf32>
    %126 = tpu.matmul %123, %125, %cst_109 {dimension_numbers = #tpu.dot_dimension_numbers<[1], [0], [0], [1], [0, 0, 1, 1], [], []>} : vector<16x32xbf16>, vector<32x64xbf16>, vector<16x64xf32> -> vector<16x64xf32>
    %127 = arith.addf %119, %126 : vector<16x64xf32>
    %c4_110 = arith.constant 4 : index
    %c0_111 = arith.constant 0 : index
    %c0_112 = arith.constant 0 : index
    %128 = vector.load %arg7[%c4_110, %c0_111, %c0_112] : memref<9x16x49xbf16, #tpu.memory_space<vmem>>, vector<1x16x49xbf16>
    %129 = vector.shape_cast %128 : vector<1x16x49xbf16> to vector<16x49xbf16>
    %cst_113 = arith.constant dense<0.000000e+00> : vector<16x32xf32>
    %130 = tpu.matmul %129, %94, %cst_113 {dimension_numbers = #tpu.dot_dimension_numbers<[1], [0], [0], [1], [0, 0, 1, 1], [], []>} : vector<16x49xbf16>, vector<49x32xbf16>, vector<16x32xf32> -> vector<16x32xf32>
    %131 = arith.truncf %130 : vector<16x32xf32> to vector<16x32xbf16>
    %c4_114 = arith.constant 4 : index
    %c0_115 = arith.constant 0 : index
    %c0_116 = arith.constant 0 : index
    %132 = vector.load %arg8[%c4_114, %c0_115, %c0_116] : memref<9x32x64xbf16, #tpu.memory_space<vmem>>, vector<1x32x64xbf16>
    %133 = vector.shape_cast %132 : vector<1x32x64xbf16> to vector<32x64xbf16>
    %cst_117 = arith.constant dense<0.000000e+00> : vector<16x64xf32>
    %134 = tpu.matmul %131, %133, %cst_117 {dimension_numbers = #tpu.dot_dimension_numbers<[1], [0], [0], [1], [0, 0, 1, 1], [], []>} : vector<16x32xbf16>, vector<32x64xbf16>, vector<16x64xf32> -> vector<16x64xf32>
    %135 = arith.addf %127, %134 : vector<16x64xf32>
    %c5_118 = arith.constant 5 : index
    %c0_119 = arith.constant 0 : index
    %c0_120 = arith.constant 0 : index
    %136 = vector.load %arg7[%c5_118, %c0_119, %c0_120] : memref<9x16x49xbf16, #tpu.memory_space<vmem>>, vector<1x16x49xbf16>
    %137 = vector.shape_cast %136 : vector<1x16x49xbf16> to vector<16x49xbf16>
    %cst_121 = arith.constant dense<0.000000e+00> : vector<16x32xf32>
    %138 = tpu.matmul %137, %94, %cst_121 {dimension_numbers = #tpu.dot_dimension_numbers<[1], [0], [0], [1], [0, 0, 1, 1], [], []>} : vector<16x49xbf16>, vector<49x32xbf16>, vector<16x32xf32> -> vector<16x32xf32>
    %139 = arith.truncf %138 : vector<16x32xf32> to vector<16x32xbf16>
    %c5_122 = arith.constant 5 : index
    %c0_123 = arith.constant 0 : index
    %c0_124 = arith.constant 0 : index
    %140 = vector.load %arg8[%c5_122, %c0_123, %c0_124] : memref<9x32x64xbf16, #tpu.memory_space<vmem>>, vector<1x32x64xbf16>
    %141 = vector.shape_cast %140 : vector<1x32x64xbf16> to vector<32x64xbf16>
    %cst_125 = arith.constant dense<0.000000e+00> : vector<16x64xf32>
    %142 = tpu.matmul %139, %141, %cst_125 {dimension_numbers = #tpu.dot_dimension_numbers<[1], [0], [0], [1], [0, 0, 1, 1], [], []>} : vector<16x32xbf16>, vector<32x64xbf16>, vector<16x64xf32> -> vector<16x64xf32>
    %143 = arith.addf %135, %142 : vector<16x64xf32>
    %c6_126 = arith.constant 6 : index
    %c0_127 = arith.constant 0 : index
    %c0_128 = arith.constant 0 : index
    %144 = vector.load %arg7[%c6_126, %c0_127, %c0_128] : memref<9x16x49xbf16, #tpu.memory_space<vmem>>, vector<1x16x49xbf16>
    %145 = vector.shape_cast %144 : vector<1x16x49xbf16> to vector<16x49xbf16>
    %cst_129 = arith.constant dense<0.000000e+00> : vector<16x32xf32>
    %146 = tpu.matmul %145, %94, %cst_129 {dimension_numbers = #tpu.dot_dimension_numbers<[1], [0], [0], [1], [0, 0, 1, 1], [], []>} : vector<16x49xbf16>, vector<49x32xbf16>, vector<16x32xf32> -> vector<16x32xf32>
    %147 = arith.truncf %146 : vector<16x32xf32> to vector<16x32xbf16>
    %c6_130 = arith.constant 6 : index
    %c0_131 = arith.constant 0 : index
    %c0_132 = arith.constant 0 : index
    %148 = vector.load %arg8[%c6_130, %c0_131, %c0_132] : memref<9x32x64xbf16, #tpu.memory_space<vmem>>, vector<1x32x64xbf16>
    %149 = vector.shape_cast %148 : vector<1x32x64xbf16> to vector<32x64xbf16>
    %cst_133 = arith.constant dense<0.000000e+00> : vector<16x64xf32>
    %150 = tpu.matmul %147, %149, %cst_133 {dimension_numbers = #tpu.dot_dimension_numbers<[1], [0], [0], [1], [0, 0, 1, 1], [], []>} : vector<16x32xbf16>, vector<32x64xbf16>, vector<16x64xf32> -> vector<16x64xf32>
    %151 = arith.addf %143, %150 : vector<16x64xf32>
    %c7_134 = arith.constant 7 : index
    %c0_135 = arith.constant 0 : index
    %c0_136 = arith.constant 0 : index
    %152 = vector.load %arg7[%c7_134, %c0_135, %c0_136] : memref<9x16x49xbf16, #tpu.memory_space<vmem>>, vector<1x16x49xbf16>
    %153 = vector.shape_cast %152 : vector<1x16x49xbf16> to vector<16x49xbf16>
    %cst_137 = arith.constant dense<0.000000e+00> : vector<16x32xf32>
    %154 = tpu.matmul %153, %94, %cst_137 {dimension_numbers = #tpu.dot_dimension_numbers<[1], [0], [0], [1], [0, 0, 1, 1], [], []>} : vector<16x49xbf16>, vector<49x32xbf16>, vector<16x32xf32> -> vector<16x32xf32>
    %155 = arith.truncf %154 : vector<16x32xf32> to vector<16x32xbf16>
    %c7_138 = arith.constant 7 : index
    %c0_139 = arith.constant 0 : index
    %c0_140 = arith.constant 0 : index
    %156 = vector.load %arg8[%c7_138, %c0_139, %c0_140] : memref<9x32x64xbf16, #tpu.memory_space<vmem>>, vector<1x32x64xbf16>
    %157 = vector.shape_cast %156 : vector<1x32x64xbf16> to vector<32x64xbf16>
    %cst_141 = arith.constant dense<0.000000e+00> : vector<16x64xf32>
    %158 = tpu.matmul %155, %157, %cst_141 {dimension_numbers = #tpu.dot_dimension_numbers<[1], [0], [0], [1], [0, 0, 1, 1], [], []>} : vector<16x32xbf16>, vector<32x64xbf16>, vector<16x64xf32> -> vector<16x64xf32>
    %159 = arith.addf %151, %158 : vector<16x64xf32>
    %c8_142 = arith.constant 8 : index
    %c0_143 = arith.constant 0 : index
    %c0_144 = arith.constant 0 : index
    %160 = vector.load %arg7[%c8_142, %c0_143, %c0_144] : memref<9x16x49xbf16, #tpu.memory_space<vmem>>, vector<1x16x49xbf16>
    %161 = vector.shape_cast %160 : vector<1x16x49xbf16> to vector<16x49xbf16>
    %cst_145 = arith.constant dense<0.000000e+00> : vector<16x32xf32>
    %162 = tpu.matmul %161, %94, %cst_145 {dimension_numbers = #tpu.dot_dimension_numbers<[1], [0], [0], [1], [0, 0, 1, 1], [], []>} : vector<16x49xbf16>, vector<49x32xbf16>, vector<16x32xf32> -> vector<16x32xf32>
    %163 = arith.truncf %162 : vector<16x32xf32> to vector<16x32xbf16>
    %c8_146 = arith.constant 8 : index
    %c0_147 = arith.constant 0 : index
    %c0_148 = arith.constant 0 : index
    %164 = vector.load %arg8[%c8_146, %c0_147, %c0_148] : memref<9x32x64xbf16, #tpu.memory_space<vmem>>, vector<1x32x64xbf16>
    %165 = vector.shape_cast %164 : vector<1x32x64xbf16> to vector<32x64xbf16>
    %cst_149 = arith.constant dense<0.000000e+00> : vector<16x64xf32>
    %166 = tpu.matmul %163, %165, %cst_149 {dimension_numbers = #tpu.dot_dimension_numbers<[1], [0], [0], [1], [0, 0, 1, 1], [], []>} : vector<16x32xbf16>, vector<32x64xbf16>, vector<16x64xf32> -> vector<16x64xf32>
    %167 = arith.addf %159, %166 : vector<16x64xf32>
    %c0_150 = arith.constant 0 : index
    %c0_151 = arith.constant 0 : index
    %168 = vector.load %arg9[%c0_150, %c0_151] : memref<1x64xf32, #tpu.memory_space<vmem>>, vector<1x64xf32>
    %169 = vector.broadcast %168 : vector<1x64xf32> to vector<16x64xf32>
    %170 = arith.addf %167, %169 : vector<16x64xf32>
    %cst_152 = arith.constant 0.000000e+00 : f32
    %171 = vector.broadcast %cst_152 : f32 to vector<16x64xf32>
    %172 = arith.cmpf ogt, %170, %171 : vector<16x64xf32>
    %cst_153 = arith.constant 2.000000e-01 : f32
    %173 = vector.broadcast %cst_153 : f32 to vector<16x64xf32>
    %174 = arith.mulf %173, %170 : vector<16x64xf32>
    %175 = arith.select %172, %170, %174 : vector<16x64xi1>, vector<16x64xf32>
    %176 = arith.truncf %175 : vector<16x64xf32> to vector<16x64xbf16>
    %cst_154 = arith.constant 0.000000e+00 : f32
    %177 = vector.broadcast %cst_154 : f32 to vector<1x128xf32>
    %178 = vector.extract_strided_slice %176 {offsets = [0, 0], sizes = [1, 64], strides = [1, 1]} : vector<16x64xbf16> to vector<1x64xbf16>
    %c0_155 = arith.constant 0 : index
    %c0_156 = arith.constant 0 : index
    %c0_157 = arith.constant 0 : index
    %179 = vector.load %arg10[%c0_155, %c0_156, %c0_157] : memref<16x64x128xbf16, #tpu.memory_space<vmem>>, vector<1x64x128xbf16>
    %180 = vector.shape_cast %179 : vector<1x64x128xbf16> to vector<64x128xbf16>
    %cst_158 = arith.constant dense<0.000000e+00> : vector<1x128xf32>
    %181 = tpu.matmul %178, %180, %cst_158 {dimension_numbers = #tpu.dot_dimension_numbers<[1], [0], [0], [1], [0, 0, 1, 1], [], []>} : vector<1x64xbf16>, vector<64x128xbf16>, vector<1x128xf32> -> vector<1x128xf32>
    %182 = arith.addf %177, %181 : vector<1x128xf32>
    %183 = vector.extract_strided_slice %176 {offsets = [1, 0], sizes = [1, 64], strides = [1, 1]} : vector<16x64xbf16> to vector<1x64xbf16>
    %c1_159 = arith.constant 1 : index
    %c0_160 = arith.constant 0 : index
    %c0_161 = arith.constant 0 : index
    %184 = vector.load %arg10[%c1_159, %c0_160, %c0_161] : memref<16x64x128xbf16, #tpu.memory_space<vmem>>, vector<1x64x128xbf16>
    %185 = vector.shape_cast %184 : vector<1x64x128xbf16> to vector<64x128xbf16>
    %cst_162 = arith.constant dense<0.000000e+00> : vector<1x128xf32>
    %186 = tpu.matmul %183, %185, %cst_162 {dimension_numbers = #tpu.dot_dimension_numbers<[1], [0], [0], [1], [0, 0, 1, 1], [], []>} : vector<1x64xbf16>, vector<64x128xbf16>, vector<1x128xf32> -> vector<1x128xf32>
    %187 = arith.addf %182, %186 : vector<1x128xf32>
    %188 = vector.extract_strided_slice %176 {offsets = [2, 0], sizes = [1, 64], strides = [1, 1]} : vector<16x64xbf16> to vector<1x64xbf16>
    %c2_163 = arith.constant 2 : index
    %c0_164 = arith.constant 0 : index
    %c0_165 = arith.constant 0 : index
    %189 = vector.load %arg10[%c2_163, %c0_164, %c0_165] : memref<16x64x128xbf16, #tpu.memory_space<vmem>>, vector<1x64x128xbf16>
    %190 = vector.shape_cast %189 : vector<1x64x128xbf16> to vector<64x128xbf16>
    %cst_166 = arith.constant dense<0.000000e+00> : vector<1x128xf32>
    %191 = tpu.matmul %188, %190, %cst_166 {dimension_numbers = #tpu.dot_dimension_numbers<[1], [0], [0], [1], [0, 0, 1, 1], [], []>} : vector<1x64xbf16>, vector<64x128xbf16>, vector<1x128xf32> -> vector<1x128xf32>
    %192 = arith.addf %187, %191 : vector<1x128xf32>
    %193 = vector.extract_strided_slice %176 {offsets = [3, 0], sizes = [1, 64], strides = [1, 1]} : vector<16x64xbf16> to vector<1x64xbf16>
    %c3_167 = arith.constant 3 : index
    %c0_168 = arith.constant 0 : index
    %c0_169 = arith.constant 0 : index
    %194 = vector.load %arg10[%c3_167, %c0_168, %c0_169] : memref<16x64x128xbf16, #tpu.memory_space<vmem>>, vector<1x64x128xbf16>
    %195 = vector.shape_cast %194 : vector<1x64x128xbf16> to vector<64x128xbf16>
    %cst_170 = arith.constant dense<0.000000e+00> : vector<1x128xf32>
    %196 = tpu.matmul %193, %195, %cst_170 {dimension_numbers = #tpu.dot_dimension_numbers<[1], [0], [0], [1], [0, 0, 1, 1], [], []>} : vector<1x64xbf16>, vector<64x128xbf16>, vector<1x128xf32> -> vector<1x128xf32>
    %197 = arith.addf %192, %196 : vector<1x128xf32>
    %198 = vector.extract_strided_slice %176 {offsets = [4, 0], sizes = [1, 64], strides = [1, 1]} : vector<16x64xbf16> to vector<1x64xbf16>
    %c4_171 = arith.constant 4 : index
    %c0_172 = arith.constant 0 : index
    %c0_173 = arith.constant 0 : index
    %199 = vector.load %arg10[%c4_171, %c0_172, %c0_173] : memref<16x64x128xbf16, #tpu.memory_space<vmem>>, vector<1x64x128xbf16>
    %200 = vector.shape_cast %199 : vector<1x64x128xbf16> to vector<64x128xbf16>
    %cst_174 = arith.constant dense<0.000000e+00> : vector<1x128xf32>
    %201 = tpu.matmul %198, %200, %cst_174 {dimension_numbers = #tpu.dot_dimension_numbers<[1], [0], [0], [1], [0, 0, 1, 1], [], []>} : vector<1x64xbf16>, vector<64x128xbf16>, vector<1x128xf32> -> vector<1x128xf32>
    %202 = arith.addf %197, %201 : vector<1x128xf32>
    %203 = vector.extract_strided_slice %176 {offsets = [5, 0], sizes = [1, 64], strides = [1, 1]} : vector<16x64xbf16> to vector<1x64xbf16>
    %c5_175 = arith.constant 5 : index
    %c0_176 = arith.constant 0 : index
    %c0_177 = arith.constant 0 : index
    %204 = vector.load %arg10[%c5_175, %c0_176, %c0_177] : memref<16x64x128xbf16, #tpu.memory_space<vmem>>, vector<1x64x128xbf16>
    %205 = vector.shape_cast %204 : vector<1x64x128xbf16> to vector<64x128xbf16>
    %cst_178 = arith.constant dense<0.000000e+00> : vector<1x128xf32>
    %206 = tpu.matmul %203, %205, %cst_178 {dimension_numbers = #tpu.dot_dimension_numbers<[1], [0], [0], [1], [0, 0, 1, 1], [], []>} : vector<1x64xbf16>, vector<64x128xbf16>, vector<1x128xf32> -> vector<1x128xf32>
    %207 = arith.addf %202, %206 : vector<1x128xf32>
    %208 = vector.extract_strided_slice %176 {offsets = [6, 0], sizes = [1, 64], strides = [1, 1]} : vector<16x64xbf16> to vector<1x64xbf16>
    %c6_179 = arith.constant 6 : index
    %c0_180 = arith.constant 0 : index
    %c0_181 = arith.constant 0 : index
    %209 = vector.load %arg10[%c6_179, %c0_180, %c0_181] : memref<16x64x128xbf16, #tpu.memory_space<vmem>>, vector<1x64x128xbf16>
    %210 = vector.shape_cast %209 : vector<1x64x128xbf16> to vector<64x128xbf16>
    %cst_182 = arith.constant dense<0.000000e+00> : vector<1x128xf32>
    %211 = tpu.matmul %208, %210, %cst_182 {dimension_numbers = #tpu.dot_dimension_numbers<[1], [0], [0], [1], [0, 0, 1, 1], [], []>} : vector<1x64xbf16>, vector<64x128xbf16>, vector<1x128xf32> -> vector<1x128xf32>
    %212 = arith.addf %207, %211 : vector<1x128xf32>
    %213 = vector.extract_strided_slice %176 {offsets = [7, 0], sizes = [1, 64], strides = [1, 1]} : vector<16x64xbf16> to vector<1x64xbf16>
    %c7_183 = arith.constant 7 : index
    %c0_184 = arith.constant 0 : index
    %c0_185 = arith.constant 0 : index
    %214 = vector.load %arg10[%c7_183, %c0_184, %c0_185] : memref<16x64x128xbf16, #tpu.memory_space<vmem>>, vector<1x64x128xbf16>
    %215 = vector.shape_cast %214 : vector<1x64x128xbf16> to vector<64x128xbf16>
    %cst_186 = arith.constant dense<0.000000e+00> : vector<1x128xf32>
    %216 = tpu.matmul %213, %215, %cst_186 {dimension_numbers = #tpu.dot_dimension_numbers<[1], [0], [0], [1], [0, 0, 1, 1], [], []>} : vector<1x64xbf16>, vector<64x128xbf16>, vector<1x128xf32> -> vector<1x128xf32>
    %217 = arith.addf %212, %216 : vector<1x128xf32>
    %218 = vector.extract_strided_slice %176 {offsets = [8, 0], sizes = [1, 64], strides = [1, 1]} : vector<16x64xbf16> to vector<1x64xbf16>
    %c8_187 = arith.constant 8 : index
    %c0_188 = arith.constant 0 : index
    %c0_189 = arith.constant 0 : index
    %219 = vector.load %arg10[%c8_187, %c0_188, %c0_189] : memref<16x64x128xbf16, #tpu.memory_space<vmem>>, vector<1x64x128xbf16>
    %220 = vector.shape_cast %219 : vector<1x64x128xbf16> to vector<64x128xbf16>
    %cst_190 = arith.constant dense<0.000000e+00> : vector<1x128xf32>
    %221 = tpu.matmul %218, %220, %cst_190 {dimension_numbers = #tpu.dot_dimension_numbers<[1], [0], [0], [1], [0, 0, 1, 1], [], []>} : vector<1x64xbf16>, vector<64x128xbf16>, vector<1x128xf32> -> vector<1x128xf32>
    %222 = arith.addf %217, %221 : vector<1x128xf32>
    %223 = vector.extract_strided_slice %176 {offsets = [9, 0], sizes = [1, 64], strides = [1, 1]} : vector<16x64xbf16> to vector<1x64xbf16>
    %c9 = arith.constant 9 : index
    %c0_191 = arith.constant 0 : index
    %c0_192 = arith.constant 0 : index
    %224 = vector.load %arg10[%c9, %c0_191, %c0_192] : memref<16x64x128xbf16, #tpu.memory_space<vmem>>, vector<1x64x128xbf16>
    %225 = vector.shape_cast %224 : vector<1x64x128xbf16> to vector<64x128xbf16>
    %cst_193 = arith.constant dense<0.000000e+00> : vector<1x128xf32>
    %226 = tpu.matmul %223, %225, %cst_193 {dimension_numbers = #tpu.dot_dimension_numbers<[1], [0], [0], [1], [0, 0, 1, 1], [], []>} : vector<1x64xbf16>, vector<64x128xbf16>, vector<1x128xf32> -> vector<1x128xf32>
    %227 = arith.addf %222, %226 : vector<1x128xf32>
    %228 = vector.extract_strided_slice %176 {offsets = [10, 0], sizes = [1, 64], strides = [1, 1]} : vector<16x64xbf16> to vector<1x64xbf16>
    %c10 = arith.constant 10 : index
    %c0_194 = arith.constant 0 : index
    %c0_195 = arith.constant 0 : index
    %229 = vector.load %arg10[%c10, %c0_194, %c0_195] : memref<16x64x128xbf16, #tpu.memory_space<vmem>>, vector<1x64x128xbf16>
    %230 = vector.shape_cast %229 : vector<1x64x128xbf16> to vector<64x128xbf16>
    %cst_196 = arith.constant dense<0.000000e+00> : vector<1x128xf32>
    %231 = tpu.matmul %228, %230, %cst_196 {dimension_numbers = #tpu.dot_dimension_numbers<[1], [0], [0], [1], [0, 0, 1, 1], [], []>} : vector<1x64xbf16>, vector<64x128xbf16>, vector<1x128xf32> -> vector<1x128xf32>
    %232 = arith.addf %227, %231 : vector<1x128xf32>
    %233 = vector.extract_strided_slice %176 {offsets = [11, 0], sizes = [1, 64], strides = [1, 1]} : vector<16x64xbf16> to vector<1x64xbf16>
    %c11 = arith.constant 11 : index
    %c0_197 = arith.constant 0 : index
    %c0_198 = arith.constant 0 : index
    %234 = vector.load %arg10[%c11, %c0_197, %c0_198] : memref<16x64x128xbf16, #tpu.memory_space<vmem>>, vector<1x64x128xbf16>
    %235 = vector.shape_cast %234 : vector<1x64x128xbf16> to vector<64x128xbf16>
    %cst_199 = arith.constant dense<0.000000e+00> : vector<1x128xf32>
    %236 = tpu.matmul %233, %235, %cst_199 {dimension_numbers = #tpu.dot_dimension_numbers<[1], [0], [0], [1], [0, 0, 1, 1], [], []>} : vector<1x64xbf16>, vector<64x128xbf16>, vector<1x128xf32> -> vector<1x128xf32>
    %237 = arith.addf %232, %236 : vector<1x128xf32>
    %238 = vector.extract_strided_slice %176 {offsets = [12, 0], sizes = [1, 64], strides = [1, 1]} : vector<16x64xbf16> to vector<1x64xbf16>
    %c12 = arith.constant 12 : index
    %c0_200 = arith.constant 0 : index
    %c0_201 = arith.constant 0 : index
    %239 = vector.load %arg10[%c12, %c0_200, %c0_201] : memref<16x64x128xbf16, #tpu.memory_space<vmem>>, vector<1x64x128xbf16>
    %240 = vector.shape_cast %239 : vector<1x64x128xbf16> to vector<64x128xbf16>
    %cst_202 = arith.constant dense<0.000000e+00> : vector<1x128xf32>
    %241 = tpu.matmul %238, %240, %cst_202 {dimension_numbers = #tpu.dot_dimension_numbers<[1], [0], [0], [1], [0, 0, 1, 1], [], []>} : vector<1x64xbf16>, vector<64x128xbf16>, vector<1x128xf32> -> vector<1x128xf32>
    %242 = arith.addf %237, %241 : vector<1x128xf32>
    %243 = vector.extract_strided_slice %176 {offsets = [13, 0], sizes = [1, 64], strides = [1, 1]} : vector<16x64xbf16> to vector<1x64xbf16>
    %c13 = arith.constant 13 : index
    %c0_203 = arith.constant 0 : index
    %c0_204 = arith.constant 0 : index
    %244 = vector.load %arg10[%c13, %c0_203, %c0_204] : memref<16x64x128xbf16, #tpu.memory_space<vmem>>, vector<1x64x128xbf16>
    %245 = vector.shape_cast %244 : vector<1x64x128xbf16> to vector<64x128xbf16>
    %cst_205 = arith.constant dense<0.000000e+00> : vector<1x128xf32>
    %246 = tpu.matmul %243, %245, %cst_205 {dimension_numbers = #tpu.dot_dimension_numbers<[1], [0], [0], [1], [0, 0, 1, 1], [], []>} : vector<1x64xbf16>, vector<64x128xbf16>, vector<1x128xf32> -> vector<1x128xf32>
    %247 = arith.addf %242, %246 : vector<1x128xf32>
    %248 = vector.extract_strided_slice %176 {offsets = [14, 0], sizes = [1, 64], strides = [1, 1]} : vector<16x64xbf16> to vector<1x64xbf16>
    %c14 = arith.constant 14 : index
    %c0_206 = arith.constant 0 : index
    %c0_207 = arith.constant 0 : index
    %249 = vector.load %arg10[%c14, %c0_206, %c0_207] : memref<16x64x128xbf16, #tpu.memory_space<vmem>>, vector<1x64x128xbf16>
    %250 = vector.shape_cast %249 : vector<1x64x128xbf16> to vector<64x128xbf16>
    %cst_208 = arith.constant dense<0.000000e+00> : vector<1x128xf32>
    %251 = tpu.matmul %248, %250, %cst_208 {dimension_numbers = #tpu.dot_dimension_numbers<[1], [0], [0], [1], [0, 0, 1, 1], [], []>} : vector<1x64xbf16>, vector<64x128xbf16>, vector<1x128xf32> -> vector<1x128xf32>
    %252 = arith.addf %247, %251 : vector<1x128xf32>
    %253 = vector.extract_strided_slice %176 {offsets = [15, 0], sizes = [1, 64], strides = [1, 1]} : vector<16x64xbf16> to vector<1x64xbf16>
    %c15 = arith.constant 15 : index
    %c0_209 = arith.constant 0 : index
    %c0_210 = arith.constant 0 : index
    %254 = vector.load %arg10[%c15, %c0_209, %c0_210] : memref<16x64x128xbf16, #tpu.memory_space<vmem>>, vector<1x64x128xbf16>
    %255 = vector.shape_cast %254 : vector<1x64x128xbf16> to vector<64x128xbf16>
    %cst_211 = arith.constant dense<0.000000e+00> : vector<1x128xf32>
    %256 = tpu.matmul %253, %255, %cst_211 {dimension_numbers = #tpu.dot_dimension_numbers<[1], [0], [0], [1], [0, 0, 1, 1], [], []>} : vector<1x64xbf16>, vector<64x128xbf16>, vector<1x128xf32> -> vector<1x128xf32>
    %257 = arith.addf %252, %256 : vector<1x128xf32>
    %c0_212 = arith.constant 0 : index
    %c0_213 = arith.constant 0 : index
    %258 = vector.load %arg11[%c0_212, %c0_213] : memref<1x128xf32, #tpu.memory_space<vmem>>, vector<1x128xf32>
    %259 = arith.addf %257, %258 : vector<1x128xf32>
    %cst_214 = arith.constant 0.000000e+00 : f32
    %260 = vector.broadcast %cst_214 : f32 to vector<1x128xf32>
    %261 = arith.cmpf ogt, %259, %260 : vector<1x128xf32>
    %cst_215 = arith.constant 2.000000e-01 : f32
    %262 = vector.broadcast %cst_215 : f32 to vector<1x128xf32>
    %263 = arith.mulf %262, %259 : vector<1x128xf32>
    %264 = arith.select %261, %259, %263 : vector<1x128xi1>, vector<1x128xf32>
    %c0_216 = arith.constant 0 : index
    %c0_217 = arith.constant 0 : index
    %265 = vector.load %arg12[%c0_216, %c0_217] : memref<1x128xf32, #tpu.memory_space<vmem>>, vector<1x128xf32>
    %266 = arith.mulf %264, %265 : vector<1x128xf32>
    %cst_218 = arith.constant dense<0.000000e+00> : vector<1xf32>
    %267 = vector.multi_reduction <add>, %266, %cst_218 [1] : vector<1x128xf32> to vector<1xf32>
    %268 = vector.shape_cast %267 : vector<1xf32> to vector<1x1xf32>
    %c0_219 = arith.constant 0 : index
    %c0_220 = arith.constant 0 : index
    %269 = vector.load %arg13[%c0_219, %c0_220] : memref<1x1xf32, #tpu.memory_space<vmem>>, vector<1x1xf32>
    %270 = arith.addf %268, %269 : vector<1x1xf32>
    %cst_221 = arith.constant 0.000000e+00 : f32
    %271 = vector.broadcast %cst_221 : f32 to vector<1x1xf32>
    %272 = arith.subf %271, %270 : vector<1x1xf32>
    %273 = math.exp %272 : vector<1x1xf32>
    %cst_222 = arith.constant 1.000000e+00 : f32
    %274 = vector.broadcast %cst_222 : f32 to vector<1x1xf32>
    %275 = arith.addf %274, %273 : vector<1x1xf32>
    %cst_223 = arith.constant 1.000000e+00 : f32
    %276 = vector.broadcast %cst_223 : f32 to vector<1x1xf32>
    %277 = arith.divf %276, %275 : vector<1x1xf32>
    %278 = vector.shape_cast %277 : vector<1x1xf32> to vector<1x1xf32>
    %279 = vector.broadcast %278 : vector<1x1xf32> to vector<1x128xf32>
    %c0_224 = arith.constant 0 : index
    %c0_225 = arith.constant 0 : index
    %c0_226 = arith.constant 0 : index
    %280 = vector.load %arg14[%c0_224, %c0_225, %c0_226] : memref<1x1x128xf32, #tpu.memory_space<vmem>>, vector<1x1x128xf32>
    %281 = vector.shape_cast %280 : vector<1x1x128xf32> to vector<1x128xf32>
    %282 = vector.shape_cast %279 : vector<1x128xf32> to vector<1x1x128xf32>
    tpu.vector_store %arg14[%c0_224, %c0_225, %c0_226], %282 {strides = array<i32>} : memref<1x1x128xf32, #tpu.memory_space<vmem>>, vector<1x1x128xf32>,
    return
  }
  func.func @transform_0(%arg0: i32) -> (i32, i32, i32) {
    %c0_i32 = arith.constant 0 : i32
    %c0_i32_0 = arith.constant 0 : i32
    %c0_i32_1 = arith.constant 0 : i32
    return %arg0, %c0_i32, %c0_i32_0 : i32, i32, i32
  }
  func.func @transform_1(%arg0: i32) -> (i32, i32) {
    %c0_i32 = arith.constant 0 : i32
    %c0_i32_0 = arith.constant 0 : i32
    %c0_i32_1 = arith.constant 0 : i32
    return %c0_i32, %c0_i32_0 : i32, i32
  }
  func.func @transform_2(%arg0: i32) -> (i32, i32) {
    %c0_i32 = arith.constant 0 : i32
    %c0_i32_0 = arith.constant 0 : i32
    %c0_i32_1 = arith.constant 0 : i32
    return %c0_i32, %c0_i32_0 : i32, i32
  }
  func.func @transform_3(%arg0: i32) -> (i32, i32, i32) {
    %c0_i32 = arith.constant 0 : i32
    %c0_i32_0 = arith.constant 0 : i32
    %c0_i32_1 = arith.constant 0 : i32
    %c0_i32_2 = arith.constant 0 : i32
    return %c0_i32, %c0_i32_0, %c0_i32_1 : i32, i32, i32
  }
  func.func @transform_4(%arg0: i32) -> (i32, i32, i32) {
    %c0_i32 = arith.constant 0 : i32
    %c0_i32_0 = arith.constant 0 : i32
    %c0_i32_1 = arith.constant 0 : i32
    %c0_i32_2 = arith.constant 0 : i32
    return %c0_i32, %c0_i32_0, %c0_i32_1 : i32, i32, i32
  }
  func.func @transform_5(%arg0: i32) -> (i32, i32) {
    %c0_i32 = arith.constant 0 : i32
    %c0_i32_0 = arith.constant 0 : i32
    %c0_i32_1 = arith.constant 0 : i32
    return %c0_i32, %c0_i32_0 : i32, i32
  }
  func.func @transform_6(%arg0: i32) -> (i32, i32, i32) {
    %c0_i32 = arith.constant 0 : i32
    %c0_i32_0 = arith.constant 0 : i32
    %c0_i32_1 = arith.constant 0 : i32
    %c0_i32_2 = arith.constant 0 : i32
    return %c0_i32, %c0_i32_0, %c0_i32_1 : i32, i32, i32
  }
  func.func @transform_7(%arg0: i32) -> (i32, i32, i32) {
    %c0_i32 = arith.constant 0 : i32
    %c0_i32_0 = arith.constant 0 : i32
    %c0_i32_1 = arith.constant 0 : i32
    %c0_i32_2 = arith.constant 0 : i32
    return %c0_i32, %c0_i32_0, %c0_i32_1 : i32, i32, i32
  }
  func.func @transform_8(%arg0: i32) -> (i32, i32) {
    %c0_i32 = arith.constant 0 : i32
    %c0_i32_0 = arith.constant 0 : i32
    %c0_i32_1 = arith.constant 0 : i32
    return %c0_i32, %c0_i32_0 : i32, i32
  }
  func.func @transform_9(%arg0: i32) -> (i32, i32, i32) {
    %c0_i32 = arith.constant 0 : i32
    %c0_i32_0 = arith.constant 0 : i32
    %c0_i32_1 = arith.constant 0 : i32
    %c0_i32_2 = arith.constant 0 : i32
    return %c0_i32, %c0_i32_0, %c0_i32_1 : i32, i32, i32
  }
  func.func @transform_10(%arg0: i32) -> (i32, i32) {
    %c0_i32 = arith.constant 0 : i32
    %c0_i32_0 = arith.constant 0 : i32
    %c0_i32_1 = arith.constant 0 : i32
    return %c0_i32, %c0_i32_0 : i32, i32
  }
  func.func @transform_11(%arg0: i32) -> (i32, i32) {
    %c0_i32 = arith.constant 0 : i32
    %c0_i32_0 = arith.constant 0 : i32
    %c0_i32_1 = arith.constant 0 : i32
    return %c0_i32, %c0_i32_0 : i32, i32
  }
  func.func @transform_12(%arg0: i32) -> (i32, i32) {
    %c0_i32 = arith.constant 0 : i32
    %c0_i32_0 = arith.constant 0 : i32
    %c0_i32_1 = arith.constant 0 : i32
    return %c0_i32, %c0_i32_0 : i32, i32
  }
  func.func @transform_13(%arg0: i32) -> (i32, i32, i32) {
    %c0_i32 = arith.constant 0 : i32
    %c0_i32_0 = arith.constant 0 : i32
    %c0_i32_1 = arith.constant 0 : i32
    return %arg0, %c0_i32, %c0_i32_0 : i32, i32, i32
  }
}

</mosaic_0001>

<bundles_post_ra>
// kernel: discriminator_forward.1
= control target key start
LH: loop header
LB: loop body
LE: loop exit
PB: predicated region body
PF: predicated region fallthrough
CT: control target
= control target key end

     0   :  { %s6770_s27 = smov 0   ;;  %s8166_s0 = inlined_call_operand.vmem [shape: bf16[2,196,9], index: 0, kind: input, shape index: {}]   ;;  %s8167_s1 = inlined_call_operand.vmem [shape: bf16[9,16], index: 1, kind: input, shape index: {}]   ;;  %s8168_s2 = inlined_call_operand.vmem [shape: f32[1,16], index: 2, kind: input, shape index: {}]   ;;  %s8169_s3 = inlined_call_operand.vmem [shape: bf16[9,49,196], index: 3, kind: input, shape index: {}]   ;;  %s8170_s4 = inlined_call_operand.vmem [shape: bf16[9,16,32], index: 4, kind: input, shape index: {}]   ;;  %s8171_s5 = inlined_call_operand.vmem [shape: f32[1,32], index: 5, kind: input, shape index: {}]   ;;  %s8172_s6 = inlined_call_operand.vmem [shape: bf16[9,16,49], index: 6, kind: input, shape index: {}]   ;;  %s8173_s7 = inlined_call_operand.vmem [shape: bf16[9,32,64], index: 7, kind: input, shape index: {}]   ;;  %s8174_s8 = inlined_call_operand.vmem [shape: f32[1,64], index: 8, kind: input, shape index: {}]   ;;  %s8175_s9 = inlined_call_operand.vmem [shape: bf16[16,64,128], index: 9, kind: input, shape index: {}]   ;;  %s8176_s10 = inlined_call_operand.vmem [shape: f32[1,128], index: 10, kind: input, shape index: {}]   ;;  %s8177_s11 = inlined_call_operand.vmem [shape: f32[1,128], index: 11, kind: input, shape index: {}]   ;;  %s8178_s12 = inlined_call_operand.<no memory space> [shape: f32[1,1], index: 12, kind: input, shape index: {}]   ;;  %s8179_s13 = inlined_call_operand.vmem [shape: f32[2,1,128], index: 13, kind: output, shape index: {}]  }
   0x1   :  { %v18_v0 = vstv %s8178_s12 }
   0x2   :  { %19 = vst [vmem:[#allocation2] sm:$0x1] %v18_v0 }
   0x3 LB: > { %s5139_s28 = sadd.s32 4294967295, %s6691_s27   ;;  %p5143_p0 = scmp.ge.s32.totalorder %s6691_s27, 1  ;;  %s6691_s27 = sphi %s6770_s27, %s25_s27  }
   0x4   : > { %p389_p1 = scmp.lt.s32.totalorder %s6691_s27, 3 }
   0x6   : > { %p390_p2 = pnand %p5143_p0, %p389_p1 }
   0x7   : > { %vm582_vm0 = vcmask (!%p390_p2), 1043456   ;;  %v6693_v1 = vmov (!%p390_p2), 0.0   ;;  %v6468_v2 = vld [vmem:[%s8167_s1] sm:$0x1f] (!%p390_p2)   ;;  %vm583_vm1 = vcmask (!%p390_p2), 1044480   ;;  %p431_p3 = scmp.lt.s32.totalorder (!%p390_p2), %s5139_s28, 1 }
   0x8   : > { %393 = sbr.rel (%p390_p2) target bundleno = 4020 (0xfb4), region = 72  ;;  %5906 = vmatprep.subr.bf16.mxu0 (!%p390_p2), %v6693_v1  ;;  %v6694_v3 = vmov (!%p390_p2), 65535   ;;  %vm6695_vm2 = vmmov (!%p390_p2), 0   ;;  %vm542_vm3 = vcmask (!%p390_p2), 72704   ;;  %v6696_v20 = vmov (!%p390_p2), 0  }
   0x9   : > { %v584_v4 = vsel (!%p390_p2), %vm582_vm0, 4294967295, %v6694_v3  ;;  %5908 = vmatprep.mubr.msk.bf16.mxu0 (!%p390_p2), %vm6695_vm2, %v6693_v1  ;;  %870 = vmatprep.subr.bf16.mxu1 (!%p390_p2), %v6696_v20  ;;  %v6484_v21 = vld [vmem:[%s8169_s3 + $0x4] ss:$8 sps:$4 sm:$0xff] (!%p390_p2)   ;;  %vm853_vm4 = vcmask (!%p390_p2), 556032   ;;  %v6851_v22 = vld [vmem:[%s8168_s2] ss:$0 sm:$0xff] (!%p390_p2) }
   0xa   : > { %v585_v5 = vsel (!%p390_p2), %vm583_vm1, %v584_v4, 0  ;;  %6467 = vset.pattern.permute.xlu0 (!%p390_p2), %v6696_v20  ;;  %5181 = vmatprep.mubr.msk.bf16.mxu1 (!%p390_p2), %vm853_vm4, %v6484_v21 }
   0xb   : > { %v587_v6 = vand.u32 (!%p390_p2), %v6468_v2, %v585_v5 }
   0xd   : > { %5907 = vmatpush3.bf16.msra.mxu0 (!%p390_p2), %v587_v6 }
   0xf   : > { %s8181_s28 = smov (!%p431_p3, %s5139_s28), 1 }
  0x10   : > { %s6454_s30 = smul.u32 100, %s8181_s28  ;;  %s438_s19 = scalar_lea.vmem %s8179_s13, %s8181_s28 }
  0x12   : > { %s6790_s16 = scalar_lea.vmem %s8166_s0, %s6454_s30 }
  0x13   : > { %v6469_v7 = vld [vmem:[%s6790_s16] sm:$0xff]   ;;  %v6470_v8 = vld [vmem:[%s6790_s16 + $0x8] sm:$0xff]   ;;  %v6471_v9 = vld [vmem:[%s6790_s16 + $0x10] sm:$0xff]  }
  0x14   : > { %5909 = vmatmul.mubr.msk.bf16.vlgmr.msra.gmra.mrb[0].mxu0 %vm542_vm3, %v6469_v7  ;;  %v6472_v10 = vld [vmem:[%s6790_s16 + $0x18] sm:$0xff]   ;;  %v6473_v11 = vld [vmem:[%s6790_s16 + $0x20] sm:$0xff]   ;;  %v6474_v12 = vld [vmem:[%s6790_s16 + $0x28] sm:$0xff]  }
  0x15   : > { %5912 = vmatprep.mubr.msk.bf16.mxu0 %vm6695_vm2, %v6693_v1  ;;  %v6475_v13 = vld [vmem:[%s6790_s16 + $0x30] sm:$0xff]   ;;  %v6476_v14 = vld [vmem:[%s6790_s16 + $0x38] sm:$0xff]   ;;  %v6477_v15 = vld [vmem:[%s6790_s16 + $0x40] sm:$0xff]  }
  0x16   : > { %v6478_v16 = vld [vmem:[%s6790_s16 + $0x48] sm:$0xff]   ;;  %v6479_v17 = vld [vmem:[%s6790_s16 + $0x50] sm:$0xff]   ;;  %v6480_v18 = vld [vmem:[%s6790_s16 + $0x58] sm:$0xff]  }
  0x17   : > { %v6481_v19 = vld [vmem:[%s6790_s16 + $0x60] ss:$0 sps:$4 sm:$0x33]  }
  0x1c   : > { %5913 = vmatmul.mubr.msk.bf16.gmra.mrb[4].mxu0 %vm542_vm3, %v6470_v8 }
  0x1d   : > { %5916 = vmatprep.mubr.msk.bf16.mxu0 %vm6695_vm2, %v6693_v1 }
  0x24   : > { %5917 = vmatmul.mubr.msk.bf16.gmra.mrb[8].mxu0 %vm542_vm3, %v6471_v9 }
  0x25   : > { %5920 = vmatprep.mubr.msk.bf16.mxu0 %vm6695_vm2, %v6693_v1 }
  0x2c   : > { %5921 = vmatmul.mubr.msk.bf16.gmra.mrb[12].mxu0 %vm542_vm3, %v6472_v10 }
  0x2d   : > { %5924 = vmatprep.mubr.msk.bf16.mxu0 %vm6695_vm2, %v6693_v1 }
  0x34   : > { %5925 = vmatmul.mubr.msk.bf16.gmra.mrb[16].mxu0 %vm542_vm3, %v6473_v11 }
  0x35   : > { %5928 = vmatprep.mubr.msk.bf16.mxu0 %vm6695_vm2, %v6693_v1 }
  0x3c   : > { %5929 = vmatmul.mubr.msk.bf16.gmra.mrb[20].mxu0 %vm542_vm3, %v6474_v12 }
  0x3d   : > { %5932 = vmatprep.mubr.msk.bf16.mxu0 %vm6695_vm2, %v6693_v1 }
  0x44   : > { %5933 = vmatmul.mubr.msk.bf16.gmra.mrb[24].mxu0 %vm542_vm3, %v6475_v13 }
  0x45   : > { %5936 = vmatprep.mubr.msk.bf16.mxu0 %vm6695_vm2, %v6693_v1 }
  0x4c   : > { %5937 = vmatmul.mubr.msk.bf16.gmra.mrb[28].mxu0 %vm542_vm3, %v6476_v14 }
  0x4d   : > { %5940 = vmatprep.mubr.msk.bf16.mxu0 %vm6695_vm2, %v6693_v1 }
  0x54   : > { %5941 = vmatmul.mubr.msk.bf16.gmra.mrb[32].mxu0 %vm542_vm3, %v6477_v15 }
  0x55   : > { %5944 = vmatprep.mubr.msk.bf16.mxu0 %vm6695_vm2, %v6693_v1 }
  0x5c   : > { %5945 = vmatmul.mubr.msk.bf16.gmra.mrb[36].mxu0 %vm542_vm3, %v6478_v16 }
  0x5d   : > { %5948 = vmatprep.mubr.msk.bf16.mxu0 %vm6695_vm2, %v6693_v1 }
  0x64   : > { %5949 = vmatmul.mubr.msk.bf16.gmra.mrb[40].mxu0 %vm542_vm3, %v6479_v17 }
  0x65   : > { %5952 = vmatprep.mubr.msk.bf16.mxu0 %vm6695_vm2, %v6693_v1 }
  0x6c   : > { %5953 = vmatmul.mubr.msk.bf16.gmra.mrb[44].mxu0 %vm542_vm3, %v6480_v18 }
  0x6d   : > { %5956 = vmatprep.mubr.msk.bf16.mxu0 %vm6695_vm2, %v6693_v1 }
  0x74   : > { %5957 = vmatmul.mubr.msk.bf16.gmra.mrb[48].mxu0 %vm542_vm3, %v6481_v19 }
  0xe7   : > { %v623_v23 = vpop.f32.mrb[0].mxu0 }
  0xe8   : > { %v624_v24 = vadd.f32 %v6851_v22, %v623_v23  ;;  %v5910_v25 = vpop.f32.mrb[1].mxu0 }
  0xe9   : > { %v626_v26 = vpop.f32.mrb[2].mxu0 }
  0xea   : > { %v750_v27 = vmul.f32 0.2, %v624_v24  ;;  %v627_v28 = vadd.f32 %v6851_v22, %v626_v26  ;;  %v5911_v29 = vpop.f32.mrb[3].mxu0  ;;  %vm725_vm5 = vcmp.gt.f32.partialorder %v624_v24, 0.0 }
  0xec   : > { %vm726_vm6 = vcmp.gt.f32.partialorder %v627_v28, 0.0  ;;  %v751_v30 = vmul.f32 0.2, %v627_v28  ;;  %v775_v31 = vsel %vm725_vm5, %v624_v24, %v750_v27 }
  0xee   : > { %v776_v32 = vsel %vm726_vm6, %v627_v28, %v751_v30 }
  0xef   : > { %v6855_v33 = vpack.c.bf16 %v776_v32, %v775_v31  ;;  %v631_v34 = vpop.f32.mrb[4].mxu0 }
  0xf0   : > { %v632_v35 = vadd.f32 %v6851_v22, %v631_v34  ;;  %v5914_v36 = vpop.f32.mrb[5].mxu0 }
  0xf1   : > { %v634_v37 = vpop.f32.mrb[6].mxu0  ;;  %871 = vmatpush1.bf16.msra.mxu1 %v6855_v33 }
  0xf2   : > { %v752_v38 = vmul.f32 0.2, %v632_v35  ;;  %v635_v39 = vadd.f32 %v6851_v22, %v634_v37  ;;  %v5915_v40 = vpop.f32.mrb[7].mxu0  ;;  %872 = vmatprep.subr.bf16.mxu1 %v6696_v20  ;;  %vm727_vm7 = vcmp.gt.f32.partialorder %v632_v35, 0.0 }
  0xf4   : > { %vm728_vm8 = vcmp.gt.f32.partialorder %v635_v39, 0.0  ;;  %v753_v41 = vmul.f32 0.2, %v635_v39  ;;  %v777_v42 = vsel %vm727_vm7, %v632_v35, %v752_v38 }
  0xf6   : > { %v778_v43 = vsel %vm728_vm8, %v635_v39, %v753_v41 }
  0xf7   : > { %v6861_v44 = vpack.c.bf16 %v778_v43, %v777_v42  ;;  %v639_v45 = vpop.f32.mrb[8].mxu0 }
  0xf8   : > { %v640_v46 = vadd.f32 %v6851_v22, %v639_v45  ;;  %v5918_v47 = vpop.f32.mrb[9].mxu0 }
  0xf9   : > { %v642_v48 = vpop.f32.mrb[10].mxu0  ;;  %873 = vmatpush1.bf16.msra.mxu1 %v6861_v44 }
  0xfa   : > { %v754_v49 = vmul.f32 0.2, %v640_v46  ;;  %v643_v50 = vadd.f32 %v6851_v22, %v642_v48  ;;  %v5919_v51 = vpop.f32.mrb[11].mxu0  ;;  %874 = vmatprep.subr.bf16.mxu1 %v6696_v20  ;;  %vm729_vm9 = vcmp.gt.f32.partialorder %v640_v46, 0.0 }
  0xfc   : > { %vm730_vm10 = vcmp.gt.f32.partialorder %v643_v50, 0.0  ;;  %v755_v52 = vmul.f32 0.2, %v643_v50  ;;  %v779_v53 = vsel %vm729_vm9, %v640_v46, %v754_v49 }
  0xfe   : > { %v780_v54 = vsel %vm730_vm10, %v643_v50, %v755_v52 }
  0xff   : > { %v6867_v55 = vpack.c.bf16 %v780_v54, %v779_v53  ;;  %v647_v56 = vpop.f32.mrb[12].mxu0 }
 0x100   : > { %v648_v57 = vadd.f32 %v6851_v22, %v647_v56  ;;  %v5922_v58 = vpop.f32.mrb[13].mxu0 }
 0x101   : > { %v650_v59 = vpop.f32.mrb[14].mxu0  ;;  %875 = vmatpush1.bf16.msra.mxu1 %v6867_v55 }
 0x102   : > { %v756_v60 = vmul.f32 0.2, %v648_v57  ;;  %v651_v61 = vadd.f32 %v6851_v22, %v650_v59  ;;  %v5923_v62 = vpop.f32.mrb[15].mxu0  ;;  %876 = vmatprep.subr.bf16.mxu1 %v6696_v20  ;;  %vm731_vm11 = vcmp.gt.f32.partialorder %v648_v57, 0.0 }
 0x104   : > { %vm732_vm12 = vcmp.gt.f32.partialorder %v651_v61, 0.0  ;;  %v757_v63 = vmul.f32 0.2, %v651_v61  ;;  %v781_v0 = vsel %vm731_vm11, %v648_v57, %v756_v60 }
 0x106   : > { %v782_v2 = vsel %vm732_vm12, %v651_v61, %v757_v63 }
 0x107   : > { %v6873_v3 = vpack.c.bf16 %v782_v2, %v781_v0  ;;  %v655_v4 = vpop.f32.mrb[16].mxu0 }
 0x108   : > { %v656_v5 = vadd.f32 %v6851_v22, %v655_v4  ;;  %v5926_v6 = vpop.f32.mrb[17].mxu0 }
 0x109   : > { %v658_v7 = vpop.f32.mrb[18].mxu0  ;;  %877 = vmatpush1.bf16.msra.mxu1 %v6873_v3 }
 0x10a   : > { %v758_v8 = vmul.f32 0.2, %v656_v5  ;;  %v659_v9 = vadd.f32 %v6851_v22, %v658_v7  ;;  %v5927_v10 = vpop.f32.mrb[19].mxu0  ;;  %878 = vmatprep.subr.bf16.mxu1 %v6696_v20  ;;  %vm733_vm13 = vcmp.gt.f32.partialorder %v656_v5, 0.0 }
 0x10c   : > { %vm734_vm14 = vcmp.gt.f32.partialorder %v659_v9, 0.0  ;;  %v759_v11 = vmul.f32 0.2, %v659_v9  ;;  %v783_v12 = vsel %vm733_vm13, %v656_v5, %v758_v8 }
 0x10e   : > { %v784_v13 = vsel %vm734_vm14, %v659_v9, %v759_v11 }
 0x10f   : > { %v6879_v14 = vpack.c.bf16 %v784_v13, %v783_v12  ;;  %v663_v15 = vpop.f32.mrb[20].mxu0 }
 0x110   : > { %v664_v16 = vadd.f32 %v6851_v22, %v663_v15  ;;  %v5930_v17 = vpop.f32.mrb[21].mxu0 }
 0x111   : > { %v666_v18 = vpop.f32.mrb[22].mxu0  ;;  %879 = vmatpush1.bf16.msra.mxu1 %v6879_v14 }
 0x112   : > { %v760_v19 = vmul.f32 0.2, %v664_v16  ;;  %v667_v21 = vadd.f32 %v6851_v22, %v666_v18  ;;  %v5931_v23 = vpop.f32.mrb[23].mxu0  ;;  %880 = vmatprep.subr.bf16.mxu1 %v6696_v20  ;;  %vm735_vm15 = vcmp.gt.f32.partialorder %v664_v16, 0.0 }
 0x114   : > { %vm736_vm0 = vcmp.gt.f32.partialorder %v667_v21, 0.0  ;;  %v761_v24 = vmul.f32 0.2, %v667_v21  ;;  %v785_v25 = vsel %vm735_vm15, %v664_v16, %v760_v19 }
 0x116   : > { %v786_v26 = vsel %vm736_vm0, %v667_v21, %v761_v24  ;;  %vm866_vm0 = vcmask 1041408  }
 0x117   : > { %v6885_v27 = vpack.c.bf16 %v786_v26, %v785_v25  ;;  %v671_v28 = vpop.f32.mrb[24].mxu0 }
 0x118   : > { %v672_v29 = vadd.f32 %v6851_v22, %v671_v28  ;;  %v5934_v30 = vpop.f32.mrb[25].mxu0 }
 0x119   : > { %v674_v31 = vpop.f32.mrb[26].mxu0  ;;  %881 = vmatpush1.bf16.msra.mxu1 %v6885_v27 }
 0x11a   : > { %v762_v32 = vmul.f32 0.2, %v672_v29  ;;  %v675_v34 = vadd.f32 %v6851_v22, %v674_v31  ;;  %v5935_v35 = vpop.f32.mrb[27].mxu0  ;;  %882 = vmatprep.subr.bf16.mxu1 %v6696_v20  ;;  %vm737_vm1 = vcmp.gt.f32.partialorder %v672_v29, 0.0 }
 0x11c   : > { %vm738_vm3 = vcmp.gt.f32.partialorder %v675_v34, 0.0  ;;  %v763_v36 = vmul.f32 0.2, %v675_v34  ;;  %v787_v37 = vsel %vm737_vm1, %v672_v29, %v762_v32  ;;  %vm1070_vm1 = vcmask 130048  }
 0x11e   : > { %v788_v38 = vsel %vm738_vm3, %v675_v34, %v763_v36 }
 0x11f   : > { %v6891_v39 = vpack.c.bf16 %v788_v38, %v787_v37  ;;  %v679_v40 = vpop.f32.mrb[28].mxu0 }
 0x120   : > { %v680_v41 = vadd.f32 %v6851_v22, %v679_v40  ;;  %v5938_v42 = vpop.f32.mrb[29].mxu0 }
 0x121   : > { %v682_v43 = vpop.f32.mrb[30].mxu0  ;;  %883 = vmatpush1.bf16.msra.mxu1 %v6891_v39 }
 0x122   : > { %v764_v45 = vmul.f32 0.2, %v680_v41  ;;  %v683_v46 = vadd.f32 %v6851_v22, %v682_v43  ;;  %v5939_v47 = vpop.f32.mrb[31].mxu0  ;;  %884 = vmatprep.subr.bf16.mxu1 %v6696_v20  ;;  %vm739_vm5 = vcmp.gt.f32.partialorder %v680_v41, 0.0 }
 0x124   : > { %vm740_vm6 = vcmp.gt.f32.partialorder %v683_v46, 0.0  ;;  %v765_v48 = vmul.f32 0.2, %v683_v46  ;;  %v789_v49 = vsel %vm739_vm5, %v680_v41, %v764_v45 }
 0x126   : > { %v790_v50 = vsel %vm740_vm6, %v683_v46, %v765_v48 }
 0x127   : > { %v6897_v51 = vpack.c.bf16 %v790_v50, %v789_v49  ;;  %v687_v52 = vpop.f32.mrb[32].mxu0 }
 0x128   : > { %v688_v53 = vadd.f32 %v6851_v22, %v687_v52  ;;  %v5942_v54 = vpop.f32.mrb[33].mxu0  ;;  %v6482_v52 = vld [vmem:[%s8169_s3] ss:$8 sps:$4 sm:$0xff]  }
 0x129   : > { %v690_v56 = vpop.f32.mrb[34].mxu0  ;;  %885 = vmatpush1.bf16.msra.mxu1 %v6897_v51  ;;  %v6488_v54 = vld [vmem:[%s8169_s3 + $0x24] ss:$8 sps:$4 sm:$0xff]  }
 0x12a   : > { %v766_v57 = vmul.f32 0.2, %v688_v53  ;;  %v691_v58 = vadd.f32 %v6851_v22, %v690_v56  ;;  %v5943_v59 = vpop.f32.mrb[35].mxu0  ;;  %886 = vmatprep.subr.bf16.mxu1 %v6696_v20  ;;  %vm741_vm7 = vcmp.gt.f32.partialorder %v688_v53, 0.0  ;;  %v819_v56 = vld [vmem:[%s8169_s3 + $0x30] sm:$0x11] }
 0x12b   : > { %v5179_v59 = vcombine.low %v819_v56, %v819_v56 }
 0x12c   : > { %vm742_vm8 = vcmp.gt.f32.partialorder %v691_v58, 0.0  ;;  %v767_v60 = vmul.f32 0.2, %v691_v58  ;;  %v791_v61 = vsel %vm741_vm7, %v688_v53, %v766_v57  ;;  %v6487_v53 = vld [vmem:[%s8169_s3 + $0x10] ss:$8 sps:$4 sm:$0xff]  }
 0x12d   : > { %v6490_v57 = vld [vmem:[%s8169_s3 + $0x20] ss:$8 sps:$4 sm:$0xff]  }
 0x12e   : > { %v792_v62 = vsel %vm742_vm8, %v691_v58, %v767_v60  ;;  %v5180_v58 = vcombine.high %v819_v56, %v819_v56  ;;  %v6495_v60 = vld [vmem:[%s8169_s3 + $0x3c] ss:$8 sps:$4 sm:$0xff]  }
 0x12f   : > { %v6903_v63 = vpack.c.bf16 %v792_v62, %v791_v61  ;;  %v695_v0 = vpop.f32.mrb[36].mxu0  ;;  %v6493_v61 = vld [vmem:[%s8169_s3 + $0x38] ss:$8 sps:$4 sm:$0xff]   ;;  %v6496_v62 = vld [vmem:[%s8169_s3 + $0x4c] ss:$8 sps:$4 sm:$0xff]  }
 0x130   : > { %v696_v2 = vadd.f32 %v6851_v22, %v695_v0  ;;  %v5946_v4 = vpop.f32.mrb[37].mxu0  ;;  %v6498_v0 = vld [vmem:[%s8169_s3 + $0x48] ss:$8 sps:$4 sm:$0xff]  }
 0x131   : > { %v698_v5 = vpop.f32.mrb[38].mxu0  ;;  %887 = vmatpush1.bf16.msra.mxu1 %v6903_v63  ;;  %v5191_v4 = vld [vmem:[%s8169_s3 + $0x68] sm:$0x11] }
 0x132   : > { %v768_v6 = vmul.f32 0.2, %v696_v2  ;;  %v699_v7 = vadd.f32 %v6851_v22, %v698_v5  ;;  %v5947_v8 = vpop.f32.mrb[39].mxu0  ;;  %888 = vmatprep.subr.bf16.mxu1 %v6696_v20  ;;  %vm743_vm9 = vcmp.gt.f32.partialorder %v696_v2, 0.0  ;;  %v6501_v5 = vld [vmem:[%s8169_s3 + $0x58] ss:$8 sps:$4 sm:$0xff]  }
 0x133   : > { %v6506_v8 = vld [vmem:[%s8169_s3 + $0x74] ss:$8 sps:$4 sm:$0xff]  }
 0x134   : > { %vm744_vm10 = vcmp.gt.f32.partialorder %v699_v7, 0.0  ;;  %v769_v9 = vmul.f32 0.2, %v699_v7  ;;  %v793_v10 = vsel %vm743_vm9, %v696_v2, %v768_v6  ;;  %v6499_v2 = vld [vmem:[%s8169_s3 + $0x5c] ss:$8 sps:$4 sm:$0xff]   ;;  %v5199_v6 = vcombine.high %v5191_v4, %v5191_v4 }
 0x136   : > { %v794_v11 = vsel %vm744_vm10, %v699_v7, %v769_v9  ;;  %v5198_v7 = vcombine.low %v5191_v4, %v5191_v4  ;;  %v6526_v9 = vld [vmem:[%s8170_s4 + $0x8] sm:$0xff]   ;;  %vm2770_vm10 = vcmask 1040384  }
 0x137   : > { %v6909_v12 = vpack.c.bf16 %v794_v11, %v793_v10  ;;  %v703_v13 = vpop.f32.mrb[40].mxu0  ;;  %5960 = vmatprep.subr.bf16.mxu0 %v6526_v9  ;;  %v6504_v10 = vld [vmem:[%s8169_s3 + $0x70] ss:$8 sps:$4 sm:$0xff]   ;;  %v6507_v11 = vld [vmem:[%s8169_s3 + $0x84] ss:$8 sps:$4 sm:$0xff]  }
 0x138   : > { %v704_v15 = vadd.f32 %v6851_v22, %v703_v13  ;;  %v5950_v16 = vpop.f32.mrb[41].mxu0  ;;  %5961 = vmatpush3.bf16.msra.mxu0 %v6526_v9  ;;  %v6509_v13 = vld [vmem:[%s8169_s3 + $0x80] ss:$8 sps:$4 sm:$0xff]  }
 0x139   : > { %v706_v17 = vpop.f32.mrb[42].mxu0  ;;  %889 = vmatpush1.bf16.msra.mxu1 %v6909_v12  ;;  %v5222_v16 = vld [vmem:[%s8169_s3 + $0xa0] sm:$0x11] }
 0x13a   : > { %v770_v18 = vmul.f32 0.2, %v704_v15  ;;  %v707_v19 = vadd.f32 %v6851_v22, %v706_v17  ;;  %v5951_v21 = vpop.f32.mrb[43].mxu0  ;;  %890 = vmatprep.subr.bf16.mxu1 %v6696_v20  ;;  %vm745_vm11 = vcmp.gt.f32.partialorder %v704_v15, 0.0  ;;  %v6512_v17 = vld [vmem:[%s8169_s3 + $0x90] ss:$8 sps:$4 sm:$0xff]  }
 0x13b   : > { %v6517_v21 = vld [vmem:[%s8169_s3 + $0xe4] ss:$8 sps:$4 sm:$0xff]  }
 0x13c   : > { %vm746_vm12 = vcmp.gt.f32.partialorder %v707_v19, 0.0  ;;  %v771_v23 = vmul.f32 0.2, %v707_v19  ;;  %v795_v24 = vsel %vm745_vm11, %v704_v15, %v770_v18  ;;  %v6510_v15 = vld [vmem:[%s8169_s3 + $0x94] ss:$8 sps:$4 sm:$0xff]   ;;  %v5230_v18 = vcombine.high %v5222_v16, %v5222_v16 }
 0x13d   : > { %vm2766_vm11 = vcmask 400384  }
 0x13e   : > { %v796_v25 = vsel %vm746_vm12, %v707_v19, %v771_v23  ;;  %v5229_v19 = vcombine.low %v5222_v16, %v5222_v16  ;;  %v6515_v23 = vld [vmem:[%s8169_s3 + $0xe0] ss:$8 sps:$4 sm:$0xff]   ;;  %vm2892_vm12 = vcmask 261120  }
 0x13f   : > { %v6915_v26 = vpack.c.bf16 %v796_v25, %v795_v24  ;;  %v711_v28 = vpop.f32.mrb[44].mxu0  ;;  %v6518_v24 = vld [vmem:[%s8169_s3 + $0xf4] ss:$8 sps:$4 sm:$0xff]   ;;  %v6520_v25 = vld [vmem:[%s8169_s3 + $0xf0] ss:$8 sps:$4 sm:$0xff]  }
 0x140   : > { %v712_v29 = vadd.f32 %v6851_v22, %v711_v28  ;;  %v5954_v30 = vpop.f32.mrb[45].mxu0  ;;  %v6521_v28 = vld [vmem:[%s8169_s3 + $0x104] ss:$8 sps:$4 sm:$0xff]  }
 0x141   : > { %v714_v31 = vpop.f32.mrb[46].mxu0  ;;  %891 = vmatpush1.bf16.msra.mxu1 %v6915_v26  ;;  %v5274_v30 = vld [vmem:[%s8169_s3 + $0x110] sm:$0x11] }
 0x142   : > { %v772_v32 = vmul.f32 0.2, %v712_v29  ;;  %v715_v34 = vadd.f32 %v6851_v22, %v714_v31  ;;  %v5955_v35 = vpop.f32.mrb[47].mxu0  ;;  %892 = vmatprep.subr.bf16.mxu1 %v6696_v20  ;;  %vm747_vm13 = vcmp.gt.f32.partialorder %v712_v29, 0.0  ;;  %v6523_v31 = vld [vmem:[%s8169_s3 + $0x100] ss:$8 sps:$4 sm:$0xff]  }
 0x143   : > { %v6529_v35 = vld [vmem:[%s8169_s3 + $0x11c] ss:$8 sps:$4 sm:$0xff]  }
 0x144   : > { %vm748_vm14 = vcmp.gt.f32.partialorder %v715_v34, 0.0  ;;  %v773_v36 = vmul.f32 0.2, %v715_v34  ;;  %v797_v37 = vsel %vm747_vm13, %v712_v29, %v772_v32  ;;  %v7106_v29 = vld [vmem:[%s8170_s4] sm:$0xff]   ;;  %v5282_v32 = vcombine.high %v5274_v30, %v5274_v30 }
 0x145   : > { %5970 = vmatprep.subr.bf16.mxu0 %v7106_v29 }
 0x146   : > { %v798_v38 = vsel %vm748_vm14, %v715_v34, %v773_v36  ;;  %v5281_v34 = vcombine.low %v5274_v30, %v5274_v30  ;;  %v6527_v36 = vld [vmem:[%s8169_s3 + $0x118] ss:$8 sps:$4 sm:$0xff]  }
 0x147   : > { %v6921_v40 = vpack.c.bf16 %v798_v38, %v797_v37  ;;  %v719_v41 = vpop.f32.mrb[48].mxu0  ;;  %v6530_v37 = vld [vmem:[%s8169_s3 + $0x12c] ss:$8 sps:$4 sm:$0xff]  }
 0x148   : > { %v720_v42 = vadd.f32 %v6851_v22, %v719_v41  ;;  %v5958_v43 = vpop.f32.mrb[49].mxu0  ;;  %v6485_v22 = vld [vmem:[%s8169_s3 + $0x14] ss:$8 sps:$4 sm:$0xff]  }
 0x149   : > { %v722_v45 = vpop.f32.mrb[50].mxu0  ;;  %893 = vmatpush1.bf16.msra.mxu1 %v6921_v40 }
 0x14a   : > { %vm749_vm15 = vcmp.gt.f32.partialorder %v720_v42, 0.0  ;;  %v774_v46 = vmul.f32 0.2, %v720_v42  ;;  %v5959_v47 = vpop.f32.mrb[51].mxu0  ;;  %894 = vmatprep.subr.bf16.mxu1 %v6696_v20  ;;  %v6533_v45 = vld [vmem:[%s8169_s3 + $0x13c] ss:$8 sps:$4 sm:$0xff]  }
 0x14c   : > { %v799_v48 = vsel %vm749_vm15, %v720_v42, %v774_v46  ;;  %v6532_v42 = vld [vmem:[%s8169_s3 + $0x128] ss:$8 sps:$4 sm:$0xff]   ;;  %vm3865_vm15 = vcmask 523264  }
 0x14d   : > { %v812_v49 = vpack.c.bf16 %v799_v48, %v799_v48  ;;  %v5300_v48 = vld [vmem:[%s8169_s3 + $0x148] sm:$0x11] }
 0x14f   : > { %v6926_v50 = vsel %vm866_vm0, %v812_v49, 0 }
 0x150   : > { %895 = vmatpush1.bf16.msra.mxu1 %v6926_v50 }
 0x151   : > { %993 = vmatprep.subr.bf16.mxu1 %v6696_v20 }
 0x153   : > { %903 = vmatmul.mubr.bf16.vlgmr.msra.gmra.mrb[0].mxu1 %v6482_v52 }
 0x154   : > { %994 = vmatpush1.bf16.msra.mxu1 %v6855_v33  ;;  %5182 = vmatprep.mubr.msk.bf16.mxu1 %vm853_vm4, %v6485_v22  ;;  %v6535_v22 = vld [vmem:[%s8169_s3 + $0x138] ss:$8 sps:$4 sm:$0xff]  }
 0x155   : > { %995 = vmatprep.subr.bf16.mxu1 %v6696_v20 }
 0x158   : > { %996 = vmatpush1.bf16.msra.mxu1 %v6861_v44 }
 0x159   : > { %997 = vmatprep.subr.bf16.mxu1 %v6696_v20 }
 0x15b   : > { %911 = vmatmul.mubr.bf16.gmra.mrb[4].mxu1 %v6487_v53 }
 0x15c   : > { %998 = vmatpush1.bf16.msra.mxu1 %v6867_v55  ;;  %5183 = vmatprep.mubr.msk.bf16.mxu1 %vm853_vm4, %v6488_v54  ;;  %v5308_v54 = vcombine.high %v5300_v48, %v5300_v48 }
 0x15d   : > { %999 = vmatprep.subr.bf16.mxu1 %v6696_v20 }
 0x160   : > { %1000 = vmatpush1.bf16.msra.mxu1 %v6873_v3 }
 0x161   : > { %1001 = vmatprep.subr.bf16.mxu1 %v6696_v20 }
 0x163   : > { %919 = vmatmul.mubr.bf16.gmra.mrb[8].mxu1 %v6490_v57 }
 0x164   : > { %1002 = vmatpush1.bf16.msra.mxu1 %v6879_v14  ;;  %5184 = vmatprep.mubr.msk.bf16.mxu1 %vm853_vm4, %v5180_v58 }
 0x165   : > { %1003 = vmatprep.subr.bf16.mxu1 %v6696_v20 }
 0x168   : > { %1004 = vmatpush1.bf16.msra.mxu1 %v6885_v27 }
 0x169   : > { %1005 = vmatprep.subr.bf16.mxu1 %v6696_v20 }
 0x16b   : > { %927 = vmatmul.mubr.bf16.gmra.mrb[12].mxu1 %v5179_v59 }
 0x16c   : > { %1006 = vmatpush1.bf16.msra.mxu1 %v6891_v39  ;;  %5200 = vmatprep.mubr.msk.bf16.mxu1 %vm853_vm4, %v6495_v60  ;;  %v5307_v60 = vcombine.low %v5300_v48, %v5300_v48 }
 0x16d   : > { %1007 = vmatprep.subr.bf16.mxu1 %v6696_v20 }
 0x170   : > { %1008 = vmatpush1.bf16.msra.mxu1 %v6897_v51 }
 0x171   : > { %1009 = vmatprep.subr.bf16.mxu1 %v6696_v20 }
 0x174   : > { %1010 = vmatpush1.bf16.msra.mxu1 %v6903_v63 }
 0x175   : > { %1011 = vmatprep.subr.bf16.mxu1 %v6696_v20 }
 0x178   : > { %1012 = vmatpush1.bf16.msra.mxu1 %v6909_v12 }
 0x179   : > { %1013 = vmatprep.subr.bf16.mxu1 %v6696_v20 }
 0x17c   : > { %1014 = vmatpush1.bf16.msra.mxu1 %v6915_v26 }
 0x17d   : > { %1015 = vmatprep.subr.bf16.mxu1 %v6696_v20 }
 0x180   : > { %1016 = vmatpush1.bf16.msra.mxu1 %v6921_v40 }
 0x181   : > { %1017 = vmatprep.subr.bf16.mxu1 %v6696_v20 }
 0x184   : > { %1018 = vmatpush1.bf16.msra.mxu1 %v6926_v50 }
 0x185   : > { %1282 = vmatprep.subr.bf16.mxu1 %v6696_v20 }
 0x187   : > { %1026 = vmatmul.mubr.bf16.vlgmr.msra.gmra.mrb[16].mxu1 %v6493_v61 }
 0x188   : > { %1283 = vmatpush1.bf16.msra.mxu1 %v6855_v33  ;;  %5201 = vmatprep.mubr.msk.bf16.mxu1 %vm853_vm4, %v6496_v62  ;;  %v6540_v62 = vld [vmem:[%s8169_s3 + $0x18c] ss:$8 sps:$4 sm:$0xff]  }
 0x189   : > { %1284 = vmatprep.subr.bf16.mxu1 %v6696_v20 }
 0x18c   : > { %1285 = vmatpush1.bf16.msra.mxu1 %v6861_v44 }
 0x18d   : > { %1286 = vmatprep.subr.bf16.mxu1 %v6696_v20 }
 0x18f   : > { %1034 = vmatmul.mubr.bf16.gmra.mrb[20].mxu1 %v6498_v0 }
 0x190   : > { %1287 = vmatpush1.bf16.msra.mxu1 %v6867_v55  ;;  %5202 = vmatprep.mubr.msk.bf16.mxu1 %vm853_vm4, %v6499_v2 }
 0x191   : > { %1288 = vmatprep.subr.bf16.mxu1 %v6696_v20 }
 0x194   : > { %1289 = vmatpush1.bf16.msra.mxu1 %v6873_v3 }
 0x195   : > { %1290 = vmatprep.subr.bf16.mxu1 %v6696_v20 }
 0x197   : > { %1042 = vmatmul.mubr.bf16.gmra.mrb[24].mxu1 %v6501_v5 }
 0x198   : > { %1291 = vmatpush1.bf16.msra.mxu1 %v6879_v14  ;;  %5203 = vmatprep.mubr.msk.bf16.mxu1 %vm853_vm4, %v5199_v6 }
 0x199   : > { %1292 = vmatprep.subr.bf16.mxu1 %v6696_v20 }
 0x19c   : > { %1293 = vmatpush1.bf16.msra.mxu1 %v6885_v27 }
 0x19d   : > { %1294 = vmatprep.subr.bf16.mxu1 %v6696_v20 }
 0x19f   : > { %1050 = vmatmul.mubr.bf16.gmra.mrb[28].mxu1 %v5198_v7 }
 0x1a0   : > { %1295 = vmatpush1.bf16.msra.mxu1 %v6891_v39  ;;  %5231 = vmatprep.mubr.msk.bf16.mxu1 %vm853_vm4, %v6506_v8  ;;  %v6538_v8 = vld [vmem:[%s8169_s3 + $0x188] ss:$8 sps:$4 sm:$0xff]  }
 0x1a1   : > { %1296 = vmatprep.subr.bf16.mxu1 %v6696_v20 }
 0x1a4   : > { %1297 = vmatpush1.bf16.msra.mxu1 %v6897_v51 }
 0x1a5   : > { %1298 = vmatprep.subr.bf16.mxu1 %v6696_v20 }
 0x1a8   : > { %1299 = vmatpush1.bf16.msra.mxu1 %v6903_v63 }
 0x1a9   : > { %1300 = vmatprep.subr.bf16.mxu1 %v6696_v20 }
 0x1ac   : > { %1301 = vmatpush1.bf16.msra.mxu1 %v6909_v12 }
 0x1ad   : > { %1302 = vmatprep.subr.bf16.mxu1 %v6696_v20 }
 0x1b0   : > { %1303 = vmatpush1.bf16.msra.mxu1 %v6915_v26 }
 0x1b1   : > { %1304 = vmatprep.subr.bf16.mxu1 %v6696_v20 }
 0x1b4   : > { %1305 = vmatpush1.bf16.msra.mxu1 %v6921_v40 }
 0x1b5   : > { %1306 = vmatprep.subr.bf16.mxu1 %v6696_v20 }
 0x1b8   : > { %1307 = vmatpush1.bf16.msra.mxu1 %v6926_v50 }
 0x1b9   : > { %1708 = vmatprep.subr.bf16.mxu1 %v6696_v20 }
 0x1bb   : > { %1315 = vmatmul.mubr.bf16.vlgmr.msra.gmra.mrb[32].mxu1 %v6504_v10 }
 0x1bc   : > { %1709 = vmatpush1.bf16.msra.mxu1 %v6855_v33  ;;  %5232 = vmatprep.mubr.msk.bf16.mxu1 %vm853_vm4, %v6507_v11 }
 0x1bd   : > { %1710 = vmatprep.subr.bf16.mxu1 %v6696_v20 }
 0x1c0   : > { %1711 = vmatpush1.bf16.msra.mxu1 %v6861_v44 }
 0x1c1   : > { %1712 = vmatprep.subr.bf16.mxu1 %v6696_v20 }
 0x1c3   : > { %1323 = vmatmul.mubr.bf16.gmra.mrb[36].mxu1 %v6509_v13 }
 0x1c4   : > { %1713 = vmatpush1.bf16.msra.mxu1 %v6867_v55  ;;  %5233 = vmatprep.mubr.msk.bf16.mxu1 %vm853_vm4, %v6510_v15 }
 0x1c5   : > { %1714 = vmatprep.subr.bf16.mxu1 %v6696_v20 }
 0x1c8   : > { %1715 = vmatpush1.bf16.msra.mxu1 %v6873_v3 }
 0x1c9   : > { %1716 = vmatprep.subr.bf16.mxu1 %v6696_v20 }
 0x1cb   : > { %1331 = vmatmul.mubr.bf16.gmra.mrb[40].mxu1 %v6512_v17 }
 0x1cc   : > { %1717 = vmatpush1.bf16.msra.mxu1 %v6879_v14  ;;  %5234 = vmatprep.mubr.msk.bf16.mxu1 %vm853_vm4, %v5230_v18 }
 0x1cd   : > { %1718 = vmatprep.subr.bf16.mxu1 %v6696_v20 }
 0x1d0   : > { %1719 = vmatpush1.bf16.msra.mxu1 %v6885_v27 }
 0x1d1   : > { %1720 = vmatprep.subr.bf16.mxu1 %v6696_v20 }
 0x1d3   : > { %1339 = vmatmul.mubr.bf16.gmra.mrb[44].mxu1 %v5229_v19 }
 0x1d4   : > { %1721 = vmatpush1.bf16.msra.mxu1 %v6891_v39  ;;  %5283 = vmatprep.mubr.msk.bf16.mxu1 %vm853_vm4, %v6517_v21 }
 0x1d5   : > { %1722 = vmatprep.subr.bf16.mxu1 %v6696_v20 }
 0x1d8   : > { %1723 = vmatpush1.bf16.msra.mxu1 %v6897_v51 }
 0x1d9   : > { %1724 = vmatprep.subr.bf16.mxu1 %v6696_v20 }
 0x1dc   : > { %1725 = vmatpush1.bf16.msra.mxu1 %v6903_v63 }
 0x1dd   : > { %1726 = vmatprep.subr.bf16.mxu1 %v6696_v20 }
 0x1e0   : > { %1727 = vmatpush1.bf16.msra.mxu1 %v6909_v12 }
 0x1e1   : > { %1728 = vmatprep.subr.bf16.mxu1 %v6696_v20 }
 0x1e4   : > { %1729 = vmatpush1.bf16.msra.mxu1 %v6915_v26 }
 0x1e5   : > { %1730 = vmatprep.subr.bf16.mxu1 %v6696_v20 }
 0x1e8   : > { %1731 = vmatpush1.bf16.msra.mxu1 %v6921_v40 }
 0x1e9   : > { %1732 = vmatprep.subr.bf16.mxu1 %v6696_v20 }
 0x1ec   : > { %1733 = vmatpush1.bf16.msra.mxu1 %v6926_v50 }
 0x1ed   : > { %1921 = vmatprep.subr.bf16.mxu1 %v6696_v20 }
 0x1ef   : > { %1741 = vmatmul.mubr.bf16.vlgmr.msra.gmra.mrb[48].mxu1 %v6515_v23  ;;  %v6542_v23 = vld [vmem:[%s8170_s4 + $0x10] sm:$0xff]  }
 0x1f0   : > { %1922 = vmatpush1.bf16.msra.mxu1 %v6855_v33  ;;  %5284 = vmatprep.mubr.msk.bf16.mxu1 %vm853_vm4, %v6518_v24 }
 0x1f1   : > { %1923 = vmatprep.subr.bf16.mxu1 %v6696_v20 }
 0x1f4   : > { %1924 = vmatpush1.bf16.msra.mxu1 %v6861_v44 }
 0x1f5   : > { %1925 = vmatprep.subr.bf16.mxu1 %v6696_v20 }
 0x1f7   : > { %1749 = vmatmul.mubr.bf16.gmra.mrb[52].mxu1 %v6520_v25 }
 0x1f8   : > { %1926 = vmatpush1.bf16.msra.mxu1 %v6867_v55  ;;  %5285 = vmatprep.mubr.msk.bf16.mxu1 %vm853_vm4, %v6521_v28 }
 0x1f9   : > { %1927 = vmatprep.subr.bf16.mxu1 %v6696_v20 }
 0x1fc   : > { %1928 = vmatpush1.bf16.msra.mxu1 %v6873_v3 }
 0x1fd   : > { %1929 = vmatprep.subr.bf16.mxu1 %v6696_v20 }
 0x1ff   : > { %1757 = vmatmul.mubr.bf16.gmra.mrb[56].mxu1 %v6523_v31 }
 0x200   : > { %1930 = vmatpush1.bf16.msra.mxu1 %v6879_v14  ;;  %5286 = vmatprep.mubr.msk.bf16.mxu1 %vm853_vm4, %v5282_v32 }
 0x201   : > { %1931 = vmatprep.subr.bf16.mxu1 %v6696_v20 }
 0x204   : > { %1932 = vmatpush1.bf16.msra.mxu1 %v6885_v27 }
 0x205   : > { %1933 = vmatprep.subr.bf16.mxu1 %v6696_v20 }
 0x207   : > { %1765 = vmatmul.mubr.bf16.gmra.mrb[60].mxu1 %v5281_v34 }
 0x208   : > { %1934 = vmatpush1.bf16.msra.mxu1 %v6891_v39  ;;  %5309 = vmatprep.mubr.msk.bf16.mxu1 %vm853_vm4, %v6529_v35 }
 0x209   : > { %1935 = vmatprep.subr.bf16.mxu1 %v6696_v20 }
 0x20c   : > { %1936 = vmatpush1.bf16.msra.mxu1 %v6897_v51 }
 0x20d   : > { %1937 = vmatprep.subr.bf16.mxu1 %v6696_v20 }
 0x210   : > { %1938 = vmatpush1.bf16.msra.mxu1 %v6903_v63 }
 0x211   : > { %1939 = vmatprep.subr.bf16.mxu1 %v6696_v20 }
 0x214   : > { %1940 = vmatpush1.bf16.msra.mxu1 %v6909_v12 }
 0x215   : > { %1941 = vmatprep.subr.bf16.mxu1 %v6696_v20 }
 0x218   : > { %1942 = vmatpush1.bf16.msra.mxu1 %v6915_v26 }
 0x219   : > { %1943 = vmatprep.subr.bf16.mxu1 %v6696_v20 }
 0x21c   : > { %1944 = vmatpush1.bf16.msra.mxu1 %v6921_v40 }
 0x21d   : > { %1945 = vmatprep.subr.bf16.mxu1 %v6696_v20 }
 0x220   : > { %1946 = vmatpush1.bf16.msra.mxu1 %v6926_v50 }
 0x221   : > { %2347 = vmatprep.subr.bf16.mxu1 %v6696_v20 }
 0x223   : > { %1954 = vmatmul.mubr.bf16.vlgmr.msra.gmra.mrb[64].mxu1 %v6527_v36 }
 0x224   : > { %2348 = vmatpush1.bf16.msra.mxu1 %v6855_v33  ;;  %5310 = vmatprep.mubr.msk.bf16.mxu1 %vm853_vm4, %v6530_v37 }
 0x225   : > { %2349 = vmatprep.subr.bf16.mxu1 %v6696_v20 }
 0x226   : > { %v7152_v38 = vpop.f32.mrb[0].mxu1 }
 0x227   : > { %v906_v41 = vpop.f32.mrb[1].mxu1 }
 0x228   : > { %v7157_v43 = vpop.f32.mrb[2].mxu1  ;;  %2350 = vmatpush1.bf16.msra.mxu1 %v6861_v44 }
 0x229   : > { %v934_v46 = vpack.c.bf16 %v7157_v43, %v7152_v38  ;;  %v909_v47 = vpop.f32.mrb[3].mxu1  ;;  %2351 = vmatprep.subr.bf16.mxu1 %v6696_v20 }
 0x22b   : > { %1962 = vmatmul.mubr.bf16.gmra.mrb[68].mxu1 %v6532_v42 }
 0x22c   : > { %2352 = vmatpush1.bf16.msra.mxu1 %v6867_v55  ;;  %5311 = vmatprep.mubr.msk.bf16.mxu1 %vm853_vm4, %v6533_v45 }
 0x22d   : > { %2353 = vmatprep.subr.bf16.mxu1 %v6696_v20 }
 0x22e   : > { %v7172_v49 = vpop.f32.mrb[4].mxu1 }
 0x22f   : > { %v914_v52 = vpop.f32.mrb[5].mxu1 }
 0x230   : > { %2354 = vmatpush1.bf16.msra.mxu1 %v6873_v3  ;;  %v7178_v53 = vpop.f32.mrb[6].mxu1 }
 0x231   : > { %2355 = vmatprep.subr.bf16.mxu1 %v6696_v20  ;;  %v935_v56 = vpack.c.bf16 %v7178_v53, %v7172_v49  ;;  %v917_v57 = vpop.f32.mrb[7].mxu1 }
 0x233   : > { %1970 = vmatmul.mubr.bf16.gmra.mrb[72].mxu1 %v6535_v22 }
 0x234   : > { %2356 = vmatpush1.bf16.msra.mxu1 %v6879_v14  ;;  %5312 = vmatprep.mubr.msk.bf16.mxu1 %vm853_vm4, %v5308_v54 }
 0x235   : > { %2357 = vmatprep.subr.bf16.mxu1 %v6696_v20 }
 0x236   : > { %v7186_v58 = vpop.f32.mrb[8].mxu1 }
 0x237   : > { %v922_v59 = vpop.f32.mrb[9].mxu1 }
 0x238   : > { %2358 = vmatpush1.bf16.msra.mxu1 %v6885_v27  ;;  %v7189_v61 = vpop.f32.mrb[10].mxu1  ;;  %v6545_v59 = vld [vmem:[%s8169_s3 + $0xac] ss:$8 sps:$4 sm:$0xff]  }
 0x239   : > { %2359 = vmatprep.subr.bf16.mxu1 %v6696_v20  ;;  %v936_v0 = vpack.c.bf16 %v7189_v61, %v7186_v58  ;;  %v925_v2 = vpop.f32.mrb[11].mxu1 }
 0x23a   : > { %v6543_v2 = vld [vmem:[%s8169_s3 + $0xa8] ss:$8 sps:$4 sm:$0xff]  }
 0x23b   : > { %1978 = vmatmul.mubr.bf16.gmra.mrb[76].mxu1 %v5307_v60 }
 0x23c   : > { %2360 = vmatpush1.bf16.msra.mxu1 %v6891_v39  ;;  %5361 = vmatprep.mubr.msk.bf16.mxu1 %vm853_vm4, %v6540_v62 }
 0x23d   : > { %2361 = vmatprep.subr.bf16.mxu1 %v6696_v20 }
 0x23e   : > { %v7200_v4 = vpop.f32.mrb[12].mxu1 }
 0x23f   : > { %v930_v5 = vpop.f32.mrb[13].mxu1  ;;  %v937_v37 = vpack.c.bf16 %v7200_v4, %v7200_v4  ;;  %v6546_v4 = vld [vmem:[%s8169_s3 + $0xbc] ss:$8 sps:$4 sm:$0xff]  }
 0x240   : > { %2362 = vmatpush1.bf16.msra.mxu1 %v6897_v51  ;;  %v931_v6 = vpop.f32.mrb[14].mxu1  ;;  %v6548_v5 = vld [vmem:[%s8169_s3 + $0xb8] ss:$8 sps:$4 sm:$0xff]  }
 0x241   : > { %2363 = vmatprep.subr.bf16.mxu1 %v6696_v20  ;;  %v932_v7 = vpop.f32.mrb[15].mxu1  ;;  %v6549_v6 = vld [vmem:[%s8169_s3 + $0xcc] ss:$8 sps:$4 sm:$0xff]  }
 0x242   : > { %v5248_v7 = vld [vmem:[%s8169_s3 + $0xd8] sm:$0x11] }
 0x244   : > { %2364 = vmatpush1.bf16.msra.mxu1 %v6903_v63 }
 0x245   : > { %2365 = vmatprep.subr.bf16.mxu1 %v6696_v20 }
 0x248   : > { %2366 = vmatpush1.bf16.msra.mxu1 %v6909_v12 }
 0x249   : > { %2367 = vmatprep.subr.bf16.mxu1 %v6696_v20 }
 0x24c   : > { %2368 = vmatpush1.bf16.msra.mxu1 %v6915_v26 }
 0x24d   : > { %2369 = vmatprep.subr.bf16.mxu1 %v6696_v20 }
 0x250   : > { %2370 = vmatpush1.bf16.msra.mxu1 %v6921_v40 }
 0x251   : > { %2371 = vmatprep.subr.bf16.mxu1 %v6696_v20 }
 0x254   : > { %2372 = vmatpush1.bf16.msra.mxu1 %v6926_v50 }
 0x255   : > { %2560 = vmatprep.subr.bf16.mxu1 %v6696_v20 }
 0x257   : > { %2380 = vmatmul.mubr.bf16.vlgmr.msra.gmra.mrb[80].mxu1 %v6538_v8  ;;  %v6551_v8 = vld [vmem:[%s8169_s3 + $0xc8] ss:$8 sps:$4 sm:$0xff]  }
 0x258   : > { %2561 = vmatpush1.bf16.msra.mxu1 %v6855_v33 }
 0x259   : > { %2562 = vmatprep.subr.bf16.mxu1 %v6696_v20 }
 0x25a   : > { %v1027_v9 = vpop.f32.mrb[16].mxu1 }
 0x25b   : > { %v1029_v10 = vpop.f32.mrb[17].mxu1 }
 0x25c   : > { %v1030_v11 = vpop.f32.mrb[18].mxu1  ;;  %2563 = vmatpush1.bf16.msra.mxu1 %v6861_v44  ;;  %v5255_v10 = vcombine.low %v5248_v7, %v5248_v7 }
 0x25d   : > { %v1057_v13 = vpack.c.bf16 %v1030_v11, %v1027_v9  ;;  %v1032_v15 = vpop.f32.mrb[19].mxu1  ;;  %2564 = vmatprep.subr.bf16.mxu1 %v6696_v20  ;;  %v5256_v9 = vcombine.high %v5248_v7, %v5248_v7 }
 0x25f   : > { %5962 = vmatprep.mubr.msk.bf16.mxu0 %vm1070_vm1, %v1057_v13 }
 0x260   : > { %2565 = vmatpush1.bf16.msra.mxu1 %v6867_v55 }
 0x261   : > { %2566 = vmatprep.subr.bf16.mxu1 %v6696_v20 }
 0x262   : > { %v1035_v16 = vpop.f32.mrb[20].mxu1 }
 0x263   : > { %v1037_v17 = vpop.f32.mrb[21].mxu1 }
 0x264   : > { %2567 = vmatpush1.bf16.msra.mxu1 %v6873_v3  ;;  %v1038_v18 = vpop.f32.mrb[22].mxu1 }
 0x265   : > { %2568 = vmatprep.subr.bf16.mxu1 %v6696_v20  ;;  %v1058_v19 = vpack.c.bf16 %v1038_v18, %v1035_v16  ;;  %v1040_v21 = vpop.f32.mrb[23].mxu1  ;;  %v6554_v18 = vld [vmem:[%s8170_s4 + $0x18] sm:$0xff]  }
 0x267   : > { %5963 = vmatmul.mubr.msk.bf16.vlgmr.msra.gmra.mrb[52].mxu0 %vm1070_vm1, %v1058_v19 }
 0x268   : > { %2569 = vmatpush1.bf16.msra.mxu1 %v6879_v14  ;;  %5971 = vmatpush3.bf16.msra.mxu0 %v7106_v29 }
 0x269   : > { %2570 = vmatprep.subr.bf16.mxu1 %v6696_v20  ;;  %5980 = vmatprep.subr.bf16.mxu0 %v6542_v23 }
 0x26a   : > { %v1043_v24 = vpop.f32.mrb[24].mxu1 }
 0x26b   : > { %v1045_v25 = vpop.f32.mrb[25].mxu1 }
 0x26c   : > { %2571 = vmatpush1.bf16.msra.mxu1 %v6885_v27  ;;  %v1046_v28 = vpop.f32.mrb[26].mxu1 }
 0x26d   : > { %2572 = vmatprep.subr.bf16.mxu1 %v6696_v20  ;;  %v1059_v30 = vpack.c.bf16 %v1046_v28, %v1043_v24  ;;  %v1048_v31 = vpop.f32.mrb[27].mxu1 }
 0x26f   : > { %5966 = vmatprep.mubr.msk.bf16.mxu0 %vm1070_vm1, %v1059_v30 }
 0x270   : > { %2573 = vmatpush1.bf16.msra.mxu1 %v6891_v39 }
 0x271   : > { %2574 = vmatprep.subr.bf16.mxu1 %v6696_v20 }
 0x272   : > { %v1051_v32 = vpop.f32.mrb[28].mxu1 }
 0x273   : > { %v1060_v29 = vpack.c.bf16 %v1051_v32, %v1051_v32  ;;  %v1053_v34 = vpop.f32.mrb[29].mxu1 }
 0x274   : > { %2575 = vmatpush1.bf16.msra.mxu1 %v6897_v51  ;;  %v1054_v35 = vpop.f32.mrb[30].mxu1 }
 0x275   : > { %5967 = vmatmul.mubr.msk.bf16.gmra.mrb[56].mxu0 %vm1070_vm1, %v1060_v29  ;;  %2576 = vmatprep.subr.bf16.mxu1 %v6696_v20  ;;  %v1055_v36 = vpop.f32.mrb[31].mxu1 }
 0x276   : > { %5972 = vmatprep.mubr.msk.bf16.mxu0 %vm1070_vm1, %v934_v46  ;;  %v7347_v36 = vld [vmem:[%s8170_s4 + $0x20] sm:$0xff]  }
 0x278   : > { %2577 = vmatpush1.bf16.msra.mxu1 %v6903_v63 }
 0x279   : > { %2578 = vmatprep.subr.bf16.mxu1 %v6696_v20 }
 0x27c   : > { %2579 = vmatpush1.bf16.msra.mxu1 %v6909_v12 }
 0x27d   : > { %5973 = vmatmul.mubr.msk.bf16.vlgmr.msra.gmra.mrb[52].mxu0 %vm1070_vm1, %v935_v56  ;;  %2580 = vmatprep.subr.bf16.mxu1 %v6696_v20 }
 0x27e   : > { %5976 = vmatprep.mubr.msk.bf16.mxu0 %vm1070_vm1, %v936_v0  ;;  %5981 = vmatpush3.bf16.msra.mxu0 %v6542_v23 }
 0x27f   : > { %1495 = vmatprep.subr.bf16.mxu0 %v6696_v20 }
 0x280   : > { %2581 = vmatpush1.bf16.msra.mxu1 %v6915_v26 }
 0x281   : > { %2582 = vmatprep.subr.bf16.mxu1 %v6696_v20 }
 0x284   : > { %2583 = vmatpush1.bf16.msra.mxu1 %v6921_v40 }
 0x285   : > { %5977 = vmatmul.mubr.msk.bf16.gmra.mrb[60].mxu0 %vm1070_vm1, %v937_v37  ;;  %2584 = vmatprep.subr.bf16.mxu1 %v6696_v20 }
 0x288   : > { %2585 = vmatpush1.bf16.msra.mxu1 %v6926_v50 }
 0x289   : > { %6062 = vmatprep.subr.bf16.mxu1 %v6693_v1 }
 0x28e   : > { %v1316_v38 = vpop.f32.mrb[32].mxu1 }
 0x28f   : > { %v1318_v41 = vpop.f32.mrb[33].mxu1 }
 0x290   : > { %v1319_v42 = vpop.f32.mrb[34].mxu1 }
 0x291   : > { %v1346_v43 = vpack.c.bf16 %v1319_v42, %v1316_v38  ;;  %v1321_v45 = vpop.f32.mrb[35].mxu1 }
 0x293   : > { %5982 = vmatprep.mubr.msk.bf16.mxu0 %vm1070_vm1, %v1346_v43 }
 0x296   : > { %v1324_v46 = vpop.f32.mrb[36].mxu1 }
 0x297   : > { %v1326_v47 = vpop.f32.mrb[37].mxu1 }
 0x298   : > { %v1327_v48 = vpop.f32.mrb[38].mxu1 }
 0x299   : > { %v1347_v49 = vpack.c.bf16 %v1327_v48, %v1324_v46  ;;  %v1329_v52 = vpop.f32.mrb[39].mxu1 }
 0x29b   : > { %5983 = vmatmul.mubr.msk.bf16.vlgmr.msra.gmra.mrb[52].mxu0 %vm1070_vm1, %v1347_v49 }
 0x29c   : > { %1496 = vmatpush1.bf16.msra.mxu0 %v6855_v33 }
 0x29d   : > { %1497 = vmatprep.subr.bf16.mxu0 %v6696_v20 }
 0x29e   : > { %v1332_v22 = vpop.f32.mrb[40].mxu1 }
 0x29f   : > { %v1334_v53 = vpop.f32.mrb[41].mxu1 }
 0x2a0   : > { %1498 = vmatpush1.bf16.msra.mxu0 %v6861_v44  ;;  %v1335_v54 = vpop.f32.mrb[42].mxu1 }
 0x2a1   : > { %1499 = vmatprep.subr.bf16.mxu0 %v6696_v20  ;;  %v1348_v56 = vpack.c.bf16 %v1335_v54, %v1332_v22  ;;  %v1337_v57 = vpop.f32.mrb[43].mxu1 }
 0x2a3   : > { %5986 = vmatprep.mubr.msk.bf16.mxu0 %vm1070_vm1, %v1348_v56 }
 0x2a4   : > { %1500 = vmatpush1.bf16.msra.mxu0 %v6867_v55 }
 0x2a5   : > { %1501 = vmatprep.subr.bf16.mxu0 %v6696_v20 }
 0x2a6   : > { %v1340_v58 = vpop.f32.mrb[44].mxu1 }
 0x2a7   : > { %v1349_v60 = vpack.c.bf16 %v1340_v58, %v1340_v58  ;;  %v1342_v61 = vpop.f32.mrb[45].mxu1 }
 0x2a8   : > { %1502 = vmatpush1.bf16.msra.mxu0 %v6873_v3  ;;  %v1343_v62 = vpop.f32.mrb[46].mxu1 }
 0x2a9   : > { %5987 = vmatmul.mubr.msk.bf16.gmra.mrb[64].mxu0 %vm1070_vm1, %v1349_v60  ;;  %1503 = vmatprep.subr.bf16.mxu0 %v6696_v20  ;;  %v1344_v0 = vpop.f32.mrb[47].mxu1 }
 0x2aa   : > { %5257 = vmatprep.mubr.msk.bf16.mxu0 %vm853_vm4, %v6545_v59 }
 0x2ac   : > { %1504 = vmatpush1.bf16.msra.mxu0 %v6879_v14 }
 0x2ad   : > { %1505 = vmatprep.subr.bf16.mxu0 %v6696_v20 }
 0x2b0   : > { %1506 = vmatpush1.bf16.msra.mxu0 %v6885_v27 }
 0x2b1   : > { %1507 = vmatprep.subr.bf16.mxu0 %v6696_v20 }
 0x2b4   : > { %1508 = vmatpush1.bf16.msra.mxu0 %v6891_v39 }
 0x2b5   : > { %1509 = vmatprep.subr.bf16.mxu0 %v6696_v20 }
 0x2b8   : > { %1510 = vmatpush1.bf16.msra.mxu0 %v6897_v51 }
 0x2b9   : > { %1511 = vmatprep.subr.bf16.mxu0 %v6696_v20 }
 0x2bc   : > { %1512 = vmatpush1.bf16.msra.mxu0 %v6903_v63 }
 0x2bd   : > { %1513 = vmatprep.subr.bf16.mxu0 %v6696_v20 }
 0x2c0   : > { %1514 = vmatpush1.bf16.msra.mxu0 %v6909_v12 }
 0x2c1   : > { %1515 = vmatprep.subr.bf16.mxu0 %v6696_v20 }
 0x2c2   : > { %v7321_v11 = vpop.f32.mrb[48].mxu1 }
 0x2c3   : > { %v1744_v13 = vpop.f32.mrb[49].mxu1 }
 0x2c4   : > { %1516 = vmatpush1.bf16.msra.mxu0 %v6915_v26  ;;  %v7323_v15 = vpop.f32.mrb[50].mxu1 }
 0x2c5   : > { %1517 = vmatprep.subr.bf16.mxu0 %v6696_v20  ;;  %v1772_v16 = vpack.c.bf16 %v7323_v15, %v7321_v11  ;;  %v1747_v17 = vpop.f32.mrb[51].mxu1 }
 0x2c8   : > { %1518 = vmatpush1.bf16.msra.mxu0 %v6921_v40 }
 0x2c9   : > { %1519 = vmatprep.subr.bf16.mxu0 %v6696_v20 }
 0x2ca   : > { %v7330_v19 = vpop.f32.mrb[52].mxu1 }
 0x2cb   : > { %v1752_v21 = vpop.f32.mrb[53].mxu1 }
 0x2cc   : > { %1520 = vmatpush1.bf16.msra.mxu0 %v6926_v50  ;;  %v7332_v23 = vpop.f32.mrb[54].mxu1 }
 0x2cd   : > { %5990 = vmatprep.subr.bf16.mxu0 %v6554_v18  ;;  %v1773_v24 = vpack.c.bf16 %v7332_v23, %v7330_v19  ;;  %v1755_v25 = vpop.f32.mrb[55].mxu1  ;;  %v6587_v19 = vld [vmem:[%s8170_s4 + $0x30] sm:$0xff]  }
 0x2cf   : > { %1528 = vmatmul.mubr.bf16.vlgmr.msra.gmra.mrb[68].mxu0 %v6543_v2 }
 0x2d0   : > { %5258 = vmatprep.mubr.msk.bf16.mxu0 %vm853_vm4, %v6546_v4  ;;  %5991 = vmatpush3.bf16.msra.mxu0 %v6554_v18 }
 0x2d1   : > { %6000 = vmatprep.subr.bf16.mxu0 %v7347_v36 }
 0x2d2   : > { %v7336_v28 = vpop.f32.mrb[56].mxu1 }
 0x2d3   : > { %v1760_v30 = vpop.f32.mrb[57].mxu1 }
 0x2d4   : > { %v7338_v31 = vpop.f32.mrb[58].mxu1 }
 0x2d5   : > { %v1774_v32 = vpack.c.bf16 %v7338_v31, %v7336_v28  ;;  %v1763_v29 = vpop.f32.mrb[59].mxu1 }
 0x2d7   : > { %1536 = vmatmul.mubr.bf16.gmra.mrb[72].mxu0 %v6548_v5 }
 0x2d8   : > { %5259 = vmatprep.mubr.msk.bf16.mxu0 %vm853_vm4, %v6549_v6 }
 0x2da   : > { %v7342_v34 = vpop.f32.mrb[60].mxu1 }
 0x2db   : > { %v1768_v35 = vpop.f32.mrb[61].mxu1  ;;  %v1775_v11 = vpack.c.bf16 %v7342_v34, %v7342_v34 }
 0x2dc   : > { %v1769_v37 = vpop.f32.mrb[62].mxu1 }
 0x2dd   : > { %v1770_v38 = vpop.f32.mrb[63].mxu1 }
 0x2de   : > { %v6562_v38 = vld [vmem:[%s8169_s3 + $0x19c] ss:$8 sps:$4 sm:$0xff]  }
 0x2df   : > { %1544 = vmatmul.mubr.bf16.gmra.mrb[76].mxu0 %v6551_v8  ;;  %5362 = vmatprep.mubr.msk.bf16.mxu1 %vm853_vm4, %v6562_v38  ;;  %v6584_v38 = vld [vmem:[%s8169_s3 + $0x1e0] ss:$8 sps:$4 sm:$0xff]  }
 0x2e0   : > { %5260 = vmatprep.mubr.msk.bf16.mxu0 %vm853_vm4, %v5256_v9 }
 0x2e7   : > { %1552 = vmatmul.mubr.bf16.gmra.mrb[80].mxu0 %v5255_v10 }
 0x2f6   : > { %v7350_v41 = vpop.f32.mrb[64].mxu1 }
 0x2f7   : > { %v1957_v42 = vpop.f32.mrb[65].mxu1 }
 0x2f8   : > { %v7352_v43 = vpop.f32.mrb[66].mxu1  ;;  %v6565_v42 = vld [vmem:[%s8169_s3 + $0x198] ss:$8 sps:$4 sm:$0xff]  }
 0x2f9   : > { %v1985_v46 = vpack.c.bf16 %v7352_v43, %v7350_v41  ;;  %v1960_v47 = vpop.f32.mrb[67].mxu1  ;;  %2388 = vmatmul.mubr.bf16.gmra.mrb[84].mxu1 %v6565_v42 }
 0x2fa   : > { %v6571_v47 = vld [vmem:[%s8169_s3 + $0x1a8] ss:$8 sps:$4 sm:$0xff]  }
 0x2fe   : > { %v7356_v22 = vpop.f32.mrb[68].mxu1 }
 0x2ff   : > { %v1965_v53 = vpop.f32.mrb[69].mxu1 }
 0x300   : > { %v7358_v54 = vpop.f32.mrb[70].mxu1  ;;  %v6578_v53 = vld [vmem:[%s8169_s3 + $0x1c4] ss:$8 sps:$4 sm:$0xff]  }
 0x301   : > { %v1986_v56 = vpack.c.bf16 %v7358_v54, %v7356_v22  ;;  %v1968_v57 = vpop.f32.mrb[71].mxu1 }
 0x306   : > { %v7362_v58 = vpop.f32.mrb[72].mxu1 }
 0x307   : > { %v1973_v59 = vpop.f32.mrb[73].mxu1 }
 0x308   : > { %v7364_v61 = vpop.f32.mrb[74].mxu1  ;;  %v6576_v59 = vld [vmem:[%s8169_s3 + $0x1c0] ss:$8 sps:$4 sm:$0xff]  }
 0x309   : > { %v1987_v2 = vpack.c.bf16 %v7364_v61, %v7362_v58  ;;  %v1976_v4 = vpop.f32.mrb[75].mxu1 }
 0x30e   : > { %v7368_v7 = vpop.f32.mrb[76].mxu1 }
 0x30f   : > { %v1981_v9 = vpop.f32.mrb[77].mxu1  ;;  %v1988_v15 = vpack.c.bf16 %v7368_v7, %v7368_v7 }
 0x310   : > { %v1982_v13 = vpop.f32.mrb[78].mxu1 }
 0x311   : > { %v1983_v17 = vpop.f32.mrb[79].mxu1 }
 0x348   : > { %v5968_v45 = vpop.f32.mrb[56].mxu0 }
 0x349   : > { %v1133_v48 = vpop.f32.mrb[57].mxu0 }
 0x34a   : > { %v5969_v49 = vpop.f32.mrb[58].mxu0 }
 0x34b   : > { %v1136_v52 = vpop.f32.mrb[59].mxu0 }
 0x358   : > { %v5978_v60 = vpop.f32.mrb[60].mxu0 }
 0x359   : > { %v1224_v62 = vadd.f32 %v5978_v60, %v5968_v45  ;;  %v1215_v0 = vpop.f32.mrb[61].mxu0  ;;  %v6568_v45 = vld [vmem:[%s8169_s3 + $0x1ac] ss:$8 sps:$4 sm:$0xff]  }
 0x35a   : > { %v1216_v5 = vadd.f32 %v1215_v0, %v1133_v48  ;;  %v5979_v6 = vpop.f32.mrb[62].mxu0  ;;  %5363 = vmatprep.mubr.msk.bf16.mxu1 %vm853_vm4, %v6568_v45  ;;  %v5352_v48 = vld [vmem:[%s8169_s3 + $0x1b8] sm:$0x11] }
 0x35b   : > { %v1218_v8 = vpop.f32.mrb[63].mxu0  ;;  %2396 = vmatmul.mubr.bf16.gmra.mrb[88].mxu1 %v6571_v47  ;;  %v5360_v49 = vcombine.high %v5352_v48, %v5352_v48 }
 0x35c   : > { %v1219_v10 = vadd.f32 %v1218_v8, %v1136_v52  ;;  %v5359_v52 = vcombine.low %v5352_v48, %v5352_v48  ;;  %v6581_v8 = vld [vmem:[%s8169_s3 + $0x1d0] ss:$8 sps:$4 sm:$0xff]  }
 0x35d   : > { %5364 = vmatprep.mubr.msk.bf16.mxu1 %vm853_vm4, %v5360_v49 }
 0x363   : > { %2404 = vmatmul.mubr.bf16.gmra.mrb[92].mxu1 %v5359_v52 }
 0x364   : > { %5387 = vmatprep.mubr.msk.bf16.mxu1 %vm853_vm4, %v6578_v53 }
 0x36b   : > { %2593 = vmatmul.mubr.bf16.vlgmr.msra.gmra.mrb[96].mxu1 %v6576_v59 }
 0x37c   : > { %v5988_v18 = vpop.f32.mrb[64].mxu0 }
 0x37d   : > { %v7370_v21 = vadd.f32 %v5988_v18, %v1224_v62  ;;  %v1421_v25 = vpop.f32.mrb[65].mxu0  ;;  %v6579_v62 = vld [vmem:[%s8169_s3 + $0x1d4] ss:$8 sps:$4 sm:$0xff]  }
 0x37e   : > { %v7372_v30 = vadd.f32 %v1421_v25, %v1216_v5  ;;  %v5989_v29 = vpop.f32.mrb[66].mxu0  ;;  %5388 = vmatprep.mubr.msk.bf16.mxu1 %vm853_vm4, %v6579_v62  ;;  %v6556_v25 = vld [vmem:[%s8170_s4 + $0x28] sm:$0xff]  }
 0x37f   : > { %v1424_v35 = vpop.f32.mrb[67].mxu0  ;;  %2601 = vmatmul.mubr.bf16.gmra.mrb[100].mxu1 %v6581_v8  ;;  %v5378_v29 = vld [vmem:[%s8169_s3 + $0x1f0] sm:$0x11] }
 0x380   : > { %v7374_v37 = vadd.f32 %v1424_v35, %v1219_v10  ;;  %v6582_v10 = vld [vmem:[%s8169_s3 + $0x1e4] ss:$8 sps:$4 sm:$0xff]   ;;  %v5386_v45 = vcombine.high %v5378_v29, %v5378_v29  ;;  %v5385_v52 = vcombine.low %v5378_v29, %v5378_v29 }
 0x381   : > { %5389 = vmatprep.mubr.msk.bf16.mxu1 %vm853_vm4, %v6582_v10 }
 0x387   : > { %2609 = vmatmul.mubr.bf16.gmra.mrb[104].mxu1 %v6584_v38 }
 0x388   : > { %5390 = vmatprep.mubr.msk.bf16.mxu1 %vm853_vm4, %v5386_v45 }
 0x38f   : > { %2617 = vmatmul.mubr.bf16.gmra.mrb[108].mxu1 %v5385_v52 }
 0x390   : > { %6070 = vmatprep.mubr.msk.bf16.mxu1 %vm6695_vm2, %v6693_v1 }
 0x3a2   : > { %v1529_v57 = vpop.f32.mrb[68].mxu0 }
 0x3a3   : > { %v1531_v60 = vpop.f32.mrb[69].mxu0 }
 0x3a4   : > { %v1532_v0 = vpop.f32.mrb[70].mxu0 }
 0x3a5   : > { %v1559_v4 = vpack.c.bf16 %v1532_v0, %v1529_v57  ;;  %v1534_v5 = vpop.f32.mrb[71].mxu0 }
 0x3a7   : > { %5992 = vmatprep.mubr.msk.bf16.mxu0 %vm1070_vm1, %v1559_v4 }
 0x3aa   : > { %v1537_v6 = vpop.f32.mrb[72].mxu0 }
 0x3ab   : > { %v1539_v9 = vpop.f32.mrb[73].mxu0 }
 0x3ac   : > { %v1540_v13 = vpop.f32.mrb[74].mxu0 }
 0x3ad   : > { %v1560_v17 = vpack.c.bf16 %v1540_v13, %v1537_v6  ;;  %v1542_v18 = vpop.f32.mrb[75].mxu0 }
 0x3af   : > { %5993 = vmatmul.mubr.msk.bf16.vlgmr.msra.gmra.mrb[52].mxu0 %vm1070_vm1, %v1560_v17 }
 0x3b0   : > { %6001 = vmatpush3.bf16.msra.mxu0 %v7347_v36 }
 0x3b1   : > { %6010 = vmatprep.subr.bf16.mxu0 %v6556_v25 }
 0x3b2   : > { %v1545_v35 = vpop.f32.mrb[76].mxu0 }
 0x3b3   : > { %v1547_v42 = vpop.f32.mrb[77].mxu0 }
 0x3b4   : > { %v1548_v47 = vpop.f32.mrb[78].mxu0 }
 0x3b5   : > { %v1561_v48 = vpack.c.bf16 %v1548_v47, %v1545_v35  ;;  %v1550_v49 = vpop.f32.mrb[79].mxu0 }
 0x3b7   : > { %5996 = vmatprep.mubr.msk.bf16.mxu0 %vm1070_vm1, %v1561_v48 }
 0x3ba   : > { %v1553_v36 = vpop.f32.mrb[80].mxu0 }
 0x3bb   : > { %v1562_v53 = vpack.c.bf16 %v1553_v36, %v1553_v36  ;;  %v1555_v57 = vpop.f32.mrb[81].mxu0 }
 0x3bc   : > { %v1556_v59 = vpop.f32.mrb[82].mxu0 }
 0x3bd   : > { %v1557_v60 = vpop.f32.mrb[83].mxu0  ;;  %5997 = vmatmul.mubr.msk.bf16.gmra.mrb[84].mxu0 %vm1070_vm1, %v1562_v53 }
 0x3be   : > { %6002 = vmatprep.mubr.msk.bf16.mxu0 %vm1070_vm1, %v1772_v16  ;;  %v6559_v16 = vld [vmem:[%s8169_s3 + $0x154] ss:$8 sps:$4 sm:$0xff]  }
 0x3c5   : > { %6003 = vmatmul.mubr.msk.bf16.vlgmr.msra.gmra.mrb[52].mxu0 %vm1070_vm1, %v1773_v24 }
 0x3c6   : > { %6006 = vmatprep.mubr.msk.bf16.mxu0 %vm1070_vm1, %v1774_v32  ;;  %6011 = vmatpush3.bf16.msra.mxu0 %v6556_v25 }
 0x3c7   : > { %2134 = vmatprep.subr.bf16.mxu0 %v6696_v20 }
 0x3cd   : > { %6007 = vmatmul.mubr.msk.bf16.gmra.mrb[88].mxu0 %vm1070_vm1, %v1775_v11 }
 0x3ce   : > { %6012 = vmatprep.mubr.msk.bf16.mxu0 %vm1070_vm1, %v1985_v46 }
 0x3d5   : > { %6013 = vmatmul.mubr.msk.bf16.vlgmr.msra.gmra.mrb[52].mxu0 %vm1070_vm1, %v1986_v56 }
 0x3d6   : > { %2135 = vmatpush1.bf16.msra.mxu0 %v6855_v33  ;;  %6016 = vmatprep.mubr.msk.bf16.mxu0 %vm1070_vm1, %v1987_v2  ;;  %v6557_v33 = vld [vmem:[%s8169_s3 + $0x150] ss:$8 sps:$4 sm:$0xff]  }
 0x3d7   : > { %2136 = vmatprep.subr.bf16.mxu0 %v6696_v20  ;;  %v6588_v2 = vld [vmem:[%s8170_s4 + $0x38] sm:$0xff]  }
 0x3da   : > { %2137 = vmatpush1.bf16.msra.mxu0 %v6861_v44  ;;  %v6560_v44 = vld [vmem:[%s8169_s3 + $0x164] ss:$8 sps:$4 sm:$0xff]  }
 0x3db   : > { %2138 = vmatprep.subr.bf16.mxu0 %v6696_v20 }
 0x3dd   : > { %6017 = vmatmul.mubr.msk.bf16.gmra.mrb[92].mxu0 %vm1070_vm1, %v1988_v15 }
 0x3de   : > { %2139 = vmatpush1.bf16.msra.mxu0 %v6867_v55  ;;  %5335 = vmatprep.mubr.msk.bf16.mxu0 %vm853_vm4, %v6559_v16  ;;  %v6564_v55 = vld [vmem:[%s8169_s3 + $0x160] ss:$8 sps:$4 sm:$0xff]  }
 0x3df   : > { %2140 = vmatprep.subr.bf16.mxu0 %v6696_v20 }
 0x3e2   : > { %2141 = vmatpush1.bf16.msra.mxu0 %v6873_v3  ;;  %v6566_v3 = vld [vmem:[%s8169_s3 + $0x174] ss:$8 sps:$4 sm:$0xff]  }
 0x3e3   : > { %2142 = vmatprep.subr.bf16.mxu0 %v6696_v20 }
 0x3e6   : > { %2143 = vmatpush1.bf16.msra.mxu0 %v6879_v14  ;;  %v5326_v14 = vld [vmem:[%s8169_s3 + $0x180] sm:$0x11] }
 0x3e7   : > { %2144 = vmatprep.subr.bf16.mxu0 %v6696_v20 }
 0x3ea   : > { %2145 = vmatpush1.bf16.msra.mxu0 %v6885_v27  ;;  %v6570_v27 = vld [vmem:[%s8169_s3 + $0x170] ss:$8 sps:$4 sm:$0xff]  }
 0x3eb   : > { %2146 = vmatprep.subr.bf16.mxu0 %v6696_v20 }
 0x3ee   : > { %2147 = vmatpush1.bf16.msra.mxu0 %v6891_v39  ;;  %v5334_v39 = vcombine.high %v5326_v14, %v5326_v14 }
 0x3ef   : > { %2148 = vmatprep.subr.bf16.mxu0 %v6696_v20 }
 0x3f2   : > { %2149 = vmatpush1.bf16.msra.mxu0 %v6897_v51  ;;  %v5333_v51 = vcombine.low %v5326_v14, %v5326_v14 }
 0x3f3   : > { %2150 = vmatprep.subr.bf16.mxu0 %v6696_v20 }
 0x3f6   : > { %2151 = vmatpush1.bf16.msra.mxu0 %v6903_v63  ;;  %v7510_v63 = vpop.f32.mrb[80].mxu1 }
 0x3f7   : > { %2152 = vmatprep.subr.bf16.mxu0 %v6696_v20 }
 0x3fa   : > { %2153 = vmatpush1.bf16.msra.mxu0 %v6909_v12  ;;  %v2383_v12 = vpop.f32.mrb[81].mxu1 }
 0x3fb   : > { %2154 = vmatprep.subr.bf16.mxu0 %v6696_v20 }
 0x3fe   : > { %2155 = vmatpush1.bf16.msra.mxu0 %v6915_v26  ;;  %v7512_v26 = vpop.f32.mrb[82].mxu1 }
 0x3ff   : > { %2156 = vmatprep.subr.bf16.mxu0 %v6696_v20 }
 0x402   : > { %2157 = vmatpush1.bf16.msra.mxu0 %v6921_v40  ;;  %v2411_v40 = vpack.c.bf16 %v7512_v26, %v7510_v63 }
 0x403   : > { %2158 = vmatprep.subr.bf16.mxu0 %v6696_v20 }
 0x406   : > { %2159 = vmatpush1.bf16.msra.mxu0 %v6926_v50  ;;  %v2386_v50 = vpop.f32.mrb[83].mxu1 }
 0x407   : > { %6020 = vmatprep.subr.bf16.mxu0 %v6587_v19  ;;  %v7519_v23 = vpop.f32.mrb[84].mxu1 }
 0x408   : > { %v2391_v24 = vpop.f32.mrb[85].mxu1 }
 0x409   : > { %2167 = vmatmul.mubr.bf16.vlgmr.msra.gmra.mrb[96].mxu0 %v6557_v33  ;;  %v7521_v28 = vpop.f32.mrb[86].mxu1 }
 0x40a   : > { %5336 = vmatprep.mubr.msk.bf16.mxu0 %vm853_vm4, %v6560_v44  ;;  %6021 = vmatpush3.bf16.msra.mxu0 %v6587_v19  ;;  %v2394_v31 = vpop.f32.mrb[87].mxu1  ;;  %v2412_v32 = vpack.c.bf16 %v7521_v28, %v7519_v23 }
 0x40b   : > { %6030 = vmatprep.subr.bf16.mxu0 %v6588_v2 }
 0x411   : > { %2175 = vmatmul.mubr.bf16.gmra.mrb[100].mxu0 %v6564_v55 }
 0x412   : > { %5337 = vmatprep.mubr.msk.bf16.mxu0 %vm853_vm4, %v6566_v3 }
 0x419   : > { %2183 = vmatmul.mubr.bf16.gmra.mrb[104].mxu0 %v6570_v27 }
 0x41a   : > { %5338 = vmatprep.mubr.msk.bf16.mxu0 %vm853_vm4, %v5334_v39 }
 0x421   : > { %2191 = vmatmul.mubr.bf16.gmra.mrb[108].mxu0 %v5333_v51 }
 0x42e   : > { %v7525_v34 = vpop.f32.mrb[88].mxu1 }
 0x42f   : > { %v2399_v41 = vpop.f32.mrb[89].mxu1 }
 0x430   : > { %v7527_v43 = vpop.f32.mrb[90].mxu1 }
 0x431   : > { %v2402_v46 = vpop.f32.mrb[91].mxu1  ;;  %v2413_v22 = vpack.c.bf16 %v7527_v43, %v7525_v34 }
 0x436   : > { %v7531_v54 = vpop.f32.mrb[92].mxu1 }
 0x437   : > { %v2407_v56 = vpop.f32.mrb[93].mxu1 }
 0x438   : > { %v2408_v58 = vpop.f32.mrb[94].mxu1 }
 0x439   : > { %v2409_v61 = vpop.f32.mrb[95].mxu1 }
 0x43a   : > { %v6589_v61 = vld [vmem:[%s8170_s4 + $0x40] sm:$0xff]  }
 0x43e   : > { %v7536_v7 = vpop.f32.mrb[96].mxu1 }
 0x43f   : > { %v2596_v62 = vpop.f32.mrb[97].mxu1 }
 0x440   : > { %v7538_v0 = vpop.f32.mrb[98].mxu1 }
 0x441   : > { %v2599_v4 = vpop.f32.mrb[99].mxu1  ;;  %v2624_v5 = vpack.c.bf16 %v7538_v0, %v7536_v7 }
 0x452   : > { %v7542_v6 = vpop.f32.mrb[100].mxu1 }
 0x453   : > { %v2604_v8 = vpop.f32.mrb[101].mxu1 }
 0x454   : > { %v7544_v9 = vpop.f32.mrb[102].mxu1 }
 0x455   : > { %v2607_v10 = vpop.f32.mrb[103].mxu1  ;;  %v2625_v13 = vpack.c.bf16 %v7544_v9, %v7542_v6 }
 0x45a   : > { %v7548_v17 = vpop.f32.mrb[104].mxu1 }
 0x45b   : > { %v2612_v18 = vpop.f32.mrb[105].mxu1 }
 0x45c   : > { %v7550_v25 = vpop.f32.mrb[106].mxu1 }
 0x45d   : > { %v2615_v29 = vpop.f32.mrb[107].mxu1  ;;  %v2626_v35 = vpack.c.bf16 %v7550_v25, %v7548_v17 }
 0x462   : > { %v2618_v47 = vpop.f32.mrb[108].mxu1 }
 0x463   : > { %v2620_v36 = vpop.f32.mrb[109].mxu1  ;;  %v2627_v63 = vpack.c.bf16 %v2618_v47, %v2618_v47 }
 0x464   : > { %v2621_v53 = vpop.f32.mrb[110].mxu1 }
 0x465   : > { %v2622_v59 = vpop.f32.mrb[111].mxu1 }
 0x490   : > { %v5998_v38 = vpop.f32.mrb[84].mxu0 }
 0x491   : > { %v1654_v42 = vadd.f32 %v5998_v38, %v7370_v21  ;;  %v1634_v45 = vpop.f32.mrb[85].mxu0 }
 0x492   : > { %v1652_v48 = vadd.f32 %v1634_v45, %v7372_v30  ;;  %v5999_v49 = vpop.f32.mrb[86].mxu0 }
 0x493   : > { %v1637_v52 = vpop.f32.mrb[87].mxu0 }
 0x494   : > { %v1653_v57 = vadd.f32 %v1637_v52, %v7374_v37 }
 0x4a0   : > { %v6008_v60 = vpop.f32.mrb[88].mxu0 }
 0x4a1   : > { %v1867_v11 = vadd.f32 %v6008_v60, %v1654_v42  ;;  %v1847_v15 = vpop.f32.mrb[89].mxu0 }
 0x4a2   : > { %v1865_v16 = vadd.f32 %v1847_v15, %v1652_v48  ;;  %v6009_v33 = vpop.f32.mrb[90].mxu0 }
 0x4a3   : > { %v1850_v44 = vpop.f32.mrb[91].mxu0 }
 0x4a4   : > { %v1866_v55 = vadd.f32 %v1850_v44, %v1653_v57 }
 0x4b0   : > { %v6018_v3 = vpop.f32.mrb[92].mxu0 }
 0x4b1   : > { %v2080_v21 = vadd.f32 %v6018_v3, %v1867_v11  ;;  %v2060_v14 = vpop.f32.mrb[93].mxu0 }
 0x4b2   : > { %v2078_v27 = vadd.f32 %v2060_v14, %v1865_v16  ;;  %v6019_v39 = vpop.f32.mrb[94].mxu0 }
 0x4b3   : > { %v2063_v30 = vpop.f32.mrb[95].mxu0 }
 0x4b4   : > { %v2079_v51 = vadd.f32 %v2063_v30, %v1866_v55 }
 0x4dc   : > { %v2168_v12 = vpop.f32.mrb[96].mxu0 }
 0x4dd   : > { %v2170_v50 = vpop.f32.mrb[97].mxu0 }
 0x4de   : > { %v2171_v19 = vpop.f32.mrb[98].mxu0 }
 0x4df   : > { %v2198_v24 = vpack.c.bf16 %v2171_v19, %v2168_v12  ;;  %v2173_v37 = vpop.f32.mrb[99].mxu0 }
 0x4e1   : > { %6022 = vmatprep.mubr.msk.bf16.mxu0 %vm1070_vm1, %v2198_v24 }
 0x4e4   : > { %v2176_v31 = vpop.f32.mrb[100].mxu0 }
 0x4e5   : > { %v2178_v41 = vpop.f32.mrb[101].mxu0 }
 0x4e6   : > { %v2179_v46 = vpop.f32.mrb[102].mxu0 }
 0x4e7   : > { %v2199_v56 = vpack.c.bf16 %v2179_v46, %v2176_v31  ;;  %v2181_v58 = vpop.f32.mrb[103].mxu0 }
 0x4e9   : > { %6023 = vmatmul.mubr.msk.bf16.vlgmr.msra.gmra.mrb[52].mxu0 %vm1070_vm1, %v2199_v56 }
 0x4ea   : > { %6031 = vmatpush3.bf16.msra.mxu0 %v6588_v2  ;;  %v2414_v2 = vpack.c.bf16 %v7531_v54, %v7531_v54 }
 0x4eb   : > { %6040 = vmatprep.subr.bf16.mxu0 %v6589_v61 }
 0x4ec   : > { %v2184_v62 = vpop.f32.mrb[104].mxu0 }
 0x4ed   : > { %v2186_v4 = vpop.f32.mrb[105].mxu0 }
 0x4ee   : > { %v2187_v8 = vpop.f32.mrb[106].mxu0  ;;  %v2772_v4 = vsel %vm2770_vm10, 65535, %v6696_v20  ;;  %v6593_v20 = vld [vmem:[%s8173_s7 + $0x10] sm:$0xff]  }
 0x4ef   : > { %v2200_v10 = vpack.c.bf16 %v2187_v8, %v2184_v62  ;;  %v2189_v17 = vpop.f32.mrb[107].mxu0 }
 0x4f0   : > { %v6591_v17 = vld [vmem:[%s8172_s6] sm:$0xff]  }
 0x4f1   : > { %6026 = vmatprep.mubr.msk.bf16.mxu0 %vm1070_vm1, %v2200_v10  ;;  %v6590_v10 = vld [vmem:[%s8172_s6 + $0x8] sm:$0xff]  }
 0x4f4   : > { %v2192_v18 = vpop.f32.mrb[108].mxu0 }
 0x4f5   : > { %v2201_v25 = vpack.c.bf16 %v2192_v18, %v2192_v18  ;;  %v2194_v29 = vpop.f32.mrb[109].mxu0  ;;  %v6592_v18 = vld [vmem:[%s8172_s6 + $0x10] sm:$0xff]  }
 0x4f6   : > { %v2195_v38 = vpop.f32.mrb[110].mxu0 }
 0x4f7   : > { %v2196_v42 = vpop.f32.mrb[111].mxu0  ;;  %6027 = vmatmul.mubr.msk.bf16.gmra.mrb[112].mxu0 %vm1070_vm1, %v2201_v25  ;;  %v6594_v25 = vld [vmem:[%s8173_s7 + $0x18] sm:$0xff]  }
 0x4f8   : > { %6032 = vmatprep.mubr.msk.bf16.mxu0 %vm1070_vm1, %v2411_v40 }
 0x4ff   : > { %6033 = vmatmul.mubr.msk.bf16.vlgmr.msra.gmra.mrb[52].mxu0 %vm1070_vm1, %v2412_v32 }
 0x500   : > { %6036 = vmatprep.mubr.msk.bf16.mxu0 %vm1070_vm1, %v2413_v22  ;;  %6041 = vmatpush3.bf16.msra.mxu0 %v6589_v61 }
 0x501   : > { %6050 = vmatprep.subr.bf16.mxu0 %v6693_v1 }
 0x507   : > { %6037 = vmatmul.mubr.msk.bf16.gmra.mrb[116].mxu0 %vm1070_vm1, %v2414_v2 }
 0x508   : > { %6042 = vmatprep.mubr.msk.bf16.mxu0 %vm1070_vm1, %v2624_v5 }
 0x50f   : > { %6043 = vmatmul.mubr.msk.bf16.vlgmr.msra.gmra.mrb[52].mxu0 %vm1070_vm1, %v2625_v13  ;;  %v5398_v13 = vld [vmem:[%s8171_s5] ss:$0 sm:$0xff] }
 0x510   : > { %6046 = vmatprep.mubr.msk.bf16.mxu0 %vm1070_vm1, %v2626_v35 }
 0x517   : > { %6047 = vmatmul.mubr.msk.bf16.gmra.mrb[120].mxu0 %vm1070_vm1, %v2627_v63 }
 0x518   : > { %6058 = vmatprep.mubr.msk.bf16.mxu0 %vm6695_vm2, %v6693_v1 }
 0x5ca   : > { %v6028_v26 = vpop.f32.mrb[112].mxu0 }
 0x5cb   : > { %v2293_v40 = vadd.f32 %v6028_v26, %v2080_v21  ;;  %v2273_v23 = vpop.f32.mrb[113].mxu0  ;;  %v6595_v26 = vld [vmem:[%s8173_s7] sm:$0xff]  }
 0x5cc   : > { %v2291_v28 = vadd.f32 %v2273_v23, %v2078_v27  ;;  %v6029_v32 = vpop.f32.mrb[114].mxu0 }
 0x5cd   : > { %v2276_v34 = vpop.f32.mrb[115].mxu0 }
 0x5ce   : > { %v2292_v43 = vadd.f32 %v2276_v34, %v2079_v51 }
 0x5da   : > { %v6038_v22 = vpop.f32.mrb[116].mxu0 }
 0x5db   : > { %v2506_v54 = vadd.f32 %v6038_v22, %v2293_v40  ;;  %v2486_v7 = vpop.f32.mrb[117].mxu0  ;;  %v6597_v22 = vld [vmem:[%s8173_s7 + $0x20] sm:$0xff]  }
 0x5dc   : > { %v2504_v0 = vadd.f32 %v2486_v7, %v2291_v28  ;;  %v6039_v5 = vpop.f32.mrb[118].mxu0 }
 0x5dd   : > { %v2489_v6 = vpop.f32.mrb[119].mxu0 }
 0x5de   : > { %v2505_v9 = vadd.f32 %v2489_v6, %v2292_v43  ;;  %v6596_v43 = vld [vmem:[%s8173_s7 + $0x8] sm:$0xff]  }
 0x5e2   : > { %v6044_v35 = vpop.f32.mrb[52].mxu0 }
 0x5e3   : > { %v2729_v45 = vadd.f32 %v6044_v35, %v5398_v13  ;;  %v2683_v47 = vpop.f32.mrb[53].mxu0  ;;  %v6600_v35 = vld [vmem:[%s8173_s7 + $0x30] sm:$0xff]  }
 0x5e4   : > { %v2727_v48 = vadd.f32 %v5398_v13, %v2683_v47  ;;  %v6045_v49 = vpop.f32.mrb[54].mxu0 }
 0x5e5   : > { %v2743_v36 = vmul.f32 0.2, %v2729_v45  ;;  %v2730_v52 = vadd.f32 %v6045_v49, %v5398_v13  ;;  %v2686_v53 = vpop.f32.mrb[55].mxu0  ;;  %vm2736_vm4 = vcmp.gt.f32.partialorder %v2729_v45, 0.0 }
 0x5e6   : > { %v2741_v57 = vmul.f32 0.2, %v2727_v48  ;;  %v2728_v59 = vadd.f32 %v5398_v13, %v2686_v53  ;;  %vm2734_vm3 = vcmp.gt.f32.partialorder %v2727_v48, 0.0 }
 0x5e7   : > { %vm2737_vm5 = vcmp.gt.f32.partialorder %v2730_v52, 0.0  ;;  %v2744_v60 = vmul.f32 0.2, %v2730_v52  ;;  %v2750_v15 = vsel %vm2736_vm4, %v2729_v45, %v2743_v36  ;;  %v6601_v45 = vld [vmem:[%s8173_s7 + $0x38] sm:$0xff]  }
 0x5e8   : > { %vm2735_vm6 = vcmp.gt.f32.partialorder %v2728_v59, 0.0  ;;  %v2742_v11 = vmul.f32 0.2, %v2728_v59  ;;  %v2748_v33 = vsel %vm2734_vm3, %v2727_v48, %v2741_v57 }
 0x5e9   : > { %v2751_v16 = vsel %vm2737_vm5, %v2730_v52, %v2744_v60 }
 0x5ea   : > { %v7595_v44 = vpack.c.bf16 %v2751_v16, %v2750_v15  ;;  %v2749_v55 = vsel %vm2735_vm6, %v2728_v59, %v2742_v11  ;;  %v6048_v3 = vpop.f32.mrb[120].mxu0 }
 0x5eb   : > { %v7597_v21 = vpack.c.bf16 %v2749_v55, %v2748_v33  ;;  %v2719_v14 = vadd.f32 %v6048_v3, %v2506_v54  ;;  %v2699_v27 = vpop.f32.mrb[121].mxu0  ;;  %v6598_v54 = vld [vmem:[%s8173_s7 + $0x28] sm:$0xff]  }
 0x5ec   : > { %v2717_v39 = vadd.f32 %v2699_v27, %v2504_v0  ;;  %v6049_v30 = vpop.f32.mrb[122].mxu0 }
 0x5ed   : > { %v2733_v51 = vadd.f32 %v5398_v13, %v2719_v14  ;;  %v2702_v12 = vpop.f32.mrb[123].mxu0  ;;  %6051 = vmatpush3.bf16.msra.mxu0 %v7597_v21  ;;  %6063 = vmatpush3.bf16.msra.mxu1 %v7597_v21 }
 0x5ee   : > { %v2731_v50 = vadd.f32 %v5398_v13, %v2717_v39  ;;  %v2718_v19 = vadd.f32 %v2702_v12, %v2505_v9  ;;  %6052 = vmatprep.subr.bf16.mxu0 %v6693_v1  ;;  %6064 = vmatprep.subr.bf16.mxu1 %v6693_v1 }
 0x5ef   : > { %vm2740_vm7 = vcmp.gt.f32.partialorder %v2733_v51, 0.0  ;;  %v2747_v24 = vmul.f32 0.2, %v2733_v51 }
 0x5f0   : > { %v2745_v37 = vmul.f32 0.2, %v2731_v50  ;;  %v2732_v31 = vadd.f32 %v5398_v13, %v2718_v19  ;;  %vm2738_vm8 = vcmp.gt.f32.partialorder %v2731_v50, 0.0  ;;  %v6599_v13 = vld [vmem:[%s8172_s6 + $0x18] sm:$0xff]   ;;  %v6603_v19 = vld [vmem:[%s8173_s7 + $0x40] sm:$0xff]  }
 0x5f1   : > { %6053 = vmatpush3.bf16.msra.mxu0 %v7595_v44  ;;  %6065 = vmatpush3.bf16.msra.mxu1 %v7595_v44  ;;  %v2754_v41 = vsel %vm2740_vm7, %v2733_v51, %v2747_v24  ;;  %v6604_v24 = vld [vmem:[%s8173_s7 + $0x48] sm:$0xff]  }
 0x5f2   : > { %vm2739_vm9 = vcmp.gt.f32.partialorder %v2732_v31, 0.0  ;;  %v2746_v46 = vmul.f32 0.2, %v2732_v31  ;;  %6054 = vmatprep.subr.bf16.mxu0 %v6693_v1  ;;  %6066 = vmatprep.subr.bf16.mxu1 %v6693_v1  ;;  %v2752_v56 = vsel %vm2738_vm8, %v2731_v50, %v2745_v37  ;;  %v2758_v61 = vpack.c.bf16 %v2754_v41, %v2754_v41  ;;  %v6602_v50 = vld [vmem:[%s8172_s6 + $0x20] sm:$0xff]  }
 0x5f4   : > { %v2753_v58 = vsel %vm2739_vm9, %v2732_v31, %v2746_v46  ;;  %v7615_v8 = vand.u32 %v2772_v4, %v2758_v61 }
 0x5f5   : > { %v7607_v62 = vpack.c.bf16 %v2753_v58, %v2752_v56 }
 0x5f7   : > { %6055 = vmatpush3.bf16.msra.mxu0 %v7607_v62  ;;  %6067 = vmatpush3.bf16.msra.mxu1 %v7607_v62 }
 0x5f8   : > { %6056 = vmatprep.subr.bf16.mxu0 %v6693_v1  ;;  %6068 = vmatprep.subr.bf16.mxu1 %v6693_v1 }
 0x5fb   : > { %6057 = vmatpush3.bf16.msra.mxu0 %v7615_v8  ;;  %6069 = vmatpush3.bf16.msra.mxu1 %v7615_v8 }
 0x5fc   : > { %6090 = vmatprep.subr.bf16.mxu1 %v6693_v1  ;;  %6074 = vmatprep.subr.bf16.mxu0 %v6693_v1 }
 0x5fe   : > { %6071 = vmatmul.mubr.msk.bf16.vlgmr.msra.gmra.mrb[112].mxu1 %vm2766_vm11, %v6590_v10  ;;  %6059 = vmatmul.mubr.msk.bf16.vlgmr.msra.gmra.mrb[124].mxu0 %vm2766_vm11, %v6591_v17 }
 0x5ff   : > { %6091 = vmatpush3.bf16.msra.mxu1 %v7597_v21  ;;  %6098 = vmatprep.mubr.msk.bf16.mxu1 %vm6695_vm2, %v6693_v1 }
 0x600   : > { %6092 = vmatprep.subr.bf16.mxu1 %v6693_v1  ;;  %6075 = vmatpush3.bf16.msra.mxu0 %v6593_v20 }
 0x601   : > { %6076 = vmatprep.subr.bf16.mxu0 %v6693_v1  ;;  %6078 = vmatprep.mubr.msk.bf16.mxu0 %vm6695_vm2, %v6693_v1 }
 0x603   : > { %6093 = vmatpush3.bf16.msra.mxu1 %v7595_v44 }
 0x604   : > { %6094 = vmatprep.subr.bf16.mxu1 %v6693_v1  ;;  %6077 = vmatpush3.bf16.msra.mxu0 %v6594_v25  ;;  %v6606_v25 = vld [vmem:[%s8173_s7 + $0x50] sm:$0xff]  }
 0x605   : > { %6082 = vmatprep.subr.bf16.mxu0 %v6693_v1 }
 0x607   : > { %6095 = vmatpush3.bf16.msra.mxu1 %v7607_v62 }
 0x608   : > { %6096 = vmatprep.subr.bf16.mxu1 %v6693_v1 }
 0x60b   : > { %6097 = vmatpush3.bf16.msra.mxu1 %v7615_v8 }
 0x60c   : > { %6122 = vmatprep.subr.bf16.mxu1 %v6693_v1 }
 0x60e   : > { %6099 = vmatmul.mubr.msk.bf16.vlgmr.msra.gmra.mrb[116].mxu1 %vm2766_vm11, %v6592_v18  ;;  %v6605_v18 = vld [vmem:[%s8172_s6 + $0x28] sm:$0xff]  }
 0x60f   : > { %6126 = vmatprep.mubr.msk.bf16.mxu1 %vm6695_vm2, %v6693_v1  ;;  %6123 = vmatpush3.bf16.msra.mxu1 %v6600_v35 }
 0x610   : > { %6124 = vmatprep.subr.bf16.mxu1 %v6693_v1 }
 0x613   : > { %6125 = vmatpush3.bf16.msra.mxu1 %v6601_v45 }
 0x614   : > { %6130 = vmatprep.subr.bf16.mxu1 %v6693_v1 }
 0x6d1   : > { %v2867_v29 = vpop.f32.mrb[112].mxu1  ;;  %v2810_v38 = vpop.f32.mrb[124].mxu0 }
 0x6d2   : > { %v6072_v42 = vpop.f32.mrb[113].mxu1  ;;  %v6060_v2 = vpop.f32.mrb[125].mxu0 }
 0x6d3   : > { %v2870_v63 = vpop.f32.mrb[114].mxu1  ;;  %v2813_v40 = vpop.f32.mrb[126].mxu0 }
 0x6d4   : > { %v2874_v23 = vpack.c.bf16 %v2870_v63, %v2867_v29  ;;  %v2817_v28 = vpack.c.bf16 %v2813_v40, %v2810_v38  ;;  %v6073_v32 = vpop.f32.mrb[115].mxu1  ;;  %v6061_v34 = vpop.f32.mrb[127].mxu0  ;;  %v6607_v29 = vld [vmem:[%s8173_s7 + $0x58] sm:$0xff]  }
 0x6d6   : > { %6079 = vmatmul.mubr.msk.bf16.vlgmr.msra.gmra.mrb[128].mxu0 %vm2892_vm12, %v2874_v23 }
 0x6d7   : > { %6083 = vmatpush3.bf16.msra.mxu0 %v6595_v26  ;;  %6086 = vmatprep.mubr.msk.bf16.mxu0 %vm6695_vm2, %v6693_v1 }
 0x6d8   : > { %6084 = vmatprep.subr.bf16.mxu0 %v6693_v1 }
 0x6db   : > { %6085 = vmatpush3.bf16.msra.mxu0 %v6596_v43 }
 0x6dc   : > { %6102 = vmatprep.subr.bf16.mxu0 %v6693_v1 }
 0x6de   : > { %6087 = vmatmul.mubr.msk.bf16.vlgmr.msra.gmra.mrb[132].mxu0 %vm2892_vm12, %v2817_v28 }
 0x6df   : > { %6103 = vmatpush3.bf16.msra.mxu0 %v6597_v22  ;;  %6106 = vmatprep.mubr.msk.bf16.mxu0 %vm6695_vm2, %v6693_v1  ;;  %v6608_v22 = vld [vmem:[%s8172_s6 + $0x30] sm:$0xff]  }
 0x6e0   : > { %6104 = vmatprep.subr.bf16.mxu0 %v6693_v1 }
 0x6e1   : > { %v3038_v7 = vpop.f32.mrb[116].mxu1 }
 0x6e2   : > { %v6100_v0 = vpop.f32.mrb[117].mxu1 }
 0x6e3   : > { %6105 = vmatpush3.bf16.msra.mxu0 %v6598_v54  ;;  %v3041_v5 = vpop.f32.mrb[118].mxu1  ;;  %v6609_v54 = vld [vmem:[%s8173_s7 + $0x60] sm:$0xff]  }
 0x6e4   : > { %v3045_v6 = vpack.c.bf16 %v3041_v5, %v3038_v7  ;;  %6110 = vmatprep.subr.bf16.mxu0 %v6693_v1  ;;  %v6101_v9 = vpop.f32.mrb[119].mxu1  ;;  %v6610_v7 = vld [vmem:[%s8173_s7 + $0x68] sm:$0xff]  }
 0x6e6   : > { %6107 = vmatmul.mubr.msk.bf16.vlgmr.msra.gmra.mrb[136].mxu0 %vm2892_vm12, %v3045_v6 }
 0x6e7   : > { %6111 = vmatpush3.bf16.msra.mxu0 %v7597_v21  ;;  %6118 = vmatprep.mubr.msk.bf16.mxu0 %vm6695_vm2, %v6693_v1 }
 0x6e8   : > { %6112 = vmatprep.subr.bf16.mxu0 %v6693_v1 }
 0x6eb   : > { %6113 = vmatpush3.bf16.msra.mxu0 %v7595_v44 }
 0x6ec   : > { %6114 = vmatprep.subr.bf16.mxu0 %v6693_v1 }
 0x6ef   : > { %6115 = vmatpush3.bf16.msra.mxu0 %v7607_v62 }
 0x6f0   : > { %6116 = vmatprep.subr.bf16.mxu0 %v6693_v1 }
 0x6f3   : > { %6117 = vmatpush3.bf16.msra.mxu0 %v7615_v8 }
 0x6f4   : > { %6142 = vmatprep.subr.bf16.mxu0 %v6693_v1 }
 0x6f6   : > { %6119 = vmatmul.mubr.msk.bf16.vlgmr.msra.gmra.mrb[140].mxu0 %vm2766_vm11, %v6599_v13 }
 0x6f7   : > { %6146 = vmatprep.mubr.msk.bf16.mxu0 %vm6695_vm2, %v6693_v1  ;;  %6143 = vmatpush3.bf16.msra.mxu0 %v6603_v19 }
 0x6f8   : > { %6144 = vmatprep.subr.bf16.mxu0 %v6693_v1 }
 0x6fb   : > { %6145 = vmatpush3.bf16.msra.mxu0 %v6604_v24 }
 0x6fc   : > { %6150 = vmatprep.subr.bf16.mxu0 %v6693_v1 }
 0x7a9   : > { %v2930_v47 = vpop.f32.mrb[128].mxu0 }
 0x7aa   : > { %v6080_v48 = vpop.f32.mrb[129].mxu0 }
 0x7ab   : > { %v2933_v49 = vpop.f32.mrb[130].mxu0 }
 0x7ac   : > { %v6081_v36 = vpop.f32.mrb[131].mxu0 }
 0x7b1   : > { %v2986_v52 = vpop.f32.mrb[132].mxu0 }
 0x7b2   : > { %v2987_v53 = vadd.f32 %v2986_v52, %v2930_v47  ;;  %v6088_v57 = vpop.f32.mrb[133].mxu0  ;;  %v6611_v52 = vld [vmem:[%s8172_s6 + $0x38] sm:$0xff]  }
 0x7b3   : > { %v2989_v59 = vpop.f32.mrb[134].mxu0  ;;  %v6613_v57 = vld [vmem:[%s8173_s7 + $0x78] sm:$0xff]  }
 0x7b4   : > { %v2990_v60 = vadd.f32 %v2989_v59, %v2933_v49  ;;  %v6089_v11 = vpop.f32.mrb[135].mxu0 }
 0x7b9   : > { %v3100_v15 = vpop.f32.mrb[136].mxu0 }
 0x7ba   : > { %v3107_v16 = vadd.f32 %v3100_v15, %v2987_v53  ;;  %v6108_v33 = vpop.f32.mrb[137].mxu0  ;;  %v6612_v53 = vld [vmem:[%s8173_s7 + $0x70] sm:$0xff]  }
 0x7bb   : > { %v3103_v55 = vpop.f32.mrb[138].mxu0 }
 0x7bc   : > { %v3108_v3 = vadd.f32 %v3103_v55, %v2990_v60  ;;  %v6109_v14 = vpop.f32.mrb[139].mxu0 }
 0x7c9   : > { %v3154_v27 = vpop.f32.mrb[140].mxu0 }
 0x7ca   : > { %v6120_v39 = vpop.f32.mrb[141].mxu0 }
 0x7cb   : > { %v3157_v30 = vpop.f32.mrb[142].mxu0 }
 0x7cc   : > { %v3161_v51 = vpack.c.bf16 %v3157_v30, %v3154_v27  ;;  %v6121_v12 = vpop.f32.mrb[143].mxu0  ;;  %v6614_v30 = vld [vmem:[%s8172_s6 + $0x40] sm:$0xff]  }
 0x7ce   : > { %6127 = vmatmul.mubr.msk.bf16.vlgmr.msra.gmra.mrb[120].mxu1 %vm2892_vm12, %v3161_v51 }
 0x7cf   : > { %6131 = vmatpush3.bf16.msra.mxu1 %v7597_v21  ;;  %6138 = vmatprep.mubr.msk.bf16.mxu1 %vm6695_vm2, %v6693_v1 }
 0x7d0   : > { %6132 = vmatprep.subr.bf16.mxu1 %v6693_v1 }
 0x7d3   : > { %6133 = vmatpush3.bf16.msra.mxu1 %v7595_v44 }
 0x7d4   : > { %6134 = vmatprep.subr.bf16.mxu1 %v6693_v1 }
 0x7d7   : > { %6135 = vmatpush3.bf16.msra.mxu1 %v7607_v62 }
 0x7d8   : > { %6136 = vmatprep.subr.bf16.mxu1 %v6693_v1 }
 0x7db   : > { %6137 = vmatpush3.bf16.msra.mxu1 %v7615_v8 }
 0x7dc   : > { %6162 = vmatprep.subr.bf16.mxu1 %v6693_v1 }
 0x7de   : > { %6139 = vmatmul.mubr.msk.bf16.vlgmr.msra.gmra.mrb[124].mxu1 %vm2766_vm11, %v6602_v50 }
 0x7df   : > { %6166 = vmatprep.mubr.msk.bf16.mxu1 %vm6695_vm2, %v6693_v1  ;;  %6163 = vmatpush3.bf16.msra.mxu1 %v6606_v25 }
 0x7e0   : > { %6164 = vmatprep.subr.bf16.mxu1 %v6693_v1 }
 0x7e3   : > { %6165 = vmatpush3.bf16.msra.mxu1 %v6607_v29  ;;  %v5492_v29 = vld [vmem:[%s8174_s8] ss:$0 sm:$0xff] }
 0x7e4   : > { %6170 = vmatprep.subr.bf16.mxu1 %v6693_v1 }
 0x8a1   : > { %v3216_v37 = vpop.f32.mrb[120].mxu1 }
 0x8a2   : > { %v3223_v31 = vadd.f32 %v3216_v37, %v3107_v16  ;;  %v6128_v41 = vpop.f32.mrb[121].mxu1 }
 0x8a3   : > { %v3219_v46 = vpop.f32.mrb[122].mxu1 }
 0x8a4   : > { %v3224_v56 = vadd.f32 %v3219_v46, %v3108_v3  ;;  %v6129_v58 = vpop.f32.mrb[123].mxu1  ;;  %v6618_v46 = vld [vmem:[%s8175_s9 + $0x20] sm:$0xff]  }
 0x8b1   : > { %v3270_v61 = vpop.f32.mrb[124].mxu1 }
 0x8b2   : > { %v6140_v4 = vpop.f32.mrb[125].mxu1 }
 0x8b3   : > { %v3273_v10 = vpop.f32.mrb[126].mxu1  ;;  %v6620_v4 = vld [vmem:[%s8175_s9 + $0x28] sm:$0xff]  }
 0x8b4   : > { %v3277_v17 = vpack.c.bf16 %v3273_v10, %v3270_v61  ;;  %v6141_v20 = vpop.f32.mrb[127].mxu1  ;;  %v6619_v61 = vld [vmem:[%s8175_s9 + $0x8] sm:$0xff]   ;;  %v6621_v10 = vld [vmem:[%s8175_s9 + $0x10] sm:$0xff]  }
 0x8b5   : > { %v6623_v20 = vld [vmem:[%s8175_s9 + $0x18] sm:$0xff]  }
 0x8b6   : > { %6147 = vmatmul.mubr.msk.bf16.vlgmr.msra.gmra.mrb[144].mxu0 %vm2892_vm12, %v3277_v17  ;;  %v6622_v17 = vld [vmem:[%s8175_s9 + $0x30] sm:$0xff]  }
 0x8b7   : > { %6151 = vmatpush3.bf16.msra.mxu0 %v7597_v21  ;;  %6158 = vmatprep.mubr.msk.bf16.mxu0 %vm6695_vm2, %v6693_v1 }
 0x8b8   : > { %6152 = vmatprep.subr.bf16.mxu0 %v6693_v1 }
 0x8bb   : > { %6153 = vmatpush3.bf16.msra.mxu0 %v7595_v44 }
 0x8bc   : > { %6154 = vmatprep.subr.bf16.mxu0 %v6693_v1 }
 0x8bf   : > { %6155 = vmatpush3.bf16.msra.mxu0 %v7607_v62 }
 0x8c0   : > { %6156 = vmatprep.subr.bf16.mxu0 %v6693_v1 }
 0x8c3   : > { %6157 = vmatpush3.bf16.msra.mxu0 %v7615_v8 }
 0x8c4   : > { %6182 = vmatprep.subr.bf16.mxu0 %v6693_v1 }
 0x8c6   : > { %6159 = vmatmul.mubr.msk.bf16.vlgmr.msra.gmra.mrb[148].mxu0 %vm2766_vm11, %v6605_v18  ;;  %v6624_v18 = vld [vmem:[%s8175_s9 + $0x38] sm:$0xff]  }
 0x8c7   : > { %6186 = vmatprep.mubr.msk.bf16.mxu0 %vm6695_vm2, %v6693_v1  ;;  %6183 = vmatpush3.bf16.msra.mxu0 %v6609_v54 }
 0x8c8   : > { %6184 = vmatprep.subr.bf16.mxu0 %v6693_v1 }
 0x8cb   : > { %6185 = vmatpush3.bf16.msra.mxu0 %v6610_v7  ;;  %v6626_v7 = vld [vmem:[%s8175_s9 + $0x40] sm:$0xff]  }
 0x8cc   : > { %6190 = vmatprep.subr.bf16.mxu0 %v6693_v1 }
 0x989   : > { %v3332_v38 = vpop.f32.mrb[144].mxu0 }
 0x98a   : > { %v3339_v42 = vadd.f32 %v3332_v38, %v3223_v31  ;;  %v6148_v2 = vpop.f32.mrb[145].mxu0 }
 0x98b   : > { %v3335_v63 = vpop.f32.mrb[146].mxu0 }
 0x98c   : > { %v3340_v26 = vadd.f32 %v3335_v63, %v3224_v56  ;;  %v6149_v40 = vpop.f32.mrb[147].mxu0 }
 0x999   : > { %v3386_v23 = vpop.f32.mrb[148].mxu0 }
 0x99a   : > { %v6160_v28 = vpop.f32.mrb[149].mxu0 }
 0x99b   : > { %v3389_v32 = vpop.f32.mrb[150].mxu0 }
 0x99c   : > { %v3393_v34 = vpack.c.bf16 %v3389_v32, %v3386_v23  ;;  %v6161_v43 = vpop.f32.mrb[151].mxu0 }
 0x99e   : > { %6167 = vmatmul.mubr.msk.bf16.vlgmr.msra.gmra.mrb[128].mxu1 %vm2892_vm12, %v3393_v34 }
 0x99f   : > { %6171 = vmatpush3.bf16.msra.mxu1 %v7597_v21  ;;  %6178 = vmatprep.mubr.msk.bf16.mxu1 %vm6695_vm2, %v6693_v1 }
 0x9a0   : > { %6172 = vmatprep.subr.bf16.mxu1 %v6693_v1 }
 0x9a3   : > { %6173 = vmatpush3.bf16.msra.mxu1 %v7595_v44 }
 0x9a4   : > { %6174 = vmatprep.subr.bf16.mxu1 %v6693_v1 }
 0x9a7   : > { %6175 = vmatpush3.bf16.msra.mxu1 %v7607_v62 }
 0x9a8   : > { %6176 = vmatprep.subr.bf16.mxu1 %v6693_v1 }
 0x9ab   : > { %6177 = vmatpush3.bf16.msra.mxu1 %v7615_v8 }
 0x9ac   : > { %6202 = vmatprep.subr.bf16.mxu1 %v6693_v1 }
 0x9ae   : > { %6179 = vmatmul.mubr.msk.bf16.vlgmr.msra.gmra.mrb[132].mxu1 %vm2766_vm11, %v6608_v22  ;;  %v6625_v22 = vld [vmem:[%s8175_s9 + $0x60] sm:$0xff]  }
 0x9af   : > { %6206 = vmatprep.mubr.msk.bf16.mxu1 %vm6695_vm2, %v6693_v1  ;;  %6203 = vmatpush3.bf16.msra.mxu1 %v6612_v53  ;;  %v6636_v53 = vld [vmem:[%s8175_s9 + $0x88] sm:$0xff]  }
 0x9b0   : > { %6204 = vmatprep.subr.bf16.mxu1 %v6693_v1 }
 0x9b3   : > { %6205 = vmatpush3.bf16.msra.mxu1 %v6613_v57  ;;  %v6637_v57 = vld [vmem:[%s8175_s9 + $0xb0] sm:$0xff]  }
 0x9b4   : > { %6210 = vmatprep.subr.bf16.mxu1 %v6693_v1 }
 0xa71   : > { %v3448_v0 = vpop.f32.mrb[128].mxu1 }
 0xa72   : > { %v3455_v5 = vadd.f32 %v3448_v0, %v3339_v42  ;;  %v6168_v6 = vpop.f32.mrb[129].mxu1 }
 0xa73   : > { %v3451_v9 = vpop.f32.mrb[130].mxu1  ;;  %v6628_v6 = vld [vmem:[%s8175_s9 + $0x48] sm:$0xff]  }
 0xa74   : > { %v3456_v13 = vadd.f32 %v3451_v9, %v3340_v26  ;;  %v6169_v35 = vpop.f32.mrb[131].mxu1  ;;  %v6629_v9 = vld [vmem:[%s8175_s9 + $0x70] sm:$0xff]  }
 0xa75   : > { %v6631_v35 = vld [vmem:[%s8175_s9 + $0x78] sm:$0xff]  }
 0xa81   : > { %v3502_v45 = vpop.f32.mrb[132].mxu1 }
 0xa82   : > { %v6180_v47 = vpop.f32.mrb[133].mxu1 }
 0xa83   : > { %v3505_v48 = vpop.f32.mrb[134].mxu1  ;;  %v6633_v47 = vld [vmem:[%s8175_s9 + $0xa0] sm:$0xff]  }
 0xa84   : > { %v3509_v49 = vpack.c.bf16 %v3505_v48, %v3502_v45  ;;  %v6181_v36 = vpop.f32.mrb[135].mxu1  ;;  %v6632_v45 = vld [vmem:[%s8175_s9 + $0x58] sm:$0xff]  }
 0xa86   : > { %6187 = vmatmul.mubr.msk.bf16.vlgmr.msra.gmra.mrb[152].mxu0 %vm2892_vm12, %v3509_v49  ;;  %v6634_v49 = vld [vmem:[%s8175_s9 + $0x80] sm:$0xff]  }
 0xa87   : > { %6191 = vmatpush3.bf16.msra.mxu0 %v7597_v21  ;;  %6198 = vmatprep.mubr.msk.bf16.mxu0 %vm6695_vm2, %v6693_v1 }
 0xa88   : > { %6192 = vmatprep.subr.bf16.mxu0 %v6693_v1 }
 0xa8b   : > { %6193 = vmatpush3.bf16.msra.mxu0 %v7595_v44 }
 0xa8c   : > { %6194 = vmatprep.subr.bf16.mxu0 %v6693_v1 }
 0xa8f   : > { %6195 = vmatpush3.bf16.msra.mxu0 %v7607_v62 }
 0xa90   : > { %6196 = vmatprep.subr.bf16.mxu0 %v6693_v1 }
 0xa93   : > { %6197 = vmatpush3.bf16.msra.mxu0 %v7615_v8 }
 0xa94   : > { %6222 = vmatprep.subr.bf16.mxu0 %v6693_v1 }
 0xa96   : > { %6199 = vmatmul.mubr.msk.bf16.vlgmr.msra.gmra.mrb[156].mxu0 %vm2766_vm11, %v6611_v52  ;;  %v6635_v52 = vld [vmem:[%s8175_s9 + $0xa8] sm:$0xff]  }
 0xa97   : > { %6226 = vmatprep.mubr.msk.bf16.mxu0 %vm6695_vm2, %v6693_v1 }
 0xb59   : > { %v3564_v59 = vpop.f32.mrb[152].mxu0 }
 0xb5a   : > { %v3571_v60 = vadd.f32 %v3564_v59, %v3455_v5  ;;  %v6188_v11 = vpop.f32.mrb[153].mxu0  ;;  %v6627_v5 = vld [vmem:[%s8175_s9 + $0x68] sm:$0xff]   ;;  %v6638_v59 = vld [vmem:[%s8175_s9 + $0x90] sm:$0xff]  }
 0xb5b   : > { %v3567_v15 = vpop.f32.mrb[154].mxu0  ;;  %v6640_v11 = vld [vmem:[%s8175_s9 + $0x98] sm:$0xff]  }
 0xb5c   : > { %v3572_v16 = vadd.f32 %v3567_v15, %v3456_v13  ;;  %v6189_v33 = vpop.f32.mrb[155].mxu0  ;;  %v6630_v13 = vld [vmem:[%s8175_s9 + $0x50] sm:$0xff]   ;;  %v6641_v15 = vld [vmem:[%s8175_s9 + $0xe0] sm:$0xff]  }
 0xb5d   : > { %v6642_v33 = vld [vmem:[%s8175_s9 + $0xc0] sm:$0xff]  }
 0xb69   : > { %v3618_v55 = vpop.f32.mrb[156].mxu0 }
 0xb6a   : > { %v6200_v3 = vpop.f32.mrb[157].mxu0 }
 0xb6b   : > { %v3621_v14 = vpop.f32.mrb[158].mxu0  ;;  %v6643_v3 = vld [vmem:[%s8175_s9 + $0xe8] sm:$0xff]  }
 0xb6c   : > { %v3625_v27 = vpack.c.bf16 %v3621_v14, %v3618_v55  ;;  %v6201_v39 = vpop.f32.mrb[159].mxu0  ;;  %v6644_v14 = vld [vmem:[%s8175_s9 + $0xc8] sm:$0xff]  }
 0xb6d   : > { %v6646_v39 = vld [vmem:[%s8175_s9 + $0xd0] sm:$0xff]  }
 0xb6e   : > { %6207 = vmatmul.mubr.msk.bf16.vlgmr.msra.gmra.mrb[136].mxu1 %vm2892_vm12, %v3625_v27  ;;  %v6645_v27 = vld [vmem:[%s8175_s9 + $0xf0] sm:$0xff]  }
 0xb6f   : > { %6211 = vmatpush3.bf16.msra.mxu1 %v7597_v21  ;;  %6218 = vmatprep.mubr.msk.bf16.mxu1 %vm6695_vm2, %v6693_v1  ;;  %v6616_v21 = vld [vmem:[%s8173_s7 + $0x88] sm:$0xff]  }
 0xb70   : > { %6212 = vmatprep.subr.bf16.mxu1 %v6693_v1 }
 0xb73   : > { %6213 = vmatpush3.bf16.msra.mxu1 %v7595_v44  ;;  %v6615_v44 = vld [vmem:[%s8173_s7 + $0x80] sm:$0xff]  }
 0xb74   : > { %6214 = vmatprep.subr.bf16.mxu1 %v6693_v1  ;;  %6223 = vmatpush3.bf16.msra.mxu0 %v6615_v44  ;;  %v6648_v44 = vld [vmem:[%s8175_s9 + $0xd8] sm:$0xff]  }
 0xb75   : > { %6224 = vmatprep.subr.bf16.mxu0 %v6693_v1 }
 0xb77   : > { %6215 = vmatpush3.bf16.msra.mxu1 %v7607_v62  ;;  %v6617_v62 = vld [vmem:[%s8175_s9] sm:$0xff]  }
 0xb78   : > { %6216 = vmatprep.subr.bf16.mxu1 %v6693_v1  ;;  %6225 = vmatpush3.bf16.msra.mxu0 %v6616_v21  ;;  %v6649_v21 = vld [vmem:[%s8175_s9 + $0x120] sm:$0xff]  }
 0xb79   : > { %6230 = vmatprep.subr.bf16.mxu0 %v6693_v1 }
 0xb7b   : > { %6217 = vmatpush3.bf16.msra.mxu1 %v7615_v8 }
 0xb7c   : > { %6242 = vmatprep.subr.bf16.mxu1 %v6693_v1 }
 0xb7e   : > { %6219 = vmatmul.mubr.msk.bf16.vlgmr.msra.gmra.mrb[140].mxu1 %vm2766_vm11, %v6614_v30  ;;  %v6647_v30 = vld [vmem:[%s8175_s9 + $0xf8] sm:$0xff]  }
 0xb7f   : > { %6250 = vmatprep.mubr.msk.bf16.mxu1 %vm6695_vm2, %v6693_v1  ;;  %6243 = vmatpush3.bf16.msra.mxu1 %v6617_v62 }
 0xb80   : > { %6244 = vmatprep.subr.bf16.mxu1 %v6693_v1 }
 0xb83   : > { %6245 = vmatpush3.bf16.msra.mxu1 %v6619_v61  ;;  %v6659_v61 = vld [vmem:[%s8175_s9 + $0x168] sm:$0xff]  }
 0xb84   : > { %6246 = vmatprep.subr.bf16.mxu1 %v6693_v1 }
 0xb87   : > { %6247 = vmatpush3.bf16.msra.mxu1 %v6621_v10  ;;  %v6661_v10 = vld [vmem:[%s8175_s9 + $0x170] sm:$0xff]  }
 0xb88   : > { %6248 = vmatprep.subr.bf16.mxu1 %v6693_v1 }
 0xb8b   : > { %6249 = vmatpush3.bf16.msra.mxu1 %v6623_v20  ;;  %v6663_v20 = vld [vmem:[%s8175_s9 + $0x178] sm:$0xff]  }
 0xb8c   : > { %6266 = vmatprep.subr.bf16.mxu1 %v6693_v1 }
 0xc41   : > { %v3680_v8 = vpop.f32.mrb[136].mxu1 }
 0xc42   : > { %v3687_v51 = vadd.f32 %v3680_v8, %v3571_v60  ;;  %v6208_v12 = vpop.f32.mrb[137].mxu1  ;;  %v6639_v60 = vld [vmem:[%s8175_s9 + $0xb8] sm:$0xff]   ;;  %v6650_v8 = vld [vmem:[%s8175_s9 + $0x100] sm:$0xff]  }
 0xc43   : > { %v3683_v50 = vpop.f32.mrb[138].mxu1  ;;  %v6651_v12 = vld [vmem:[%s8175_s9 + $0x128] sm:$0xff]  }
 0xc44   : > { %v3688_v19 = vadd.f32 %v3683_v50, %v3572_v16  ;;  %v6209_v24 = vpop.f32.mrb[139].mxu1  ;;  %v6652_v50 = vld [vmem:[%s8175_s9 + $0x108] sm:$0xff]  }
 0xc45   : > { %v6654_v24 = vld [vmem:[%s8175_s9 + $0x110] sm:$0xff]  }
 0xc51   : > { %v3734_v37 = vpop.f32.mrb[140].mxu1 }
 0xc52   : > { %v6220_v31 = vpop.f32.mrb[141].mxu1 }
 0xc53   : > { %v3737_v41 = vpop.f32.mrb[142].mxu1  ;;  %v6656_v31 = vld [vmem:[%s8175_s9 + $0x118] sm:$0xff]  }
 0xc54   : > { %v3741_v56 = vpack.c.bf16 %v3737_v41, %v3734_v37  ;;  %v6221_v58 = vpop.f32.mrb[143].mxu1  ;;  %v6655_v37 = vld [vmem:[%s8175_s9 + $0x138] sm:$0xff]   ;;  %v6657_v41 = vld [vmem:[%s8175_s9 + $0x160] sm:$0xff]  }
 0xc56   : > { %6227 = vmatmul.mubr.msk.bf16.vlgmr.msra.gmra.mrb[160].mxu0 %vm2892_vm12, %v3741_v56  ;;  %v6658_v56 = vld [vmem:[%s8175_s9 + $0x140] sm:$0xff]  }
 0xc57   : > { %6231 = vmatpush3.bf16.msra.mxu0 %v6618_v46  ;;  %6238 = vmatprep.mubr.msk.bf16.mxu0 %vm6695_vm2, %v6693_v1 }
 0xc58   : > { %6232 = vmatprep.subr.bf16.mxu0 %v6693_v1 }
 0xc5b   : > { %6233 = vmatpush3.bf16.msra.mxu0 %v6620_v4  ;;  %v6660_v4 = vld [vmem:[%s8175_s9 + $0x148] sm:$0xff]  }
 0xc5c   : > { %6234 = vmatprep.subr.bf16.mxu0 %v6693_v1 }
 0xc5f   : > { %6235 = vmatpush3.bf16.msra.mxu0 %v6622_v17  ;;  %v6662_v17 = vld [vmem:[%s8175_s9 + $0x150] sm:$0xff]  }
 0xc60   : > { %6236 = vmatprep.subr.bf16.mxu0 %v6693_v1 }
 0xc63   : > { %6237 = vmatpush3.bf16.msra.mxu0 %v6624_v18  ;;  %v6664_v18 = vld [vmem:[%s8175_s9 + $0x158] sm:$0xff]  }
 0xc64   : > { %6254 = vmatprep.subr.bf16.mxu0 %v6693_v1 }
 0xd29   : > { %v3796_v25 = vpop.f32.mrb[160].mxu0 }
 0xd2a   : > { %v3803_v38 = vadd.f32 %v3796_v25, %v3687_v51  ;;  %v6228_v42 = vpop.f32.mrb[161].mxu0  ;;  %v6665_v25 = vld [vmem:[%s8175_s9 + $0x1a0] sm:$0xff]  }
 0xd2b   : > { %v3799_v2 = vpop.f32.mrb[162].mxu0 }
 0xd2c   : > { %v3812_v63 = vadd.f32 %v5492_v29, %v3803_v38  ;;  %v3804_v26 = vadd.f32 %v3799_v2, %v3688_v19  ;;  %v6229_v40 = vpop.f32.mrb[163].mxu0  ;;  %v6653_v19 = vld [vmem:[%s8175_s9 + $0x130] sm:$0xff]   ;;  %v6666_v38 = vld [vmem:[%s8175_s9 + $0x180] sm:$0xff]   ;;  %v6667_v2 = vld [vmem:[%s8175_s9 + $0x1a8] sm:$0xff]  }
 0xd2d   : > { %v6670_v40 = vld [vmem:[%s8175_s9 + $0x190] sm:$0xff]  }
 0xd2e   : > { %v3816_v23 = vmul.f32 0.2, %v3812_v63  ;;  %v3813_v28 = vadd.f32 %v5492_v29, %v3804_v26  ;;  %vm3814_vm13 = vcmp.gt.f32.partialorder %v3812_v63, 0.0  ;;  %v6669_v26 = vld [vmem:[%s8175_s9 + $0x1b0] sm:$0xff]  }
 0xd30   : > { %vm3815_vm14 = vcmp.gt.f32.partialorder %v3813_v28, 0.0  ;;  %v3817_v32 = vmul.f32 0.2, %v3813_v28  ;;  %v3818_v34 = vsel %vm3814_vm13, %v3812_v63, %v3816_v23  ;;  %v6668_v63 = vld [vmem:[%s8175_s9 + $0x188] sm:$0xff]   ;;  %v6671_v23 = vld [vmem:[%s8175_s9 + $0x1b8] sm:$0xff]  }
 0xd32   : > { %v3819_v43 = vsel %vm3815_vm14, %v3813_v28, %v3817_v32  ;;  %v6672_v28 = vld [vmem:[%s8175_s9 + $0x198] sm:$0xff]   ;;  %v6673_v32 = vld [vmem:[%s8175_s9 + $0x1e0] sm:$0xff]  }
 0xd33   : > { %v7868_v54 = vpack.c.bf16 %v3819_v43, %v3818_v34  ;;  %v6674_v43 = vld [vmem:[%s8175_s9 + $0x1c0] sm:$0xff]  }
 0xd35   : > { %6251 = vmatmul.mubr.msk.bf16.vlgmr.msra.gmra.mrb[144].mxu1 %vm3865_vm15, %v7868_v54  ;;  %v7876_v0 = vshrl.u32 %v7868_v54, 16  ;;  %v3985_v36 = vrot.slane %v7868_v54, 1  ;;  %v4141_v55 = vrot.slane %v7868_v54, 2  ;;  %v4297_v51 = vrot.slane %v7868_v54, 3 }
 0xd36   : > { %6267 = vmatpush3.bf16.msra.mxu1 %v6625_v22  ;;  %6274 = vmatprep.mubr.msk.bf16.mxu1 %vm6695_vm2, %v6693_v1  ;;  %v4453_v58 = vrot.slane %v7868_v54, 4  ;;  %v4609_v42 = vrot.slane %v7868_v54, 5  ;;  %v4765_v22 = vrot.slane %v7868_v54, 6 }
 0xd37   : > { %6239 = vmatmul.mubr.msk.bf16.vlgmr.msra.gmra.mrb[164].mxu0 %vm3865_vm15, %v7876_v0  ;;  %6268 = vmatprep.subr.bf16.mxu1 %v6693_v1  ;;  %v4063_v48 = vrot.slane %v7876_v0, 1  ;;  %v4219_v16 = vrot.slane %v7876_v0, 2  ;;  %v4375_v62 = vrot.slane %v7876_v0, 3  ;;  %v4531_v46 = vrot.slane %v7876_v0, 4 }
 0xd38   : > { %6255 = vmatpush3.bf16.msra.mxu0 %v6626_v7  ;;  %6262 = vmatprep.mubr.msk.bf16.mxu0 %vm6695_vm2, %v6693_v1  ;;  %v4687_v29 = vrot.slane %v7876_v0, 5  ;;  %v4843_v34 = vrot.slane %v7876_v0, 6  ;;  %v6675_v7 = vld [vmem:[%s8175_s9 + $0x1e8] sm:$0xff]  }
 0xd39   : > { %6256 = vmatprep.subr.bf16.mxu0 %v6693_v1 }
 0xd3a   : > { %6269 = vmatpush3.bf16.msra.mxu1 %v6627_v5  ;;  %v6676_v5 = vld [vmem:[%s8175_s9 + $0x1c8] sm:$0xff]  }
 0xd3b   : > { %6270 = vmatprep.subr.bf16.mxu1 %v6693_v1 }
 0xd3c   : > { %6257 = vmatpush3.bf16.msra.mxu0 %v6628_v6  ;;  %v6677_v6 = vld [vmem:[%s8175_s9 + $0x1f0] sm:$0xff]  }
 0xd3d   : > { %6258 = vmatprep.subr.bf16.mxu0 %v6693_v1 }
 0xd3e   : > { %6271 = vmatpush3.bf16.msra.mxu1 %v6629_v9  ;;  %v6678_v9 = vld [vmem:[%s8175_s9 + $0x1d0] sm:$0xff]  }
 0xd3f   : > { %6272 = vmatprep.subr.bf16.mxu1 %v6693_v1 }
 0xd40   : > { %6259 = vmatpush3.bf16.msra.mxu0 %v6630_v13  ;;  %v6679_v13 = vld [vmem:[%s8175_s9 + $0x1f8] sm:$0xff]  }
 0xd41   : > { %6260 = vmatprep.subr.bf16.mxu0 %v6693_v1 }
 0xd42   : > { %6273 = vmatpush3.bf16.msra.mxu1 %v6631_v35  ;;  %v6680_v35 = vld [vmem:[%s8175_s9 + $0x1d8] sm:$0xff]  }
 0xd43   : > { %6290 = vmatprep.subr.bf16.mxu1 %v6693_v1 }
 0xd44   : > { %6261 = vmatpush3.bf16.msra.mxu0 %v6632_v45  ;;  %v4999_v45 = vrot.slane %v7876_v0, 7 }
 0xd45   : > { %6275 = vmatmul.mubr.msk.bf16.vlgmr.msra.gmra.mrb[148].mxu1 %vm3865_vm15, %v4063_v48  ;;  %6278 = vmatprep.subr.bf16.mxu0 %v6693_v1 }
 0xd46   : > { %6291 = vmatpush3.bf16.msra.mxu1 %v6633_v47  ;;  %6298 = vmatprep.mubr.msk.bf16.mxu1 %vm6695_vm2, %v6693_v1  ;;  %v4921_v47 = vrot.slane %v7868_v54, 7 }
 0xd47   : > { %6263 = vmatmul.mubr.msk.bf16.vlgmr.msra.gmra.mrb[168].mxu0 %vm3865_vm15, %v3985_v36  ;;  %6292 = vmatprep.subr.bf16.mxu1 %v6693_v1 }
 0xd48   : > { %6279 = vmatpush3.bf16.msra.mxu0 %v6634_v49  ;;  %6286 = vmatprep.mubr.msk.bf16.mxu0 %vm6695_vm2, %v6693_v1 }
 0xd49   : > { %6280 = vmatprep.subr.bf16.mxu0 %v6693_v1 }
 0xd4a   : > { %6293 = vmatpush3.bf16.msra.mxu1 %v6635_v52 }
 0xd4b   : > { %6294 = vmatprep.subr.bf16.mxu1 %v6693_v1 }
 0xd4c   : > { %6281 = vmatpush3.bf16.msra.mxu0 %v6636_v53 }
 0xd4d   : > { %6282 = vmatprep.subr.bf16.mxu0 %v6693_v1 }
 0xd4e   : > { %6295 = vmatpush3.bf16.msra.mxu1 %v6637_v57 }
 0xd4f   : > { %6296 = vmatprep.subr.bf16.mxu1 %v6693_v1 }
 0xd50   : > { %6283 = vmatpush3.bf16.msra.mxu0 %v6638_v59 }
 0xd51   : > { %6284 = vmatprep.subr.bf16.mxu0 %v6693_v1 }
 0xd52   : > { %6297 = vmatpush3.bf16.msra.mxu1 %v6639_v60 }
 0xd53   : > { %6314 = vmatprep.subr.bf16.mxu1 %v6693_v1 }
 0xd54   : > { %6285 = vmatpush3.bf16.msra.mxu0 %v6640_v11 }
 0xd55   : > { %6299 = vmatmul.mubr.msk.bf16.vlgmr.msra.gmra.mrb[152].mxu1 %vm3865_vm15, %v4219_v16  ;;  %6302 = vmatprep.subr.bf16.mxu0 %v6693_v1 }
 0xd56   : > { %6315 = vmatpush3.bf16.msra.mxu1 %v6641_v15  ;;  %6322 = vmatprep.mubr.msk.bf16.mxu1 %vm6695_vm2, %v6693_v1 }
 0xd57   : > { %6287 = vmatmul.mubr.msk.bf16.vlgmr.msra.gmra.mrb[172].mxu0 %vm3865_vm15, %v4141_v55  ;;  %6316 = vmatprep.subr.bf16.mxu1 %v6693_v1 }
 0xd58   : > { %6303 = vmatpush3.bf16.msra.mxu0 %v6642_v33  ;;  %6310 = vmatprep.mubr.msk.bf16.mxu0 %vm6695_vm2, %v6693_v1 }
 0xd59   : > { %6304 = vmatprep.subr.bf16.mxu0 %v6693_v1 }
 0xd5a   : > { %6317 = vmatpush3.bf16.msra.mxu1 %v6643_v3 }
 0xd5b   : > { %6318 = vmatprep.subr.bf16.mxu1 %v6693_v1 }
 0xd5c   : > { %6305 = vmatpush3.bf16.msra.mxu0 %v6644_v14 }
 0xd5d   : > { %6306 = vmatprep.subr.bf16.mxu0 %v6693_v1 }
 0xd5e   : > { %6319 = vmatpush3.bf16.msra.mxu1 %v6645_v27 }
 0xd5f   : > { %6320 = vmatprep.subr.bf16.mxu1 %v6693_v1 }
 0xd60   : > { %6307 = vmatpush3.bf16.msra.mxu0 %v6646_v39 }
 0xd61   : > { %6308 = vmatprep.subr.bf16.mxu0 %v6693_v1 }
 0xd62   : > { %6321 = vmatpush3.bf16.msra.mxu1 %v6647_v30 }
 0xd63   : > { %6338 = vmatprep.subr.bf16.mxu1 %v6693_v1 }
 0xd64   : > { %6309 = vmatpush3.bf16.msra.mxu0 %v6648_v44 }
 0xd65   : > { %6323 = vmatmul.mubr.msk.bf16.vlgmr.msra.gmra.mrb[156].mxu1 %vm3865_vm15, %v4375_v62  ;;  %6326 = vmatprep.subr.bf16.mxu0 %v6693_v1 }
 0xd66   : > { %6339 = vmatpush3.bf16.msra.mxu1 %v6649_v21  ;;  %6346 = vmatprep.mubr.msk.bf16.mxu1 %vm6695_vm2, %v6693_v1 }
 0xd67   : > { %6311 = vmatmul.mubr.msk.bf16.vlgmr.msra.gmra.mrb[176].mxu0 %vm3865_vm15, %v4297_v51  ;;  %6340 = vmatprep.subr.bf16.mxu1 %v6693_v1 }
 0xd68   : > { %6327 = vmatpush3.bf16.msra.mxu0 %v6650_v8  ;;  %6334 = vmatprep.mubr.msk.bf16.mxu0 %vm6695_vm2, %v6693_v1 }
 0xd69   : > { %6328 = vmatprep.subr.bf16.mxu0 %v6693_v1 }
 0xd6a   : > { %6341 = vmatpush3.bf16.msra.mxu1 %v6651_v12 }
 0xd6b   : > { %6342 = vmatprep.subr.bf16.mxu1 %v6693_v1 }
 0xd6c   : > { %6329 = vmatpush3.bf16.msra.mxu0 %v6652_v50 }
 0xd6d   : > { %6330 = vmatprep.subr.bf16.mxu0 %v6693_v1 }
 0xd6e   : > { %6343 = vmatpush3.bf16.msra.mxu1 %v6653_v19 }
 0xd6f   : > { %6344 = vmatprep.subr.bf16.mxu1 %v6693_v1 }
 0xd70   : > { %6331 = vmatpush3.bf16.msra.mxu0 %v6654_v24 }
 0xd71   : > { %6332 = vmatprep.subr.bf16.mxu0 %v6693_v1 }
 0xd72   : > { %6345 = vmatpush3.bf16.msra.mxu1 %v6655_v37 }
 0xd73   : > { %6362 = vmatprep.subr.bf16.mxu1 %v6693_v1 }
 0xd74   : > { %6333 = vmatpush3.bf16.msra.mxu0 %v6656_v31 }
 0xd75   : > { %6347 = vmatmul.mubr.msk.bf16.vlgmr.msra.gmra.mrb[160].mxu1 %vm3865_vm15, %v4531_v46  ;;  %6350 = vmatprep.subr.bf16.mxu0 %v6693_v1 }
 0xd76   : > { %6363 = vmatpush3.bf16.msra.mxu1 %v6657_v41  ;;  %6370 = vmatprep.mubr.msk.bf16.mxu1 %vm6695_vm2, %v6693_v1 }
 0xd77   : > { %6335 = vmatmul.mubr.msk.bf16.vlgmr.msra.gmra.mrb[180].mxu0 %vm3865_vm15, %v4453_v58  ;;  %6364 = vmatprep.subr.bf16.mxu1 %v6693_v1 }
 0xd78   : > { %6351 = vmatpush3.bf16.msra.mxu0 %v6658_v56  ;;  %6358 = vmatprep.mubr.msk.bf16.mxu0 %vm6695_vm2, %v6693_v1 }
 0xd79   : > { %6352 = vmatprep.subr.bf16.mxu0 %v6693_v1 }
 0xd7a   : > { %6365 = vmatpush3.bf16.msra.mxu1 %v6659_v61 }
 0xd7b   : > { %6366 = vmatprep.subr.bf16.mxu1 %v6693_v1 }
 0xd7c   : > { %6353 = vmatpush3.bf16.msra.mxu0 %v6660_v4 }
 0xd7d   : > { %6354 = vmatprep.subr.bf16.mxu0 %v6693_v1 }
 0xd7e   : > { %6367 = vmatpush3.bf16.msra.mxu1 %v6661_v10 }
 0xd7f   : > { %6368 = vmatprep.subr.bf16.mxu1 %v6693_v1 }
 0xd80   : > { %6355 = vmatpush3.bf16.msra.mxu0 %v6662_v17 }
 0xd81   : > { %6356 = vmatprep.subr.bf16.mxu0 %v6693_v1 }
 0xd82   : > { %6369 = vmatpush3.bf16.msra.mxu1 %v6663_v20 }
 0xd83   : > { %6386 = vmatprep.subr.bf16.mxu1 %v6693_v1 }
 0xd84   : > { %6357 = vmatpush3.bf16.msra.mxu0 %v6664_v18 }
 0xd85   : > { %6371 = vmatmul.mubr.msk.bf16.vlgmr.msra.gmra.mrb[164].mxu1 %vm3865_vm15, %v4687_v29  ;;  %6374 = vmatprep.subr.bf16.mxu0 %v6693_v1 }
 0xd86   : > { %6387 = vmatpush3.bf16.msra.mxu1 %v6665_v25  ;;  %6394 = vmatprep.mubr.msk.bf16.mxu1 %vm6695_vm2, %v6693_v1 }
 0xd87   : > { %6359 = vmatmul.mubr.msk.bf16.vlgmr.msra.gmra.mrb[184].mxu0 %vm3865_vm15, %v4609_v42  ;;  %6388 = vmatprep.subr.bf16.mxu1 %v6693_v1 }
 0xd88   : > { %6375 = vmatpush3.bf16.msra.mxu0 %v6666_v38  ;;  %6382 = vmatprep.mubr.msk.bf16.mxu0 %vm6695_vm2, %v6693_v1 }
 0xd89   : > { %6376 = vmatprep.subr.bf16.mxu0 %v6693_v1 }
 0xd8a   : > { %6389 = vmatpush3.bf16.msra.mxu1 %v6667_v2 }
 0xd8b   : > { %6390 = vmatprep.subr.bf16.mxu1 %v6693_v1 }
 0xd8c   : > { %6377 = vmatpush3.bf16.msra.mxu0 %v6668_v63 }
 0xd8d   : > { %6378 = vmatprep.subr.bf16.mxu0 %v6693_v1 }
 0xd8e   : > { %6391 = vmatpush3.bf16.msra.mxu1 %v6669_v26 }
 0xd8f   : > { %6392 = vmatprep.subr.bf16.mxu1 %v6693_v1 }
 0xd90   : > { %6379 = vmatpush3.bf16.msra.mxu0 %v6670_v40 }
 0xd91   : > { %6380 = vmatprep.subr.bf16.mxu0 %v6693_v1 }
 0xd92   : > { %6393 = vmatpush3.bf16.msra.mxu1 %v6671_v23 }
 0xd93   : > { %6410 = vmatprep.subr.bf16.mxu1 %v6693_v1 }
 0xd94   : > { %6381 = vmatpush3.bf16.msra.mxu0 %v6672_v28 }
 0xd95   : > { %6395 = vmatmul.mubr.msk.bf16.vlgmr.msra.gmra.mrb[168].mxu1 %vm3865_vm15, %v4843_v34  ;;  %6398 = vmatprep.subr.bf16.mxu0 %v6693_v1 }
 0xd96   : > { %6411 = vmatpush3.bf16.msra.mxu1 %v6673_v32  ;;  %6418 = vmatprep.mubr.msk.bf16.mxu1 %vm6695_vm2, %v6693_v1 }
 0xd97   : > { %6383 = vmatmul.mubr.msk.bf16.vlgmr.msra.gmra.mrb[188].mxu0 %vm3865_vm15, %v4765_v22  ;;  %6412 = vmatprep.subr.bf16.mxu1 %v6693_v1 }
 0xd98   : > { %6399 = vmatpush3.bf16.msra.mxu0 %v6674_v43  ;;  %6406 = vmatprep.mubr.msk.bf16.mxu0 %vm6695_vm2, %v6693_v1 }
 0xd99   : > { %6400 = vmatprep.subr.bf16.mxu0 %v6693_v1 }
 0xd9a   : > { %6413 = vmatpush3.bf16.msra.mxu1 %v6675_v7 }
 0xd9b   : > { %6414 = vmatprep.subr.bf16.mxu1 %v6693_v1 }
 0xd9c   : > { %6401 = vmatpush3.bf16.msra.mxu0 %v6676_v5 }
 0xd9d   : > { %6402 = vmatprep.subr.bf16.mxu0 %v6693_v1 }
 0xd9e   : > { %6415 = vmatpush3.bf16.msra.mxu1 %v6677_v6 }
 0xd9f   : > { %6416 = vmatprep.subr.bf16.mxu1 %v6693_v1 }
 0xda0   : > { %6403 = vmatpush3.bf16.msra.mxu0 %v6678_v9 }
 0xda1   : > { %6404 = vmatprep.subr.bf16.mxu0 %v6693_v1 }
 0xda2   : > { %6417 = vmatpush3.bf16.msra.mxu1 %v6679_v13 }
 0xda4   : > { %6405 = vmatpush3.bf16.msra.mxu0 %v6680_v35 }
 0xda5   : > { %6419 = vmatmul.mubr.msk.bf16.vlgmr.msra.gmra.mrb[172].mxu1 %vm3865_vm15, %v4999_v45 }
 0xda7   : > { %6407 = vmatmul.mubr.msk.bf16.vlgmr.msra.gmra.mrb[192].mxu0 %vm3865_vm15, %v4921_v47 }
 0xe08   : > { %v3969_v48 = vpop.f32.mrb[144].mxu1 }
 0xe09   : > { %v6252_v49 = vpop.f32.mrb[145].mxu1 }
 0xe0a   : > { %v3903_v36 = vpop.f32.mrb[164].mxu0  ;;  %v3972_v52 = vpop.f32.mrb[146].mxu1 }
 0xe0b   : > { %v3970_v53 = vadd.f32 %v3969_v48, %v3903_v36  ;;  %v6240_v57 = vpop.f32.mrb[165].mxu0  ;;  %v6253_v59 = vpop.f32.mrb[147].mxu1 }
 0xe0c   : > { %v3906_v60 = vpop.f32.mrb[166].mxu0 }
 0xe0d   : > { %v6241_v11 = vpop.f32.mrb[167].mxu0 }
 0xe18   : > { %v4125_v1 = vpop.f32.mrb[148].mxu1 }
 0xe19   : > { %v6276_v15 = vpop.f32.mrb[149].mxu1 }
 0xe1a   : > { %v4047_v16 = vpop.f32.mrb[168].mxu0  ;;  %v4128_v0 = vpop.f32.mrb[150].mxu1 }
 0xe1b   : > { %v4053_v33 = vadd.f32 %v4047_v16, %v3970_v53  ;;  %v6264_v55 = vpop.f32.mrb[169].mxu0  ;;  %v6277_v3 = vpop.f32.mrb[151].mxu1  ;;  %v5068_v0 = vld [vmem:[%s8176_s10] sm:$0x1] }
 0xe1c   : > { %v4050_v14 = vpop.f32.mrb[170].mxu0 }
 0xe1d   : > { %v6265_v54 = vpop.f32.mrb[171].mxu0  ;;  %v4131_v27 = vadd.f32 %v4125_v1, %v4053_v33 }
 0xe28   : > { %v4281_v39 = vpop.f32.mrb[152].mxu1 }
 0xe29   : > { %v6300_v30 = vpop.f32.mrb[153].mxu1 }
 0xe2a   : > { %v4203_v44 = vpop.f32.mrb[172].mxu0  ;;  %v4284_v21 = vpop.f32.mrb[154].mxu1 }
 0xe2b   : > { %v4209_v62 = vadd.f32 %v4203_v44, %v4131_v27  ;;  %v6288_v8 = vpop.f32.mrb[173].mxu0  ;;  %v6301_v51 = vpop.f32.mrb[155].mxu1  ;;  %v5073_v27 = vld [vmem:[%s8177_s11] sm:$0x1] }
 0xe2c   : > { %v4206_v12 = vpop.f32.mrb[174].mxu0  ;;  %v5078_v21 = vld [vmem:[#allocation2] sm:$0x1] }
 0xe2d   : > { %v6289_v50 = vpop.f32.mrb[175].mxu0  ;;  %v4287_v19 = vadd.f32 %v4281_v39, %v4209_v62 }
 0xe38   : > { %v4437_v24 = vpop.f32.mrb[156].mxu1 }
 0xe39   : > { %v6324_v37 = vpop.f32.mrb[157].mxu1 }
 0xe3a   : > { %v4359_v31 = vpop.f32.mrb[176].mxu0  ;;  %v4440_v41 = vpop.f32.mrb[158].mxu1 }
 0xe3b   : > { %v4365_v46 = vadd.f32 %v4359_v31, %v4287_v19  ;;  %v6312_v56 = vpop.f32.mrb[177].mxu0  ;;  %v6325_v58 = vpop.f32.mrb[159].mxu1 }
 0xe3c   : > { %v4362_v61 = vpop.f32.mrb[178].mxu0 }
 0xe3d   : > { %v6313_v4 = vpop.f32.mrb[179].mxu0  ;;  %v4443_v10 = vadd.f32 %v4437_v24, %v4365_v46 }
 0xe48   : > { %v4593_v17 = vpop.f32.mrb[160].mxu1 }
 0xe49   : > { %v6348_v20 = vpop.f32.mrb[161].mxu1 }
 0xe4a   : > { %v4515_v18 = vpop.f32.mrb[180].mxu0  ;;  %v4596_v25 = vpop.f32.mrb[162].mxu1 }
 0xe4b   : > { %v4521_v29 = vadd.f32 %v4515_v18, %v4443_v10  ;;  %v6336_v38 = vpop.f32.mrb[181].mxu0  ;;  %v6349_v42 = vpop.f32.mrb[163].mxu1 }
 0xe4c   : > { %v4518_v2 = vpop.f32.mrb[182].mxu0 }
 0xe4d   : > { %v6337_v63 = vpop.f32.mrb[183].mxu0  ;;  %v4599_v26 = vadd.f32 %v4593_v17, %v4521_v29 }
 0xe58   : > { %v4749_v40 = vpop.f32.mrb[164].mxu1 }
 0xe59   : > { %v6372_v23 = vpop.f32.mrb[165].mxu1 }
 0xe5a   : > { %v4671_v28 = vpop.f32.mrb[184].mxu0  ;;  %v4752_v32 = vpop.f32.mrb[166].mxu1 }
 0xe5b   : > { %v4677_v34 = vadd.f32 %v4671_v28, %v4599_v26  ;;  %v6360_v43 = vpop.f32.mrb[185].mxu0  ;;  %v6373_v22 = vpop.f32.mrb[167].mxu1 }
 0xe5c   : > { %v4674_v7 = vpop.f32.mrb[186].mxu0 }
 0xe5d   : > { %v6361_v5 = vpop.f32.mrb[187].mxu0  ;;  %v4755_v6 = vadd.f32 %v4749_v40, %v4677_v34 }
 0xe68   : > { %v4905_v9 = vpop.f32.mrb[168].mxu1 }
 0xe69   : > { %v6396_v13 = vpop.f32.mrb[169].mxu1 }
 0xe6a   : > { %v4827_v35 = vpop.f32.mrb[188].mxu0  ;;  %v4908_v45 = vpop.f32.mrb[170].mxu1 }
 0xe6b   : > { %v4833_v47 = vadd.f32 %v4827_v35, %v4755_v6  ;;  %v6384_v48 = vpop.f32.mrb[189].mxu0  ;;  %v6397_v49 = vpop.f32.mrb[171].mxu1 }
 0xe6c   : > { %v4830_v36 = vpop.f32.mrb[190].mxu0 }
 0xe6d   : > { %v6385_v52 = vpop.f32.mrb[191].mxu0  ;;  %v4911_v53 = vadd.f32 %v4905_v9, %v4833_v47 }
 0xe78   : > { %v5061_v57 = vpop.f32.mrb[172].mxu1 }
 0xe79   : > { %v6420_v59 = vpop.f32.mrb[173].mxu1 }
 0xe7a   : > { %v4983_v60 = vpop.f32.mrb[192].mxu0  ;;  %v5064_v11 = vpop.f32.mrb[174].mxu1 }
 0xe7b   : > { %v4989_v1 = vadd.f32 %v4983_v60, %v4911_v53  ;;  %v6408_v15 = vpop.f32.mrb[193].mxu0  ;;  %v6421_v16 = vpop.f32.mrb[175].mxu1 }
 0xe7c   : > { %v4986_v33 = vpop.f32.mrb[194].mxu0 }
 0xe7d   : > { %v5067_v55 = vadd.f32 %v5061_v57, %v4989_v1  ;;  %v6409_v3 = vpop.f32.mrb[195].mxu0 }
 0xe7f   : > { %v5069_v14 = vadd.f32 %v5068_v0, %v5067_v55 }
 0xe81   : > { %vm5070_vm2 = vcmp.gt.f32.partialorder %v5069_v14, 0.0  ;;  %v5071_v54 = vmul.f32 0.2, %v5069_v14 }
 0xe83   : > { %v5072_v39 = vsel %vm5070_vm2, %v5069_v14, %v5071_v54 }
 0xe84   : > { %v5074_v30 = vmul.f32 %v5073_v27, %v5072_v39 }
 0xe86   : > { %v5075_v44 = vsel %vm2770_vm10, %v5074_v30, 0.0 }
 0xe87   : > { %5076 = vadd.xlane.f32.xlu0 %v5075_v44 }
 0xf14   : > { %v5077_v62 = vpop.xlane.xlu0 %5076 }
 0xf15   : > { %v5079_v8 = vadd.f32 %v5078_v21, %v5077_v62 }
 0xf17   : > { %v5080_v51 = vsub.f32 0.0, %v5079_v8 }
 0xf19   : > { %v5081_v12 = vmul.f32 1.442695, %v5080_v51 }
 0xf1b   : > { %6681 = vpow2.f32 %v5081_v12 }
 0xf25   : > { %v6682_v50 = vpop.eup %6681 }
 0xf26   : > { %v5083_v19 = vadd.f32 1.0, %v6682_v50 }
 0xf28   : > { %6683 = vrcp.f32 %v5083_v19 }
 0xf32   : > { %v6684_v24 = vpop.eup %6683 }
 0xf33   : > { %5088 = vperm.xlu0 %6467, %v6684_v24  }
 0xfb2   : > { %v5089_v37 = vpop.permute.xlu0 %5088 }
 0xfb3   : > { %5091 = vst [vmem:[%s438_s19] sm:$0x1] %v5089_v37 }
 0xfb4 PF: > { %s25_s27 = sadd.s32 1, %s6691_s27  }
 0xfb5   : > { %p22_p4 = scmp.ge.s32.totalorder %s25_s27, 4  }
 0xfb7   :  { %24 = sbr.rel (!%p22_p4) target bundleno = 3 (0x3), region = 149 }

</bundles_post_ra>
